<compile_context>
chip_gen: v7x
topology: tpu7x:2x2x1
jax: 0.10.0
libtpu: 0.0.40
codegen_flags: <defaults>
</compile_context>

<pallas_src>
import numpy as np

import jax
import jax.numpy as jnp
from jax.experimental import pallas as pl
from jax.experimental.pallas import tpu as pltpu

# Keep f32 numerics everywhere (kernel and reference) for a tight check.
jax.config.update("jax_default_matmul_precision", "highest")
_PRECISION = jax.lax.Precision.HIGHEST


def _dot(a, b):
    return jnp.dot(a, b, preferred_element_type=jnp.float32, precision=_PRECISION)


def make_chenxi_forward(N, C_in, H, W, C1, C2, num_classes):
    """Build (forward, prepare_params) for the fused ChenXi forward pass."""
    assert H % 4 == 0 and W % 4 == 0

    # Layer-1 geometry: conv1 reads the zero-padded (H+2, W+2) frame, flattened
    # per channel so a (kh, kw) tap is a uniform shift along the flat axis.
    Hp1, Wp1 = H + 2, W + 2
    F1 = Hp1 * Wp1                 # flat padded frame size (per image, layer 1)
    MG1 = Wp1 + 1                  # margin so every 3x3 tap is an in-bounds slice
    A1W = F1 + 2 * MG1             # conv1 input-frame width
    F1A = F1 - Wp1 - 1             # number of 2x2 pool anchors materialized

    H2, W2 = H // 2, W // 2        # spatial size after pool1
    Hp2, Wp2 = H2 + 2, W2 + 2
    F2 = Hp2 * Wp2
    MG2 = Wp2 + 1
    A2W = F2 + 2 * MG2
    F2A = F2 - Wp2 - 1

    H3, W3 = H2 // 2, W2 // 2      # spatial size after pool2
    S3 = H3 * W3                   # per-channel features seen by the classifier

    # ---- precomputed 0/1 pooling "placement" matrices (shape-only constants) --
    # g1[q, col]: take the 2x2 max anchored at flat position q of the layer-1
    # frame and drop it at interior column `col` of the zero-padded layer-2
    # frame.  Padding columns stay all-zero, which *is* conv2's zero padding.
    g1_np = np.zeros((F1A, A2W), np.float32)
    for ho in range(H2):
        for wo in range(W2):
            q = (1 + 2 * ho) * Wp1 + (1 + 2 * wo)
            g1_np[q, MG2 + (1 + ho) * Wp2 + (1 + wo)] = 1.0
    # g2 maps pool-2 anchors straight to the (h, w)-flattened classifier layout.
    g2_np = np.zeros((F2A, S3), np.float32)
    for ho in range(H3):
        for wo in range(W3):
            q = (1 + 2 * ho) * Wp2 + (1 + 2 * wo)
            g2_np[q, ho * W3 + wo] = 1.0

    # ------------------------------ fused kernel -------------------------------
    def kernel(x_ref, w1_ref, b1_ref, g1_ref, w2_ref, b2_ref, g2_ref,
               fcw_ref, fcb_ref, out_ref, y1_ref, a2_ref, y2_ref, z_ref):
        # conv1 (3x3, pad 1) + ReLU: nine shifted MXU matmuls on the flat frame.
        acc1 = None
        for kh in range(3):
            for kw in range(3):
                d = (kh - 1) * Wp1 + (kw - 1)
                tap = _dot(w1_ref[kh * 3 + kw],                    # [C1, C_in]
                           x_ref[:, MG1 + d:MG1 + d + F1])         # [C_in, F1]
                acc1 = tap if acc1 is None else acc1 + tap
        y1_ref[...] = jnp.maximum(acc1 + b1_ref[...], 0.0)         # [C1, F1]

        # maxpool1 2x2: shifted max + placement matmul into the padded frame.
        m1 = jnp.maximum(
            jnp.maximum(y1_ref[:, 0:F1A], y1_ref[:, 1:1 + F1A]),
            jnp.maximum(y1_ref[:, Wp1:Wp1 + F1A],
                        y1_ref[:, Wp1 + 1:Wp1 + 1 + F1A]))
        a2_ref[...] = _dot(m1, g1_ref[...])                        # [C1, A2W]

        # conv2 (3x3, pad 1) + ReLU.
        acc2 = None
        for kh in range(3):
            for kw in range(3):
                d = (kh - 1) * Wp2 + (kw - 1)
                tap = _dot(w2_ref[kh * 3 + kw],                    # [C2, C1]
                           a2_ref[:, MG2 + d:MG2 + d + F2])        # [C1, F2]
                acc2 = tap if acc2 is None else acc2 + tap
        y2_ref[...] = jnp.maximum(acc2 + b2_ref[...], 0.0)         # [C2, F2]

        # maxpool2 2x2 -> classifier input layout [C2, S3].
        m2 = jnp.maximum(
            jnp.maximum(y2_ref[:, 0:F2A], y2_ref[:, 1:1 + F2A]),
            jnp.maximum(y2_ref[:, Wp2:Wp2 + F2A],
                        y2_ref[:, Wp2 + 1:Wp2 + 1 + F2A]))
        z_ref[...] = _dot(m2, g2_ref[...])                         # [C2, S3]

        # classifier: Linear(C2*S3 -> num_classes), decomposed per spatial slot.
        acc3 = fcb_ref[...]                                        # [classes, 1]
        for s in range(S3):
            acc3 = acc3 + _dot(fcw_ref[s], z_ref[:, s:s + 1])
        out_ref[...] = acc3

    fused = pl.pallas_call(
        kernel,
        out_shape=jax.ShapeDtypeStruct((N, num_classes, 1), jnp.float32),
        grid=(N,),
        in_specs=[
            pl.BlockSpec((None, C_in, A1W), lambda n: (n, 0, 0)),      # x frame
            pl.BlockSpec((9, C1, C_in), lambda n: (0, 0, 0)),          # conv1 taps
            pl.BlockSpec((C1, 1), lambda n: (0, 0)),                   # conv1 bias
            pl.BlockSpec((F1A, A2W), lambda n: (0, 0)),                # pool1 placement
            pl.BlockSpec((9, C2, C1), lambda n: (0, 0, 0)),            # conv2 taps
            pl.BlockSpec((C2, 1), lambda n: (0, 0)),                   # conv2 bias
            pl.BlockSpec((F2A, S3), lambda n: (0, 0)),                 # pool2 placement
            pl.BlockSpec((S3, num_classes, C2), lambda n: (0, 0, 0)),  # fc weight
            pl.BlockSpec((num_classes, 1), lambda n: (0, 0)),          # fc bias
        ],
        out_specs=pl.BlockSpec((None, num_classes, 1), lambda n: (n, 0, 0)),
        scratch_shapes=[
            pltpu.VMEM((C1, F1), jnp.float32),    # conv1 activations (padded frame)
            pltpu.VMEM((C1, A2W), jnp.float32),   # pooled1 / conv2 input frame
            pltpu.VMEM((C2, F2), jnp.float32),    # conv2 activations
            pltpu.VMEM((C2, S3), jnp.float32),    # pooled2 (classifier input)
        ],
        compiler_params=pltpu.CompilerParams(
            dimension_semantics=("parallel",)),   # one image per step; megacore on v7x
    )

    def prepare_params(params):
        """One-time host-side weight repacking (hoisted out of the jitted forward)."""
        w1 = jnp.asarray(params["conv1_w"], jnp.float32)
        w2 = jnp.asarray(params["conv2_w"], jnp.float32)
        fw = jnp.asarray(params["fc_w"], jnp.float32)
        return {
            "w1": jnp.transpose(w1, (2, 3, 0, 1)).reshape(9, C1, C_in),
            "b1": jnp.asarray(params["conv1_b"], jnp.float32).reshape(C1, 1),
            "g1": jnp.asarray(g1_np),
            "w2": jnp.transpose(w2, (2, 3, 0, 1)).reshape(9, C2, C1),
            "b2": jnp.asarray(params["conv2_b"], jnp.float32).reshape(C2, 1),
            "g2": jnp.asarray(g2_np),
            "fcw": jnp.transpose(fw.reshape(num_classes, C2, S3), (2, 0, 1)),
            "fcb": jnp.asarray(params["fc_b"], jnp.float32).reshape(num_classes, 1),
        }

    @jax.jit
    def forward(x, prepped):
        # Tiny, input-only glue: zero-pad spatially, flatten per channel, add the
        # slice-validity margin.  Everything downstream happens in one kernel.
        xp = jnp.pad(x.astype(jnp.float32), ((0, 0), (0, 0), (1, 1), (1, 1)))
        frames = jnp.pad(xp.reshape(N, C_in, F1), ((0, 0), (0, 0), (MG1, MG1)))
        out = fused(frames, prepped["w1"], prepped["b1"], prepped["g1"],
                    prepped["w2"], prepped["b2"], prepped["g2"],
                    prepped["fcw"], prepped["fcb"])
        return out.reshape(N, num_classes)

    return forward, prepare_params


# --------------------------------------------------------------------------
# Pure-JAX reference (sanity check)
# --------------------------------------------------------------------------
def chenxi_reference(x, params):
    def conv(x, w, b):
        y = jax.lax.conv_general_dilated(
            x, w, window_strides=(1, 1), padding=((1, 1), (1, 1)),
            dimension_numbers=("NCHW", "OIHW", "NCHW"), precision=_PRECISION)
        return jnp.maximum(y + b[None, :, None, None], 0.0)

    def pool(x):
        return jax.lax.reduce_window(
            x, -jnp.inf, jax.lax.max, (1, 1, 2, 2), (1, 1, 2, 2), "VALID")

    h = pool(conv(x, params["conv1_w"], params["conv1_b"]))
    h = pool(conv(h, params["conv2_w"], params["conv2_b"]))
    h = h.reshape(h.shape[0], -1)
    return jnp.dot(h, params["fc_w"].T, precision=_PRECISION) + params["fc_b"]


# --------------------------------------------------------------------------
# Main
# --------------------------------------------------------------------------
if __name__ == "__main__":
    N, C_in, H, W = 2, 3, 16, 16
    C1, C2, num_classes = 8, 16, 10
    n_channel = C2 * (H // 4) * (W // 4)   # 16 * 4 * 4 = 256

    key = jax.random.PRNGKey(0)
    k_x, k1, k2, k3, k4, k5, k6 = jax.random.split(key, 7)
    x = jax.random.normal(k_x, (N, C_in, H, W), jnp.float32)
    params = {
        "conv1_w": 0.1 * jax.random.normal(k1, (C1, C_in, 3, 3), jnp.float32),
        "conv1_b": 0.1 * jax.random.normal(k2, (C1,), jnp.float32),
        "conv2_w": 0.1 * jax.random.normal(k3, (C2, C1, 3, 3), jnp.float32),
        "conv2_b": 0.1 * jax.random.normal(k4, (C2,), jnp.float32),
        "fc_w": 0.1 * jax.random.normal(k5, (num_classes, n_channel), jnp.float32),
        "fc_b": 0.1 * jax.random.normal(k6, (num_classes,), jnp.float32),
    }

    forward, prepare_params = make_chenxi_forward(
        N, C_in, H, W, C1, C2, num_classes)
    prepped = prepare_params(params)            # hoisted out of the jitted forward

    out = jax.block_until_ready(forward(x, prepped))
    assert out.shape == (N, num_classes), out.shape

    ref = jax.block_until_ready(chenxi_reference(x, params))
    assert jnp.allclose(out, ref, rtol=1e-3, atol=1e-3), (
        float(jnp.max(jnp.abs(out - ref))))

    print("KERNEL_OK")
</pallas_src>

<mosaic_0001>
module attributes {stable_mosaic.version = 11 : i64} {
  func.func @kernel(%arg0: i32, %arg1: memref<1x3x362xf32, #tpu.memory_space<vmem>>, %arg2: memref<9x8x3xf32, #tpu.memory_space<vmem>>, %arg3: memref<8x1xf32, #tpu.memory_space<vmem>>, %arg4: memref<305x122xf32, #tpu.memory_space<vmem>>, %arg5: memref<9x16x8xf32, #tpu.memory_space<vmem>>, %arg6: memref<16x1xf32, #tpu.memory_space<vmem>>, %arg7: memref<89x16xf32, #tpu.memory_space<vmem>>, %arg8: memref<16x10x16xf32, #tpu.memory_space<vmem>>, %arg9: memref<10x1xf32, #tpu.memory_space<vmem>>, %arg10: memref<1x10x1xf32, #tpu.memory_space<vmem>>, %arg11: memref<8x324xf32, #tpu.memory_space<vmem>>, %arg12: memref<8x122xf32, #tpu.memory_space<vmem>>, %arg13: memref<16x100xf32, #tpu.memory_space<vmem>>, %arg14: memref<16x16xf32, #tpu.memory_space<vmem>>) attributes {dimension_semantics = [#tpu.dimension_semantics<parallel>], iteration_bounds = array<i64: 2>, scalar_prefetch = 0 : i64, scratch_operands = 4 : i64, tpu.core_type = #tpu.core_type<tc>, window_params = [{transform_indices = @transform_0, window_bounds = array<i64: 1, 3, 362>}, {pipeline_mode = #tpu.pipeline_mode<synchronous>, transform_indices = @transform_1, window_bounds = array<i64: 9, 8, 3>}, {pipeline_mode = #tpu.pipeline_mode<synchronous>, transform_indices = @transform_2, window_bounds = array<i64: 8, 1>}, {pipeline_mode = #tpu.pipeline_mode<synchronous>, transform_indices = @transform_3, window_bounds = array<i64: 305, 122>}, {pipeline_mode = #tpu.pipeline_mode<synchronous>, transform_indices = @transform_4, window_bounds = array<i64: 9, 16, 8>}, {pipeline_mode = #tpu.pipeline_mode<synchronous>, transform_indices = @transform_5, window_bounds = array<i64: 16, 1>}, {pipeline_mode = #tpu.pipeline_mode<synchronous>, transform_indices = @transform_6, window_bounds = array<i64: 89, 16>}, {pipeline_mode = #tpu.pipeline_mode<synchronous>, transform_indices = @transform_7, window_bounds = array<i64: 16, 10, 16>}, {pipeline_mode = #tpu.pipeline_mode<synchronous>, transform_indices = @transform_8, window_bounds = array<i64: 10, 1>}, {transform_indices = @transform_9, window_bounds = array<i64: 1, 10, 1>}]} {
    %c0 = arith.constant 0 : index
    %c0_0 = arith.constant 0 : index
    %c0_1 = arith.constant 0 : index
    %0 = vector.load %arg2[%c0, %c0_0, %c0_1] : memref<9x8x3xf32, #tpu.memory_space<vmem>>, vector<1x8x3xf32>
    %1 = vector.shape_cast %0 : vector<1x8x3xf32> to vector<8x3xf32>
    %c0_2 = arith.constant 0 : index
    %c0_3 = arith.constant 0 : index
    %c0_4 = arith.constant 0 : index
    %2 = vector.load %arg1[%c0_2, %c0_3, %c0_4] : memref<1x3x362xf32, #tpu.memory_space<vmem>>, vector<1x3x324xf32>
    %3 = vector.shape_cast %2 : vector<1x3x324xf32> to vector<3x324xf32>
    %cst = arith.constant dense<0.000000e+00> : vector<8x324xf32>
    %4 = tpu.matmul %1, %3, %cst {dimension_numbers = #tpu.dot_dimension_numbers<[1], [0], [0], [1], [0, 0, 1, 1], [], []>, precision = #tpu.contract_precision<fp32>} : vector<8x3xf32>, vector<3x324xf32>, vector<8x324xf32> -> vector<8x324xf32>
    %c1 = arith.constant 1 : index
    %c0_5 = arith.constant 0 : index
    %c0_6 = arith.constant 0 : index
    %5 = vector.load %arg2[%c1, %c0_5, %c0_6] : memref<9x8x3xf32, #tpu.memory_space<vmem>>, vector<1x8x3xf32>
    %6 = vector.shape_cast %5 : vector<1x8x3xf32> to vector<8x3xf32>
    %c0_7 = arith.constant 0 : index
    %c0_8 = arith.constant 0 : index
    %c1_9 = arith.constant 1 : index
    %7 = vector.load %arg1[%c0_7, %c0_8, %c1_9] : memref<1x3x362xf32, #tpu.memory_space<vmem>>, vector<1x3x324xf32>
    %8 = vector.shape_cast %7 : vector<1x3x324xf32> to vector<3x324xf32>
    %cst_10 = arith.constant dense<0.000000e+00> : vector<8x324xf32>
    %9 = tpu.matmul %6, %8, %cst_10 {dimension_numbers = #tpu.dot_dimension_numbers<[1], [0], [0], [1], [0, 0, 1, 1], [], []>, precision = #tpu.contract_precision<fp32>} : vector<8x3xf32>, vector<3x324xf32>, vector<8x324xf32> -> vector<8x324xf32>
    %10 = arith.addf %4, %9 : vector<8x324xf32>
    %c2 = arith.constant 2 : index
    %c0_11 = arith.constant 0 : index
    %c0_12 = arith.constant 0 : index
    %11 = vector.load %arg2[%c2, %c0_11, %c0_12] : memref<9x8x3xf32, #tpu.memory_space<vmem>>, vector<1x8x3xf32>
    %12 = vector.shape_cast %11 : vector<1x8x3xf32> to vector<8x3xf32>
    %c0_13 = arith.constant 0 : index
    %c0_14 = arith.constant 0 : index
    %c2_15 = arith.constant 2 : index
    %13 = vector.load %arg1[%c0_13, %c0_14, %c2_15] : memref<1x3x362xf32, #tpu.memory_space<vmem>>, vector<1x3x324xf32>
    %14 = vector.shape_cast %13 : vector<1x3x324xf32> to vector<3x324xf32>
    %cst_16 = arith.constant dense<0.000000e+00> : vector<8x324xf32>
    %15 = tpu.matmul %12, %14, %cst_16 {dimension_numbers = #tpu.dot_dimension_numbers<[1], [0], [0], [1], [0, 0, 1, 1], [], []>, precision = #tpu.contract_precision<fp32>} : vector<8x3xf32>, vector<3x324xf32>, vector<8x324xf32> -> vector<8x324xf32>
    %16 = arith.addf %10, %15 : vector<8x324xf32>
    %c3 = arith.constant 3 : index
    %c0_17 = arith.constant 0 : index
    %c0_18 = arith.constant 0 : index
    %17 = vector.load %arg2[%c3, %c0_17, %c0_18] : memref<9x8x3xf32, #tpu.memory_space<vmem>>, vector<1x8x3xf32>
    %18 = vector.shape_cast %17 : vector<1x8x3xf32> to vector<8x3xf32>
    %c0_19 = arith.constant 0 : index
    %c0_20 = arith.constant 0 : index
    %c18 = arith.constant 18 : index
    %19 = vector.load %arg1[%c0_19, %c0_20, %c18] : memref<1x3x362xf32, #tpu.memory_space<vmem>>, vector<1x3x324xf32>
    %20 = vector.shape_cast %19 : vector<1x3x324xf32> to vector<3x324xf32>
    %cst_21 = arith.constant dense<0.000000e+00> : vector<8x324xf32>
    %21 = tpu.matmul %18, %20, %cst_21 {dimension_numbers = #tpu.dot_dimension_numbers<[1], [0], [0], [1], [0, 0, 1, 1], [], []>, precision = #tpu.contract_precision<fp32>} : vector<8x3xf32>, vector<3x324xf32>, vector<8x324xf32> -> vector<8x324xf32>
    %22 = arith.addf %16, %21 : vector<8x324xf32>
    %c4 = arith.constant 4 : index
    %c0_22 = arith.constant 0 : index
    %c0_23 = arith.constant 0 : index
    %23 = vector.load %arg2[%c4, %c0_22, %c0_23] : memref<9x8x3xf32, #tpu.memory_space<vmem>>, vector<1x8x3xf32>
    %24 = vector.shape_cast %23 : vector<1x8x3xf32> to vector<8x3xf32>
    %c0_24 = arith.constant 0 : index
    %c0_25 = arith.constant 0 : index
    %c19 = arith.constant 19 : index
    %25 = vector.load %arg1[%c0_24, %c0_25, %c19] : memref<1x3x362xf32, #tpu.memory_space<vmem>>, vector<1x3x324xf32>
    %26 = vector.shape_cast %25 : vector<1x3x324xf32> to vector<3x324xf32>
    %cst_26 = arith.constant dense<0.000000e+00> : vector<8x324xf32>
    %27 = tpu.matmul %24, %26, %cst_26 {dimension_numbers = #tpu.dot_dimension_numbers<[1], [0], [0], [1], [0, 0, 1, 1], [], []>, precision = #tpu.contract_precision<fp32>} : vector<8x3xf32>, vector<3x324xf32>, vector<8x324xf32> -> vector<8x324xf32>
    %28 = arith.addf %22, %27 : vector<8x324xf32>
    %c5 = arith.constant 5 : index
    %c0_27 = arith.constant 0 : index
    %c0_28 = arith.constant 0 : index
    %29 = vector.load %arg2[%c5, %c0_27, %c0_28] : memref<9x8x3xf32, #tpu.memory_space<vmem>>, vector<1x8x3xf32>
    %30 = vector.shape_cast %29 : vector<1x8x3xf32> to vector<8x3xf32>
    %c0_29 = arith.constant 0 : index
    %c0_30 = arith.constant 0 : index
    %c20 = arith.constant 20 : index
    %31 = vector.load %arg1[%c0_29, %c0_30, %c20] : memref<1x3x362xf32, #tpu.memory_space<vmem>>, vector<1x3x324xf32>
    %32 = vector.shape_cast %31 : vector<1x3x324xf32> to vector<3x324xf32>
    %cst_31 = arith.constant dense<0.000000e+00> : vector<8x324xf32>
    %33 = tpu.matmul %30, %32, %cst_31 {dimension_numbers = #tpu.dot_dimension_numbers<[1], [0], [0], [1], [0, 0, 1, 1], [], []>, precision = #tpu.contract_precision<fp32>} : vector<8x3xf32>, vector<3x324xf32>, vector<8x324xf32> -> vector<8x324xf32>
    %34 = arith.addf %28, %33 : vector<8x324xf32>
    %c6 = arith.constant 6 : index
    %c0_32 = arith.constant 0 : index
    %c0_33 = arith.constant 0 : index
    %35 = vector.load %arg2[%c6, %c0_32, %c0_33] : memref<9x8x3xf32, #tpu.memory_space<vmem>>, vector<1x8x3xf32>
    %36 = vector.shape_cast %35 : vector<1x8x3xf32> to vector<8x3xf32>
    %c0_34 = arith.constant 0 : index
    %c0_35 = arith.constant 0 : index
    %c36 = arith.constant 36 : index
    %37 = vector.load %arg1[%c0_34, %c0_35, %c36] : memref<1x3x362xf32, #tpu.memory_space<vmem>>, vector<1x3x324xf32>
    %38 = vector.shape_cast %37 : vector<1x3x324xf32> to vector<3x324xf32>
    %cst_36 = arith.constant dense<0.000000e+00> : vector<8x324xf32>
    %39 = tpu.matmul %36, %38, %cst_36 {dimension_numbers = #tpu.dot_dimension_numbers<[1], [0], [0], [1], [0, 0, 1, 1], [], []>, precision = #tpu.contract_precision<fp32>} : vector<8x3xf32>, vector<3x324xf32>, vector<8x324xf32> -> vector<8x324xf32>
    %40 = arith.addf %34, %39 : vector<8x324xf32>
    %c7 = arith.constant 7 : index
    %c0_37 = arith.constant 0 : index
    %c0_38 = arith.constant 0 : index
    %41 = vector.load %arg2[%c7, %c0_37, %c0_38] : memref<9x8x3xf32, #tpu.memory_space<vmem>>, vector<1x8x3xf32>
    %42 = vector.shape_cast %41 : vector<1x8x3xf32> to vector<8x3xf32>
    %c0_39 = arith.constant 0 : index
    %c0_40 = arith.constant 0 : index
    %c37 = arith.constant 37 : index
    %43 = vector.load %arg1[%c0_39, %c0_40, %c37] : memref<1x3x362xf32, #tpu.memory_space<vmem>>, vector<1x3x324xf32>
    %44 = vector.shape_cast %43 : vector<1x3x324xf32> to vector<3x324xf32>
    %cst_41 = arith.constant dense<0.000000e+00> : vector<8x324xf32>
    %45 = tpu.matmul %42, %44, %cst_41 {dimension_numbers = #tpu.dot_dimension_numbers<[1], [0], [0], [1], [0, 0, 1, 1], [], []>, precision = #tpu.contract_precision<fp32>} : vector<8x3xf32>, vector<3x324xf32>, vector<8x324xf32> -> vector<8x324xf32>
    %46 = arith.addf %40, %45 : vector<8x324xf32>
    %c8 = arith.constant 8 : index
    %c0_42 = arith.constant 0 : index
    %c0_43 = arith.constant 0 : index
    %47 = vector.load %arg2[%c8, %c0_42, %c0_43] : memref<9x8x3xf32, #tpu.memory_space<vmem>>, vector<1x8x3xf32>
    %48 = vector.shape_cast %47 : vector<1x8x3xf32> to vector<8x3xf32>
    %c0_44 = arith.constant 0 : index
    %c0_45 = arith.constant 0 : index
    %c38 = arith.constant 38 : index
    %49 = vector.load %arg1[%c0_44, %c0_45, %c38] : memref<1x3x362xf32, #tpu.memory_space<vmem>>, vector<1x3x324xf32>
    %50 = vector.shape_cast %49 : vector<1x3x324xf32> to vector<3x324xf32>
    %cst_46 = arith.constant dense<0.000000e+00> : vector<8x324xf32>
    %51 = tpu.matmul %48, %50, %cst_46 {dimension_numbers = #tpu.dot_dimension_numbers<[1], [0], [0], [1], [0, 0, 1, 1], [], []>, precision = #tpu.contract_precision<fp32>} : vector<8x3xf32>, vector<3x324xf32>, vector<8x324xf32> -> vector<8x324xf32>
    %52 = arith.addf %46, %51 : vector<8x324xf32>
    %c0_47 = arith.constant 0 : index
    %c0_48 = arith.constant 0 : index
    %53 = vector.load %arg3[%c0_47, %c0_48] : memref<8x1xf32, #tpu.memory_space<vmem>>, vector<8x1xf32>
    %54 = vector.broadcast %53 : vector<8x1xf32> to vector<8x324xf32>
    %55 = arith.addf %52, %54 : vector<8x324xf32>
    %cst_49 = arith.constant 0.000000e+00 : f32
    %56 = vector.broadcast %cst_49 : f32 to vector<8x324xf32>
    %57 = arith.maximumf %55, %56 : vector<8x324xf32>
    %c0_50 = arith.constant 0 : index
    %c0_51 = arith.constant 0 : index
    %58 = vector.load %arg11[%c0_50, %c0_51] : memref<8x324xf32, #tpu.memory_space<vmem>>, vector<8x324xf32>
    tpu.vector_store %arg11[%c0_50, %c0_51], %57 {strides = array<i32>} : memref<8x324xf32, #tpu.memory_space<vmem>>, vector<8x324xf32>,
    %c0_52 = arith.constant 0 : index
    %c0_53 = arith.constant 0 : index
    %59 = vector.load %arg11[%c0_52, %c0_53] : memref<8x324xf32, #tpu.memory_space<vmem>>, vector<8x305xf32>
    %c0_54 = arith.constant 0 : index
    %c1_55 = arith.constant 1 : index
    %60 = vector.load %arg11[%c0_54, %c1_55] : memref<8x324xf32, #tpu.memory_space<vmem>>, vector<8x305xf32>
    %61 = arith.maximumf %59, %60 : vector<8x305xf32>
    %c0_56 = arith.constant 0 : index
    %c18_57 = arith.constant 18 : index
    %62 = vector.load %arg11[%c0_56, %c18_57] : memref<8x324xf32, #tpu.memory_space<vmem>>, vector<8x305xf32>
    %c0_58 = arith.constant 0 : index
    %c19_59 = arith.constant 19 : index
    %63 = vector.load %arg11[%c0_58, %c19_59] : memref<8x324xf32, #tpu.memory_space<vmem>>, vector<8x305xf32>
    %64 = arith.maximumf %62, %63 : vector<8x305xf32>
    %65 = arith.maximumf %61, %64 : vector<8x305xf32>
    %c0_60 = arith.constant 0 : index
    %c0_61 = arith.constant 0 : index
    %66 = vector.load %arg4[%c0_60, %c0_61] : memref<305x122xf32, #tpu.memory_space<vmem>>, vector<305x122xf32>
    %cst_62 = arith.constant dense<0.000000e+00> : vector<8x122xf32>
    %67 = tpu.matmul %65, %66, %cst_62 {dimension_numbers = #tpu.dot_dimension_numbers<[1], [0], [0], [1], [0, 0, 1, 1], [], []>, precision = #tpu.contract_precision<fp32>} : vector<8x305xf32>, vector<305x122xf32>, vector<8x122xf32> -> vector<8x122xf32>
    %c0_63 = arith.constant 0 : index
    %c0_64 = arith.constant 0 : index
    %68 = vector.load %arg12[%c0_63, %c0_64] : memref<8x122xf32, #tpu.memory_space<vmem>>, vector<8x122xf32>
    tpu.vector_store %arg12[%c0_63, %c0_64], %67 {strides = array<i32>} : memref<8x122xf32, #tpu.memory_space<vmem>>, vector<8x122xf32>,
    %c0_65 = arith.constant 0 : index
    %c0_66 = arith.constant 0 : index
    %c0_67 = arith.constant 0 : index
    %69 = vector.load %arg5[%c0_65, %c0_66, %c0_67] : memref<9x16x8xf32, #tpu.memory_space<vmem>>, vector<1x16x8xf32>
    %70 = vector.shape_cast %69 : vector<1x16x8xf32> to vector<16x8xf32>
    %c0_68 = arith.constant 0 : index
    %c0_69 = arith.constant 0 : index
    %71 = vector.load %arg12[%c0_68, %c0_69] : memref<8x122xf32, #tpu.memory_space<vmem>>, vector<8x100xf32>
    %cst_70 = arith.constant dense<0.000000e+00> : vector<16x100xf32>
    %72 = tpu.matmul %70, %71, %cst_70 {dimension_numbers = #tpu.dot_dimension_numbers<[1], [0], [0], [1], [0, 0, 1, 1], [], []>, precision = #tpu.contract_precision<fp32>} : vector<16x8xf32>, vector<8x100xf32>, vector<16x100xf32> -> vector<16x100xf32>
    %c1_71 = arith.constant 1 : index
    %c0_72 = arith.constant 0 : index
    %c0_73 = arith.constant 0 : index
    %73 = vector.load %arg5[%c1_71, %c0_72, %c0_73] : memref<9x16x8xf32, #tpu.memory_space<vmem>>, vector<1x16x8xf32>
    %74 = vector.shape_cast %73 : vector<1x16x8xf32> to vector<16x8xf32>
    %c0_74 = arith.constant 0 : index
    %c1_75 = arith.constant 1 : index
    %75 = vector.load %arg12[%c0_74, %c1_75] : memref<8x122xf32, #tpu.memory_space<vmem>>, vector<8x100xf32>
    %cst_76 = arith.constant dense<0.000000e+00> : vector<16x100xf32>
    %76 = tpu.matmul %74, %75, %cst_76 {dimension_numbers = #tpu.dot_dimension_numbers<[1], [0], [0], [1], [0, 0, 1, 1], [], []>, precision = #tpu.contract_precision<fp32>} : vector<16x8xf32>, vector<8x100xf32>, vector<16x100xf32> -> vector<16x100xf32>
    %77 = arith.addf %72, %76 : vector<16x100xf32>
    %c2_77 = arith.constant 2 : index
    %c0_78 = arith.constant 0 : index
    %c0_79 = arith.constant 0 : index
    %78 = vector.load %arg5[%c2_77, %c0_78, %c0_79] : memref<9x16x8xf32, #tpu.memory_space<vmem>>, vector<1x16x8xf32>
    %79 = vector.shape_cast %78 : vector<1x16x8xf32> to vector<16x8xf32>
    %c0_80 = arith.constant 0 : index
    %c2_81 = arith.constant 2 : index
    %80 = vector.load %arg12[%c0_80, %c2_81] : memref<8x122xf32, #tpu.memory_space<vmem>>, vector<8x100xf32>
    %cst_82 = arith.constant dense<0.000000e+00> : vector<16x100xf32>
    %81 = tpu.matmul %79, %80, %cst_82 {dimension_numbers = #tpu.dot_dimension_numbers<[1], [0], [0], [1], [0, 0, 1, 1], [], []>, precision = #tpu.contract_precision<fp32>} : vector<16x8xf32>, vector<8x100xf32>, vector<16x100xf32> -> vector<16x100xf32>
    %82 = arith.addf %77, %81 : vector<16x100xf32>
    %c3_83 = arith.constant 3 : index
    %c0_84 = arith.constant 0 : index
    %c0_85 = arith.constant 0 : index
    %83 = vector.load %arg5[%c3_83, %c0_84, %c0_85] : memref<9x16x8xf32, #tpu.memory_space<vmem>>, vector<1x16x8xf32>
    %84 = vector.shape_cast %83 : vector<1x16x8xf32> to vector<16x8xf32>
    %c0_86 = arith.constant 0 : index
    %c10 = arith.constant 10 : index
    %85 = vector.load %arg12[%c0_86, %c10] : memref<8x122xf32, #tpu.memory_space<vmem>>, vector<8x100xf32>
    %cst_87 = arith.constant dense<0.000000e+00> : vector<16x100xf32>
    %86 = tpu.matmul %84, %85, %cst_87 {dimension_numbers = #tpu.dot_dimension_numbers<[1], [0], [0], [1], [0, 0, 1, 1], [], []>, precision = #tpu.contract_precision<fp32>} : vector<16x8xf32>, vector<8x100xf32>, vector<16x100xf32> -> vector<16x100xf32>
    %87 = arith.addf %82, %86 : vector<16x100xf32>
    %c4_88 = arith.constant 4 : index
    %c0_89 = arith.constant 0 : index
    %c0_90 = arith.constant 0 : index
    %88 = vector.load %arg5[%c4_88, %c0_89, %c0_90] : memref<9x16x8xf32, #tpu.memory_space<vmem>>, vector<1x16x8xf32>
    %89 = vector.shape_cast %88 : vector<1x16x8xf32> to vector<16x8xf32>
    %c0_91 = arith.constant 0 : index
    %c11 = arith.constant 11 : index
    %90 = vector.load %arg12[%c0_91, %c11] : memref<8x122xf32, #tpu.memory_space<vmem>>, vector<8x100xf32>
    %cst_92 = arith.constant dense<0.000000e+00> : vector<16x100xf32>
    %91 = tpu.matmul %89, %90, %cst_92 {dimension_numbers = #tpu.dot_dimension_numbers<[1], [0], [0], [1], [0, 0, 1, 1], [], []>, precision = #tpu.contract_precision<fp32>} : vector<16x8xf32>, vector<8x100xf32>, vector<16x100xf32> -> vector<16x100xf32>
    %92 = arith.addf %87, %91 : vector<16x100xf32>
    %c5_93 = arith.constant 5 : index
    %c0_94 = arith.constant 0 : index
    %c0_95 = arith.constant 0 : index
    %93 = vector.load %arg5[%c5_93, %c0_94, %c0_95] : memref<9x16x8xf32, #tpu.memory_space<vmem>>, vector<1x16x8xf32>
    %94 = vector.shape_cast %93 : vector<1x16x8xf32> to vector<16x8xf32>
    %c0_96 = arith.constant 0 : index
    %c12 = arith.constant 12 : index
    %95 = vector.load %arg12[%c0_96, %c12] : memref<8x122xf32, #tpu.memory_space<vmem>>, vector<8x100xf32>
    %cst_97 = arith.constant dense<0.000000e+00> : vector<16x100xf32>
    %96 = tpu.matmul %94, %95, %cst_97 {dimension_numbers = #tpu.dot_dimension_numbers<[1], [0], [0], [1], [0, 0, 1, 1], [], []>, precision = #tpu.contract_precision<fp32>} : vector<16x8xf32>, vector<8x100xf32>, vector<16x100xf32> -> vector<16x100xf32>
    %97 = arith.addf %92, %96 : vector<16x100xf32>
    %c6_98 = arith.constant 6 : index
    %c0_99 = arith.constant 0 : index
    %c0_100 = arith.constant 0 : index
    %98 = vector.load %arg5[%c6_98, %c0_99, %c0_100] : memref<9x16x8xf32, #tpu.memory_space<vmem>>, vector<1x16x8xf32>
    %99 = vector.shape_cast %98 : vector<1x16x8xf32> to vector<16x8xf32>
    %c0_101 = arith.constant 0 : index
    %c20_102 = arith.constant 20 : index
    %100 = vector.load %arg12[%c0_101, %c20_102] : memref<8x122xf32, #tpu.memory_space<vmem>>, vector<8x100xf32>
    %cst_103 = arith.constant dense<0.000000e+00> : vector<16x100xf32>
    %101 = tpu.matmul %99, %100, %cst_103 {dimension_numbers = #tpu.dot_dimension_numbers<[1], [0], [0], [1], [0, 0, 1, 1], [], []>, precision = #tpu.contract_precision<fp32>} : vector<16x8xf32>, vector<8x100xf32>, vector<16x100xf32> -> vector<16x100xf32>
    %102 = arith.addf %97, %101 : vector<16x100xf32>
    %c7_104 = arith.constant 7 : index
    %c0_105 = arith.constant 0 : index
    %c0_106 = arith.constant 0 : index
    %103 = vector.load %arg5[%c7_104, %c0_105, %c0_106] : memref<9x16x8xf32, #tpu.memory_space<vmem>>, vector<1x16x8xf32>
    %104 = vector.shape_cast %103 : vector<1x16x8xf32> to vector<16x8xf32>
    %c0_107 = arith.constant 0 : index
    %c21 = arith.constant 21 : index
    %105 = vector.load %arg12[%c0_107, %c21] : memref<8x122xf32, #tpu.memory_space<vmem>>, vector<8x100xf32>
    %cst_108 = arith.constant dense<0.000000e+00> : vector<16x100xf32>
    %106 = tpu.matmul %104, %105, %cst_108 {dimension_numbers = #tpu.dot_dimension_numbers<[1], [0], [0], [1], [0, 0, 1, 1], [], []>, precision = #tpu.contract_precision<fp32>} : vector<16x8xf32>, vector<8x100xf32>, vector<16x100xf32> -> vector<16x100xf32>
    %107 = arith.addf %102, %106 : vector<16x100xf32>
    %c8_109 = arith.constant 8 : index
    %c0_110 = arith.constant 0 : index
    %c0_111 = arith.constant 0 : index
    %108 = vector.load %arg5[%c8_109, %c0_110, %c0_111] : memref<9x16x8xf32, #tpu.memory_space<vmem>>, vector<1x16x8xf32>
    %109 = vector.shape_cast %108 : vector<1x16x8xf32> to vector<16x8xf32>
    %c0_112 = arith.constant 0 : index
    %c22 = arith.constant 22 : index
    %110 = vector.load %arg12[%c0_112, %c22] : memref<8x122xf32, #tpu.memory_space<vmem>>, vector<8x100xf32>
    %cst_113 = arith.constant dense<0.000000e+00> : vector<16x100xf32>
    %111 = tpu.matmul %109, %110, %cst_113 {dimension_numbers = #tpu.dot_dimension_numbers<[1], [0], [0], [1], [0, 0, 1, 1], [], []>, precision = #tpu.contract_precision<fp32>} : vector<16x8xf32>, vector<8x100xf32>, vector<16x100xf32> -> vector<16x100xf32>
    %112 = arith.addf %107, %111 : vector<16x100xf32>
    %c0_114 = arith.constant 0 : index
    %c0_115 = arith.constant 0 : index
    %113 = vector.load %arg6[%c0_114, %c0_115] : memref<16x1xf32, #tpu.memory_space<vmem>>, vector<16x1xf32>
    %114 = vector.broadcast %113 : vector<16x1xf32> to vector<16x100xf32>
    %115 = arith.addf %112, %114 : vector<16x100xf32>
    %cst_116 = arith.constant 0.000000e+00 : f32
    %116 = vector.broadcast %cst_116 : f32 to vector<16x100xf32>
    %117 = arith.maximumf %115, %116 : vector<16x100xf32>
    %c0_117 = arith.constant 0 : index
    %c0_118 = arith.constant 0 : index
    %118 = vector.load %arg13[%c0_117, %c0_118] : memref<16x100xf32, #tpu.memory_space<vmem>>, vector<16x100xf32>
    tpu.vector_store %arg13[%c0_117, %c0_118], %117 {strides = array<i32>} : memref<16x100xf32, #tpu.memory_space<vmem>>, vector<16x100xf32>,
    %c0_119 = arith.constant 0 : index
    %c0_120 = arith.constant 0 : index
    %119 = vector.load %arg13[%c0_119, %c0_120] : memref<16x100xf32, #tpu.memory_space<vmem>>, vector<16x89xf32>
    %c0_121 = arith.constant 0 : index
    %c1_122 = arith.constant 1 : index
    %120 = vector.load %arg13[%c0_121, %c1_122] : memref<16x100xf32, #tpu.memory_space<vmem>>, vector<16x89xf32>
    %121 = arith.maximumf %119, %120 : vector<16x89xf32>
    %c0_123 = arith.constant 0 : index
    %c10_124 = arith.constant 10 : index
    %122 = vector.load %arg13[%c0_123, %c10_124] : memref<16x100xf32, #tpu.memory_space<vmem>>, vector<16x89xf32>
    %c0_125 = arith.constant 0 : index
    %c11_126 = arith.constant 11 : index
    %123 = vector.load %arg13[%c0_125, %c11_126] : memref<16x100xf32, #tpu.memory_space<vmem>>, vector<16x89xf32>
    %124 = arith.maximumf %122, %123 : vector<16x89xf32>
    %125 = arith.maximumf %121, %124 : vector<16x89xf32>
    %c0_127 = arith.constant 0 : index
    %c0_128 = arith.constant 0 : index
    %126 = vector.load %arg7[%c0_127, %c0_128] : memref<89x16xf32, #tpu.memory_space<vmem>>, vector<89x16xf32>
    %cst_129 = arith.constant dense<0.000000e+00> : vector<16x16xf32>
    %127 = tpu.matmul %125, %126, %cst_129 {dimension_numbers = #tpu.dot_dimension_numbers<[1], [0], [0], [1], [0, 0, 1, 1], [], []>, precision = #tpu.contract_precision<fp32>} : vector<16x89xf32>, vector<89x16xf32>, vector<16x16xf32> -> vector<16x16xf32>
    %c0_130 = arith.constant 0 : index
    %c0_131 = arith.constant 0 : index
    %128 = vector.load %arg14[%c0_130, %c0_131] : memref<16x16xf32, #tpu.memory_space<vmem>>, vector<16x16xf32>
    tpu.vector_store %arg14[%c0_130, %c0_131], %127 {strides = array<i32>} : memref<16x16xf32, #tpu.memory_space<vmem>>, vector<16x16xf32>,
    %c0_132 = arith.constant 0 : index
    %c0_133 = arith.constant 0 : index
    %129 = vector.load %arg9[%c0_132, %c0_133] : memref<10x1xf32, #tpu.memory_space<vmem>>, vector<10x1xf32>
    %c0_134 = arith.constant 0 : index
    %c0_135 = arith.constant 0 : index
    %c0_136 = arith.constant 0 : index
    %130 = vector.load %arg8[%c0_134, %c0_135, %c0_136] : memref<16x10x16xf32, #tpu.memory_space<vmem>>, vector<1x10x16xf32>
    %131 = vector.shape_cast %130 : vector<1x10x16xf32> to vector<10x16xf32>
    %c0_137 = arith.constant 0 : index
    %c0_138 = arith.constant 0 : index
    %132 = vector.load %arg14[%c0_137, %c0_138] : memref<16x16xf32, #tpu.memory_space<vmem>>, vector<16x1xf32>
    %cst_139 = arith.constant dense<0.000000e+00> : vector<10x1xf32>
    %133 = tpu.matmul %131, %132, %cst_139 {dimension_numbers = #tpu.dot_dimension_numbers<[1], [0], [0], [1], [0, 0, 1, 1], [], []>, precision = #tpu.contract_precision<fp32>} : vector<10x16xf32>, vector<16x1xf32>, vector<10x1xf32> -> vector<10x1xf32>
    %134 = arith.addf %129, %133 : vector<10x1xf32>
    %c1_140 = arith.constant 1 : index
    %c0_141 = arith.constant 0 : index
    %c0_142 = arith.constant 0 : index
    %135 = vector.load %arg8[%c1_140, %c0_141, %c0_142] : memref<16x10x16xf32, #tpu.memory_space<vmem>>, vector<1x10x16xf32>
    %136 = vector.shape_cast %135 : vector<1x10x16xf32> to vector<10x16xf32>
    %c0_143 = arith.constant 0 : index
    %c1_144 = arith.constant 1 : index
    %137 = vector.load %arg14[%c0_143, %c1_144] : memref<16x16xf32, #tpu.memory_space<vmem>>, vector<16x1xf32>
    %cst_145 = arith.constant dense<0.000000e+00> : vector<10x1xf32>
    %138 = tpu.matmul %136, %137, %cst_145 {dimension_numbers = #tpu.dot_dimension_numbers<[1], [0], [0], [1], [0, 0, 1, 1], [], []>, precision = #tpu.contract_precision<fp32>} : vector<10x16xf32>, vector<16x1xf32>, vector<10x1xf32> -> vector<10x1xf32>
    %139 = arith.addf %134, %138 : vector<10x1xf32>
    %c2_146 = arith.constant 2 : index
    %c0_147 = arith.constant 0 : index
    %c0_148 = arith.constant 0 : index
    %140 = vector.load %arg8[%c2_146, %c0_147, %c0_148] : memref<16x10x16xf32, #tpu.memory_space<vmem>>, vector<1x10x16xf32>
    %141 = vector.shape_cast %140 : vector<1x10x16xf32> to vector<10x16xf32>
    %c0_149 = arith.constant 0 : index
    %c2_150 = arith.constant 2 : index
    %142 = vector.load %arg14[%c0_149, %c2_150] : memref<16x16xf32, #tpu.memory_space<vmem>>, vector<16x1xf32>
    %cst_151 = arith.constant dense<0.000000e+00> : vector<10x1xf32>
    %143 = tpu.matmul %141, %142, %cst_151 {dimension_numbers = #tpu.dot_dimension_numbers<[1], [0], [0], [1], [0, 0, 1, 1], [], []>, precision = #tpu.contract_precision<fp32>} : vector<10x16xf32>, vector<16x1xf32>, vector<10x1xf32> -> vector<10x1xf32>
    %144 = arith.addf %139, %143 : vector<10x1xf32>
    %c3_152 = arith.constant 3 : index
    %c0_153 = arith.constant 0 : index
    %c0_154 = arith.constant 0 : index
    %145 = vector.load %arg8[%c3_152, %c0_153, %c0_154] : memref<16x10x16xf32, #tpu.memory_space<vmem>>, vector<1x10x16xf32>
    %146 = vector.shape_cast %145 : vector<1x10x16xf32> to vector<10x16xf32>
    %c0_155 = arith.constant 0 : index
    %c3_156 = arith.constant 3 : index
    %147 = vector.load %arg14[%c0_155, %c3_156] : memref<16x16xf32, #tpu.memory_space<vmem>>, vector<16x1xf32>
    %cst_157 = arith.constant dense<0.000000e+00> : vector<10x1xf32>
    %148 = tpu.matmul %146, %147, %cst_157 {dimension_numbers = #tpu.dot_dimension_numbers<[1], [0], [0], [1], [0, 0, 1, 1], [], []>, precision = #tpu.contract_precision<fp32>} : vector<10x16xf32>, vector<16x1xf32>, vector<10x1xf32> -> vector<10x1xf32>
    %149 = arith.addf %144, %148 : vector<10x1xf32>
    %c4_158 = arith.constant 4 : index
    %c0_159 = arith.constant 0 : index
    %c0_160 = arith.constant 0 : index
    %150 = vector.load %arg8[%c4_158, %c0_159, %c0_160] : memref<16x10x16xf32, #tpu.memory_space<vmem>>, vector<1x10x16xf32>
    %151 = vector.shape_cast %150 : vector<1x10x16xf32> to vector<10x16xf32>
    %c0_161 = arith.constant 0 : index
    %c4_162 = arith.constant 4 : index
    %152 = vector.load %arg14[%c0_161, %c4_162] : memref<16x16xf32, #tpu.memory_space<vmem>>, vector<16x1xf32>
    %cst_163 = arith.constant dense<0.000000e+00> : vector<10x1xf32>
    %153 = tpu.matmul %151, %152, %cst_163 {dimension_numbers = #tpu.dot_dimension_numbers<[1], [0], [0], [1], [0, 0, 1, 1], [], []>, precision = #tpu.contract_precision<fp32>} : vector<10x16xf32>, vector<16x1xf32>, vector<10x1xf32> -> vector<10x1xf32>
    %154 = arith.addf %149, %153 : vector<10x1xf32>
    %c5_164 = arith.constant 5 : index
    %c0_165 = arith.constant 0 : index
    %c0_166 = arith.constant 0 : index
    %155 = vector.load %arg8[%c5_164, %c0_165, %c0_166] : memref<16x10x16xf32, #tpu.memory_space<vmem>>, vector<1x10x16xf32>
    %156 = vector.shape_cast %155 : vector<1x10x16xf32> to vector<10x16xf32>
    %c0_167 = arith.constant 0 : index
    %c5_168 = arith.constant 5 : index
    %157 = vector.load %arg14[%c0_167, %c5_168] : memref<16x16xf32, #tpu.memory_space<vmem>>, vector<16x1xf32>
    %cst_169 = arith.constant dense<0.000000e+00> : vector<10x1xf32>
    %158 = tpu.matmul %156, %157, %cst_169 {dimension_numbers = #tpu.dot_dimension_numbers<[1], [0], [0], [1], [0, 0, 1, 1], [], []>, precision = #tpu.contract_precision<fp32>} : vector<10x16xf32>, vector<16x1xf32>, vector<10x1xf32> -> vector<10x1xf32>
    %159 = arith.addf %154, %158 : vector<10x1xf32>
    %c6_170 = arith.constant 6 : index
    %c0_171 = arith.constant 0 : index
    %c0_172 = arith.constant 0 : index
    %160 = vector.load %arg8[%c6_170, %c0_171, %c0_172] : memref<16x10x16xf32, #tpu.memory_space<vmem>>, vector<1x10x16xf32>
    %161 = vector.shape_cast %160 : vector<1x10x16xf32> to vector<10x16xf32>
    %c0_173 = arith.constant 0 : index
    %c6_174 = arith.constant 6 : index
    %162 = vector.load %arg14[%c0_173, %c6_174] : memref<16x16xf32, #tpu.memory_space<vmem>>, vector<16x1xf32>
    %cst_175 = arith.constant dense<0.000000e+00> : vector<10x1xf32>
    %163 = tpu.matmul %161, %162, %cst_175 {dimension_numbers = #tpu.dot_dimension_numbers<[1], [0], [0], [1], [0, 0, 1, 1], [], []>, precision = #tpu.contract_precision<fp32>} : vector<10x16xf32>, vector<16x1xf32>, vector<10x1xf32> -> vector<10x1xf32>
    %164 = arith.addf %159, %163 : vector<10x1xf32>
    %c7_176 = arith.constant 7 : index
    %c0_177 = arith.constant 0 : index
    %c0_178 = arith.constant 0 : index
    %165 = vector.load %arg8[%c7_176, %c0_177, %c0_178] : memref<16x10x16xf32, #tpu.memory_space<vmem>>, vector<1x10x16xf32>
    %166 = vector.shape_cast %165 : vector<1x10x16xf32> to vector<10x16xf32>
    %c0_179 = arith.constant 0 : index
    %c7_180 = arith.constant 7 : index
    %167 = vector.load %arg14[%c0_179, %c7_180] : memref<16x16xf32, #tpu.memory_space<vmem>>, vector<16x1xf32>
    %cst_181 = arith.constant dense<0.000000e+00> : vector<10x1xf32>
    %168 = tpu.matmul %166, %167, %cst_181 {dimension_numbers = #tpu.dot_dimension_numbers<[1], [0], [0], [1], [0, 0, 1, 1], [], []>, precision = #tpu.contract_precision<fp32>} : vector<10x16xf32>, vector<16x1xf32>, vector<10x1xf32> -> vector<10x1xf32>
    %169 = arith.addf %164, %168 : vector<10x1xf32>
    %c8_182 = arith.constant 8 : index
    %c0_183 = arith.constant 0 : index
    %c0_184 = arith.constant 0 : index
    %170 = vector.load %arg8[%c8_182, %c0_183, %c0_184] : memref<16x10x16xf32, #tpu.memory_space<vmem>>, vector<1x10x16xf32>
    %171 = vector.shape_cast %170 : vector<1x10x16xf32> to vector<10x16xf32>
    %c0_185 = arith.constant 0 : index
    %c8_186 = arith.constant 8 : index
    %172 = vector.load %arg14[%c0_185, %c8_186] : memref<16x16xf32, #tpu.memory_space<vmem>>, vector<16x1xf32>
    %cst_187 = arith.constant dense<0.000000e+00> : vector<10x1xf32>
    %173 = tpu.matmul %171, %172, %cst_187 {dimension_numbers = #tpu.dot_dimension_numbers<[1], [0], [0], [1], [0, 0, 1, 1], [], []>, precision = #tpu.contract_precision<fp32>} : vector<10x16xf32>, vector<16x1xf32>, vector<10x1xf32> -> vector<10x1xf32>
    %174 = arith.addf %169, %173 : vector<10x1xf32>
    %c9 = arith.constant 9 : index
    %c0_188 = arith.constant 0 : index
    %c0_189 = arith.constant 0 : index
    %175 = vector.load %arg8[%c9, %c0_188, %c0_189] : memref<16x10x16xf32, #tpu.memory_space<vmem>>, vector<1x10x16xf32>
    %176 = vector.shape_cast %175 : vector<1x10x16xf32> to vector<10x16xf32>
    %c0_190 = arith.constant 0 : index
    %c9_191 = arith.constant 9 : index
    %177 = vector.load %arg14[%c0_190, %c9_191] : memref<16x16xf32, #tpu.memory_space<vmem>>, vector<16x1xf32>
    %cst_192 = arith.constant dense<0.000000e+00> : vector<10x1xf32>
    %178 = tpu.matmul %176, %177, %cst_192 {dimension_numbers = #tpu.dot_dimension_numbers<[1], [0], [0], [1], [0, 0, 1, 1], [], []>, precision = #tpu.contract_precision<fp32>} : vector<10x16xf32>, vector<16x1xf32>, vector<10x1xf32> -> vector<10x1xf32>
    %179 = arith.addf %174, %178 : vector<10x1xf32>
    %c10_193 = arith.constant 10 : index
    %c0_194 = arith.constant 0 : index
    %c0_195 = arith.constant 0 : index
    %180 = vector.load %arg8[%c10_193, %c0_194, %c0_195] : memref<16x10x16xf32, #tpu.memory_space<vmem>>, vector<1x10x16xf32>
    %181 = vector.shape_cast %180 : vector<1x10x16xf32> to vector<10x16xf32>
    %c0_196 = arith.constant 0 : index
    %c10_197 = arith.constant 10 : index
    %182 = vector.load %arg14[%c0_196, %c10_197] : memref<16x16xf32, #tpu.memory_space<vmem>>, vector<16x1xf32>
    %cst_198 = arith.constant dense<0.000000e+00> : vector<10x1xf32>
    %183 = tpu.matmul %181, %182, %cst_198 {dimension_numbers = #tpu.dot_dimension_numbers<[1], [0], [0], [1], [0, 0, 1, 1], [], []>, precision = #tpu.contract_precision<fp32>} : vector<10x16xf32>, vector<16x1xf32>, vector<10x1xf32> -> vector<10x1xf32>
    %184 = arith.addf %179, %183 : vector<10x1xf32>
    %c11_199 = arith.constant 11 : index
    %c0_200 = arith.constant 0 : index
    %c0_201 = arith.constant 0 : index
    %185 = vector.load %arg8[%c11_199, %c0_200, %c0_201] : memref<16x10x16xf32, #tpu.memory_space<vmem>>, vector<1x10x16xf32>
    %186 = vector.shape_cast %185 : vector<1x10x16xf32> to vector<10x16xf32>
    %c0_202 = arith.constant 0 : index
    %c11_203 = arith.constant 11 : index
    %187 = vector.load %arg14[%c0_202, %c11_203] : memref<16x16xf32, #tpu.memory_space<vmem>>, vector<16x1xf32>
    %cst_204 = arith.constant dense<0.000000e+00> : vector<10x1xf32>
    %188 = tpu.matmul %186, %187, %cst_204 {dimension_numbers = #tpu.dot_dimension_numbers<[1], [0], [0], [1], [0, 0, 1, 1], [], []>, precision = #tpu.contract_precision<fp32>} : vector<10x16xf32>, vector<16x1xf32>, vector<10x1xf32> -> vector<10x1xf32>
    %189 = arith.addf %184, %188 : vector<10x1xf32>
    %c12_205 = arith.constant 12 : index
    %c0_206 = arith.constant 0 : index
    %c0_207 = arith.constant 0 : index
    %190 = vector.load %arg8[%c12_205, %c0_206, %c0_207] : memref<16x10x16xf32, #tpu.memory_space<vmem>>, vector<1x10x16xf32>
    %191 = vector.shape_cast %190 : vector<1x10x16xf32> to vector<10x16xf32>
    %c0_208 = arith.constant 0 : index
    %c12_209 = arith.constant 12 : index
    %192 = vector.load %arg14[%c0_208, %c12_209] : memref<16x16xf32, #tpu.memory_space<vmem>>, vector<16x1xf32>
    %cst_210 = arith.constant dense<0.000000e+00> : vector<10x1xf32>
    %193 = tpu.matmul %191, %192, %cst_210 {dimension_numbers = #tpu.dot_dimension_numbers<[1], [0], [0], [1], [0, 0, 1, 1], [], []>, precision = #tpu.contract_precision<fp32>} : vector<10x16xf32>, vector<16x1xf32>, vector<10x1xf32> -> vector<10x1xf32>
    %194 = arith.addf %189, %193 : vector<10x1xf32>
    %c13 = arith.constant 13 : index
    %c0_211 = arith.constant 0 : index
    %c0_212 = arith.constant 0 : index
    %195 = vector.load %arg8[%c13, %c0_211, %c0_212] : memref<16x10x16xf32, #tpu.memory_space<vmem>>, vector<1x10x16xf32>
    %196 = vector.shape_cast %195 : vector<1x10x16xf32> to vector<10x16xf32>
    %c0_213 = arith.constant 0 : index
    %c13_214 = arith.constant 13 : index
    %197 = vector.load %arg14[%c0_213, %c13_214] : memref<16x16xf32, #tpu.memory_space<vmem>>, vector<16x1xf32>
    %cst_215 = arith.constant dense<0.000000e+00> : vector<10x1xf32>
    %198 = tpu.matmul %196, %197, %cst_215 {dimension_numbers = #tpu.dot_dimension_numbers<[1], [0], [0], [1], [0, 0, 1, 1], [], []>, precision = #tpu.contract_precision<fp32>} : vector<10x16xf32>, vector<16x1xf32>, vector<10x1xf32> -> vector<10x1xf32>
    %199 = arith.addf %194, %198 : vector<10x1xf32>
    %c14 = arith.constant 14 : index
    %c0_216 = arith.constant 0 : index
    %c0_217 = arith.constant 0 : index
    %200 = vector.load %arg8[%c14, %c0_216, %c0_217] : memref<16x10x16xf32, #tpu.memory_space<vmem>>, vector<1x10x16xf32>
    %201 = vector.shape_cast %200 : vector<1x10x16xf32> to vector<10x16xf32>
    %c0_218 = arith.constant 0 : index
    %c14_219 = arith.constant 14 : index
    %202 = vector.load %arg14[%c0_218, %c14_219] : memref<16x16xf32, #tpu.memory_space<vmem>>, vector<16x1xf32>
    %cst_220 = arith.constant dense<0.000000e+00> : vector<10x1xf32>
    %203 = tpu.matmul %201, %202, %cst_220 {dimension_numbers = #tpu.dot_dimension_numbers<[1], [0], [0], [1], [0, 0, 1, 1], [], []>, precision = #tpu.contract_precision<fp32>} : vector<10x16xf32>, vector<16x1xf32>, vector<10x1xf32> -> vector<10x1xf32>
    %204 = arith.addf %199, %203 : vector<10x1xf32>
    %c15 = arith.constant 15 : index
    %c0_221 = arith.constant 0 : index
    %c0_222 = arith.constant 0 : index
    %205 = vector.load %arg8[%c15, %c0_221, %c0_222] : memref<16x10x16xf32, #tpu.memory_space<vmem>>, vector<1x10x16xf32>
    %206 = vector.shape_cast %205 : vector<1x10x16xf32> to vector<10x16xf32>
    %c0_223 = arith.constant 0 : index
    %c15_224 = arith.constant 15 : index
    %207 = vector.load %arg14[%c0_223, %c15_224] : memref<16x16xf32, #tpu.memory_space<vmem>>, vector<16x1xf32>
    %cst_225 = arith.constant dense<0.000000e+00> : vector<10x1xf32>
    %208 = tpu.matmul %206, %207, %cst_225 {dimension_numbers = #tpu.dot_dimension_numbers<[1], [0], [0], [1], [0, 0, 1, 1], [], []>, precision = #tpu.contract_precision<fp32>} : vector<10x16xf32>, vector<16x1xf32>, vector<10x1xf32> -> vector<10x1xf32>
    %209 = arith.addf %204, %208 : vector<10x1xf32>
    %c0_226 = arith.constant 0 : index
    %c0_227 = arith.constant 0 : index
    %c0_228 = arith.constant 0 : index
    %210 = vector.load %arg10[%c0_226, %c0_227, %c0_228] : memref<1x10x1xf32, #tpu.memory_space<vmem>>, vector<1x10x1xf32>
    %211 = vector.shape_cast %210 : vector<1x10x1xf32> to vector<10x1xf32>
    %212 = vector.shape_cast %209 : vector<10x1xf32> to vector<1x10x1xf32>
    tpu.vector_store %arg10[%c0_226, %c0_227, %c0_228], %212 {strides = array<i32>} : memref<1x10x1xf32, #tpu.memory_space<vmem>>, vector<1x10x1xf32>,
    return
  }
  func.func @transform_0(%arg0: i32) -> (i32, i32, i32) {
    %c0_i32 = arith.constant 0 : i32
    %c0_i32_0 = arith.constant 0 : i32
    %c0_i32_1 = arith.constant 0 : i32
    return %arg0, %c0_i32, %c0_i32_0 : i32, i32, i32
  }
  func.func @transform_1(%arg0: i32) -> (i32, i32, i32) {
    %c0_i32 = arith.constant 0 : i32
    %c0_i32_0 = arith.constant 0 : i32
    %c0_i32_1 = arith.constant 0 : i32
    %c0_i32_2 = arith.constant 0 : i32
    return %c0_i32, %c0_i32_0, %c0_i32_1 : i32, i32, i32
  }
  func.func @transform_2(%arg0: i32) -> (i32, i32) {
    %c0_i32 = arith.constant 0 : i32
    %c0_i32_0 = arith.constant 0 : i32
    %c0_i32_1 = arith.constant 0 : i32
    return %c0_i32, %c0_i32_0 : i32, i32
  }
  func.func @transform_3(%arg0: i32) -> (i32, i32) {
    %c0_i32 = arith.constant 0 : i32
    %c0_i32_0 = arith.constant 0 : i32
    %c0_i32_1 = arith.constant 0 : i32
    return %c0_i32, %c0_i32_0 : i32, i32
  }
  func.func @transform_4(%arg0: i32) -> (i32, i32, i32) {
    %c0_i32 = arith.constant 0 : i32
    %c0_i32_0 = arith.constant 0 : i32
    %c0_i32_1 = arith.constant 0 : i32
    %c0_i32_2 = arith.constant 0 : i32
    return %c0_i32, %c0_i32_0, %c0_i32_1 : i32, i32, i32
  }
  func.func @transform_5(%arg0: i32) -> (i32, i32) {
    %c0_i32 = arith.constant 0 : i32
    %c0_i32_0 = arith.constant 0 : i32
    %c0_i32_1 = arith.constant 0 : i32
    return %c0_i32, %c0_i32_0 : i32, i32
  }
  func.func @transform_6(%arg0: i32) -> (i32, i32) {
    %c0_i32 = arith.constant 0 : i32
    %c0_i32_0 = arith.constant 0 : i32
    %c0_i32_1 = arith.constant 0 : i32
    return %c0_i32, %c0_i32_0 : i32, i32
  }
  func.func @transform_7(%arg0: i32) -> (i32, i32, i32) {
    %c0_i32 = arith.constant 0 : i32
    %c0_i32_0 = arith.constant 0 : i32
    %c0_i32_1 = arith.constant 0 : i32
    %c0_i32_2 = arith.constant 0 : i32
    return %c0_i32, %c0_i32_0, %c0_i32_1 : i32, i32, i32
  }
  func.func @transform_8(%arg0: i32) -> (i32, i32) {
    %c0_i32 = arith.constant 0 : i32
    %c0_i32_0 = arith.constant 0 : i32
    %c0_i32_1 = arith.constant 0 : i32
    return %c0_i32, %c0_i32_0 : i32, i32
  }
  func.func @transform_9(%arg0: i32) -> (i32, i32, i32) {
    %c0_i32 = arith.constant 0 : i32
    %c0_i32_0 = arith.constant 0 : i32
    %c0_i32_1 = arith.constant 0 : i32
    return %arg0, %c0_i32, %c0_i32_0 : i32, i32, i32
  }
}

</mosaic_0001>

<bundles_post_ra>
// kernel: forward.1
= control target key start
LH: loop header
LB: loop body
LE: loop exit
PB: predicated region body
PF: predicated region fallthrough
CT: control target
= control target key end

     0   :  { %s27702_s30 = smov 0   ;;  %s30017_s0 = inlined_call_operand.vmem [shape: f32[2,3,362], index: 0, kind: input, shape index: {}]   ;;  %s30018_s1 = inlined_call_operand.vmem [shape: f32[9,8,3], index: 1, kind: input, shape index: {}]   ;;  %s30019_s2 = inlined_call_operand.vmem [shape: f32[8,1], index: 2, kind: input, shape index: {}]   ;;  %s30020_s3 = inlined_call_operand.vmem [shape: f32[305,122], index: 3, kind: input, shape index: {}]   ;;  %s30021_s4 = inlined_call_operand.vmem [shape: f32[9,16,8], index: 4, kind: input, shape index: {}]   ;;  %s30022_s5 = inlined_call_operand.vmem [shape: f32[16,1], index: 5, kind: input, shape index: {}]   ;;  %s30023_s6 = inlined_call_operand.vmem [shape: f32[89,16], index: 6, kind: input, shape index: {}]   ;;  %s30024_s7 = inlined_call_operand.vmem [shape: f32[16,10,16], index: 7, kind: input, shape index: {}]   ;;  %s30025_s8 = inlined_call_operand.vmem [shape: f32[10,1], index: 8, kind: input, shape index: {}]   ;;  %s30026_s9 = inlined_call_operand.vmem [shape: f32[2,10,1], index: 9, kind: output, shape index: {}]  }
   0x1 LB: > { %s23835_s10 = sadd.s32 4294967295, %s27623_s30   ;;  %p23839_p0 = scmp.ge.s32.totalorder %s27623_s30, 1  ;;  %s27623_s30 = sphi %s27702_s30, %s19_s30  }
   0x2   : > { %p287_p1 = scmp.lt.s32.totalorder %s27623_s30, 3 }
   0x4   : > { %p288_p2 = pnand %p23839_p0, %p287_p1 }
   0x6   : > { %291 = sbr.rel (%p288_p2) target bundleno = 3986 (0xf92), region = 56 }
   0xd   : > { %p323_p3 = scmp.lt.s32.totalorder %s23835_s10, 1  ;;  %v30027_v0 = vmov 0.0   ;;  %s27626_s15 = smov 127   ;;  %vm27630_vm0 = vmmov 0   ;;  %v23843_v20 = vld [vmem:[%s30018_s1 + $0x8] sm:$0xff]  ;;  %vm350_vm1 = vcmask 23552  }
   0xe   : > { %427 = vmatprep.mubr.f32.mxu0 %v30027_v0  ;;  %25006 = vmatprep.subr.mxu1 %v30027_v0  ;;  %s27627_s16 = smov 126   ;;  %s27628_s17 = smov 110   ;;  %v352_v21 = vsel %vm350_vm1, %v23843_v20, 0  ;;  %vm347_vm2 = vcmask 1039360   ;;  %vm354_vm3 = vcmask 1042432   ;;  %vm2205_vm4 = vcmask 1031168  }
   0xf   : > { %s30211_s10 = smov (!%p323_p3, %s23835_s10), 1  ;;  %s27629_s18 = smov 109   ;;  %25008 = vmatprep.mubr.msk.f32.mxu1 %vm27630_vm0, %v30027_v0  ;;  %v27763_v22 = vand.u32 4294901760, %v352_v21  ;;  %vm3144_vm5 = vcmask 900096   ;;  %v23845_v59 = vld [vmem:[%s30018_s1 + $0x18] sm:$0xff]  ;;  %v23846_v63 = vld [vmem:[%s30018_s1 + $0x20] sm:$0xff] }
  0x10   : > { %s27571_s11 = smul.u32 12, %s30211_s10  ;;  %s27631_s19 = smov 108   ;;  %v27827_v62 = vsel %vm350_vm1, %v23845_v59, 0  ;;  %vm4083_vm6 = vcmask 891904   ;;  %vm5022_vm7 = vcmask 883712   ;;  %vm5961_vm8 = vcmask 752640  }
  0x11   : > { %s27632_s20 = smov 92   ;;  %s27633_s23 = smov 91   ;;  %v27766_v23 = vsub.f32 %v352_v21, %v27763_v22  ;;  %vm6900_vm9 = vcmask 744448   ;;  %vm7839_vm10 = vcmask 736256   ;;  %vm8779_vm11 = vcmask 556032  }
  0x12   : > { %s27716_s14 = scalar_lea.vmem %s30017_s0, %s27571_s11  ;;  %s27634_s24 = smov 90   ;;  %vm8857_vm12 = vcmask 400384   ;;  %vm8861_vm13 = vcmask 1040384   ;;  %vm10263_vm14 = vcmask 64512   ;;  %vm10251_vm15 = vcmask 998400  }
  0x13   : > { %v27721_v1 = vld [vmem:[%s27716_s14] sm:$0x77]  ;;  %v27733_v5 = vld [vmem:[%s27716_s14 + $0x8] sm:$0x7]  ;;  %v27769_v25 = vand.u32 4294901760, %v27766_v23  ;;  %s27638_s13 = smov 118  }
  0x14   : > { %341 = vrot.lane.b32.xlu1 %v27721_v1, %s27626_s15  ;;  %v27727_v2 = vcombine.high %v27721_v1, %v27721_v1  ;;  %v2194_v3 = vld [vmem:[%s27716_s14] sm:$0x77]  ;;  %v2195_v6 = vld [vmem:[%s27716_s14 + $0x8] sm:$0x7]  ;;  %s27641_s21 = smov 107   ;;  %s27644_s11 = smov 123  }
  0x15   : > { %v2198_v4 = vcombine.high %v2194_v3, %v2194_v3  ;;  %v3133_v7 = vld [vmem:[%s27716_s14] sm:$0x77]  ;;  %v3134_v8 = vld [vmem:[%s27716_s14 + $0x8] sm:$0x7]  ;;  %v431_v31 = vsub.f32 %v27766_v23, %v27769_v25  ;;  %s27645_s12 = smov 122   ;;  %s27648_s25 = smov 119  }
  0x16   : > { %343 = vrot.lane.b32.xlu0 %v27727_v2, %s27626_s15  ;;  %v3137_v9 = vcombine.high %v3133_v7, %v3133_v7  ;;  %v4073_v10 = vld [vmem:[%s27716_s14 + $0x8] sm:$0x7]  ;;  %v4072_v11 = vld [vmem:[%s27716_s14] sm:$0x77]  ;;  %s27651_s26 = smov 113  }
  0x17   : > { %v4076_v12 = vcombine.high %v4072_v11, %v4072_v11  ;;  %v5012_v13 = vld [vmem:[%s27716_s14 + $0x8] sm:$0x7]  ;;  %v5011_v14 = vld [vmem:[%s27716_s14] sm:$0x77]  ;;  %v27787_v40 = vand.u32 4294901760, %v431_v31 }
  0x18   : > { %2201 = vrot.lane.b32.xlu1 %v2198_v4, %s27627_s16  ;;  %v5015_v15 = vcombine.high %v5011_v14, %v5011_v14  ;;  %v5951_v16 = vld [vmem:[%s27716_s14 + $0x8] sm:$0x7]  ;;  %v5950_v17 = vld [vmem:[%s27716_s14] sm:$0x77]  ;;  %v4087_v4 = vsel %vm350_vm1, %v23846_v63, 0 }
  0x19   : > { %v5954_v18 = vcombine.high %v5950_v17, %v5950_v17  ;;  %v6890_v19 = vld [vmem:[%s27716_s14 + $0x8] sm:$0x7]  ;;  %v6889_v32 = vld [vmem:[%s27716_s14] sm:$0x77] }
  0x1a   : > { %345 = vrot.lane.b32.xlu0 %v27733_v5, %s27626_s15  ;;  %v6893_v34 = vcombine.high %v6889_v32, %v6889_v32  ;;  %v7829_v48 = vld [vmem:[%s27716_s14 + $0x8] sm:$0x7] }
  0x1c   : > { %2199 = vrot.lane.b32.xlu1 %v2194_v3, %s27627_s16  ;;  %v27833_v3 = vand.u32 4294901760, %v27827_v62 }
  0x1e   : > { %2203 = vrot.lane.b32.xlu0 %v2195_v6, %s27627_s16  ;;  %v27838_v6 = vand.u32 4294901760, %v4087_v4 }
  0x20   : > { %3142 = vrot.lane.b32.xlu1 %v3134_v8, %s27628_s17 }
  0x22   : > { %3140 = vrot.lane.b32.xlu0 %v3137_v9, %s27628_s17  ;;  %v27847_v9 = vsub.f32 %v4087_v4, %v27838_v6 }
  0x24   : > { %4079 = vrot.lane.b32.xlu1 %v4076_v12, %s27629_s18  ;;  %v27857_v12 = vand.u32 4294901760, %v27847_v9 }
  0x26   : > { %3138 = vrot.lane.b32.xlu0 %v3133_v7, %s27628_s17 }
  0x28   : > { %4077 = vrot.lane.b32.xlu1 %v4072_v11, %s27629_s18 }
  0x2a   : > { %4081 = vrot.lane.b32.xlu0 %v4073_v10, %s27629_s18  ;;  %s27639_s18 = smov 116  }
  0x2c   : > { %5020 = vrot.lane.b32.xlu1 %v5012_v13, %s27631_s19 }
  0x2e   : > { %5018 = vrot.lane.b32.xlu0 %v5015_v15, %s27631_s19  ;;  %v4165_v15 = vsub.f32 %v27847_v9, %v27857_v12 }
  0x30   : > { %5957 = vrot.lane.b32.xlu1 %v5954_v18, %s27632_s20 }
  0x32   : > { %5016 = vrot.lane.b32.xlu0 %v5011_v14, %s27631_s19 }
  0x34   : > { %5955 = vrot.lane.b32.xlu1 %v5950_v17, %s27632_s20  ;;  %v27869_v17 = vand.u32 4294901760, %v4165_v15 }
  0x36   : > { %5959 = vrot.lane.b32.xlu0 %v5951_v16, %s27632_s20  ;;  %s27640_s20 = smov 106  }
  0x38   : > { %6898 = vrot.lane.b32.xlu1 %v6890_v19, %s27633_s23 }
  0x3a   : > { %6896 = vrot.lane.b32.xlu0 %v6893_v34, %s27633_s23 }
  0x3e   : > { %6894 = vrot.lane.b32.xlu0 %v6889_v32, %s27633_s23  ;;  %s27647_s23 = smov 120  }
  0x42   : > { %7837 = vrot.lane.b32.xlu0 %v7829_v48, %s27634_s24 }
  0x86   : > { %v342_v24 = vpop.permute.xlu1 %341 }
  0x88   : > { %v344_v26 = vpop.permute.xlu0 %343 }
  0x89   : > { %v348_v27 = vsel %vm347_vm2, %v342_v24, %v344_v26 }
  0x8a   : > { %v355_v28 = vsel %vm354_vm3, %v348_v27, 0  ;;  %v2202_v29 = vpop.permute.xlu1 %2201 }
  0x8b   : > { %v27773_v30 = vand.u32 4294901760, %v355_v28 }
  0x8c   : > { %v27778_v33 = vpop.permute.xlu0 %345 }
  0x8d   : > { %v27781_v35 = vsub.f32 %v355_v28, %v27773_v30  ;;  %v349_v36 = vsel %vm347_vm2, %v344_v26, %v27778_v33  ;;  %v359_v10 = vsel %vm354_vm3, %v27778_v33, 0  ;;  %v333_v28 = vld [vmem:[%s30018_s1] sm:$0xff]  ;;  %v23847_v33 = vld [vmem:[%s30018_s1 + $0x28] sm:$0xff] }
  0x8e   : > { %v357_v37 = vsel %vm354_vm3, %v349_v36, 0  ;;  %v2200_v38 = vpop.permute.xlu1 %2199  ;;  %v27861_v14 = vand.u32 4294901760, %v359_v10  ;;  %v5026_v34 = vsel %vm350_vm1, %v23847_v33, 0  ;;  %v1275_v36 = vsel %vm354_vm3, %v27721_v1, 0 }
  0x8f   : > { %v361_v39 = vand.u32 4294901760, %v357_v37  ;;  %v27789_v41 = vsel %vm2205_vm4, %v2200_v38, %v2202_v29  ;;  %v447_v42 = vand.u32 4294901760, %v27781_v35 }
  0x90   : > { %v27792_v43 = vpop.permute.xlu0 %2203  ;;  %v27872_v19 = vsub.f32 %v359_v10, %v27861_v14 }
  0x91   : > { %v440_v44 = vsub.f32 %v357_v37, %v361_v39  ;;  %362 = vmatprep.subr.mxu0 %v361_v39  ;;  %v27795_v45 = vsel %vm2205_vm4, %v2202_v29, %v27792_v43  ;;  %v448_v47 = vsub.f32 %v27781_v35, %v447_v42  ;;  %vm23776_vm4 = vcmask 7168  }
  0x92   : > { %364 = vmatpush1.msra.mxu0 %v27773_v30  ;;  %v3143_v52 = vpop.permute.xlu1 %3142  ;;  %v905_v21 = vand.u32 4294901760, %v27872_v19 }
  0x93   : > { %433 = vmatmul.mubr.f32.vlgmr.msra.gmra.mrb[0].mxu0 %v27787_v40  ;;  %v441_v46 = vand.u32 4294901760, %v440_v44  ;;  %v449_v51 = vand.u32 4294901760, %v448_v47  ;;  %v3154_v53 = vsel %vm354_vm3, %v3143_v52, 0 }
  0x94   : > { %513 = vmatprep.mubr.f32.mxu0 %v30027_v0  ;;  %v3141_v54 = vpop.permute.xlu0 %3140  ;;  %v27808_v55 = vand.u32 4294901760, %v3154_v53  ;;  %v906_v26 = vsub.f32 %v27872_v19, %v905_v21 }
  0x95   : > { %v442_v49 = vsub.f32 %v440_v44, %v441_v46  ;;  %v27811_v56 = vsel %vm3144_vm5, %v3141_v54, %v3143_v52 }
  0x96   : > { %v27817_v57 = vsub.f32 %v3154_v53, %v27808_v55  ;;  %v4080_v24 = vpop.permute.xlu1 %4079  ;;  %v907_v31 = vand.u32 4294901760, %v906_v26 }
  0x97   : > { %v443_v50 = vand.u32 4294901760, %v442_v49 }
  0x98   : > { %v3139_v58 = vpop.permute.xlu0 %3138  ;;  %v3700_v61 = vand.u32 4294901760, %v27817_v57 }
  0x99   : > { %444 = vmatprep.subr.mxu0 %v443_v50  ;;  %v27823_v60 = vsel %vm3144_vm5, %v3139_v58, %v3141_v54 }
  0x9a   : > { %450 = vmatpush1.msra.mxu0 %v449_v51  ;;  %25007 = vmatpush3.msra.mxu1 %v3700_v61  ;;  %v4078_v29 = vpop.permute.xlu1 %4077 }
  0x9b   : > { %515 = vmatmul.mubr.f32.vlgmr.msra.gmra.mrb[0].mxu0 %v27763_v22  ;;  %523 = vmatprep.subr.mxu0 %v440_v44  ;;  %v27908_v32 = vsel %vm4083_vm6, %v4078_v29, %v4080_v24  ;;  %v27941_v44 = vand.u32 4294901760, %v1275_v36 }
  0x9c   : > { %526 = vmatpush1.msra.mxu0 %v27781_v35  ;;  %589 = vmatprep.mubr.f32.mxu0 %v30027_v0  ;;  %v4082_v7 = vpop.permute.xlu0 %4081  ;;  %v27920_v35 = vand.u32 4294901760, %v5026_v34 }
  0x9d   : > { %599 = vmatprep.subr.mxu0 %v361_v39  ;;  %25009 = vmatmul.mubr.f32.vlgmr.msra.gmra.mrb[0].mxu1 %v27833_v3  ;;  %v4093_v8 = vsel %vm354_vm3, %v4082_v7, 0  ;;  %v27891_v27 = vsel %vm4083_vm6, %v4080_v24, %v4082_v7  ;;  %v27966_v52 = vsub.f32 %v1275_v36, %v27941_v44 }
  0x9e   : > { %25011 = vmatprep.subr.mxu1 %v30027_v0  ;;  %25013 = vmatprep.mubr.msk.f32.mxu1 %vm27630_vm0, %v30027_v0  ;;  %v27852_v11 = vand.u32 4294901760, %v4093_v8  ;;  %v5021_v38 = vpop.permute.xlu1 %5020 }
  0x9f   : > { %25012 = vmatpush3.msra.mxu1 %v27808_v55  ;;  %v1367_v63 = vand.u32 4294901760, %v27966_v52 }
  0xa0   : > { %25016 = vmatprep.subr.mxu1 %v30027_v0  ;;  %v4638_v13 = vsub.f32 %v4093_v8, %v27852_v11  ;;  %v5019_v8 = vpop.permute.xlu0 %5018 }
  0xa1   : > { %25014 = vmatmul.mubr.f32.vlgmr.msra.gmra.mrb[2].mxu1 %v27833_v3  ;;  %v1368_v7 = vsub.f32 %v27966_v52, %v1367_v63 }
  0xa2   : > { %25017 = vmatpush3.msra.mxu1 %v27852_v11  ;;  %25018 = vmatprep.mubr.msk.f32.mxu1 %vm27630_vm0, %v30027_v0  ;;  %v4639_v16 = vand.u32 4294901760, %v4638_v13  ;;  %v5958_v36 = vpop.permute.xlu1 %5957 }
  0xa3   : > { %592 = vmatmul.mubr.f32.vlgmr.msra.gmra.mrb[0].mxu0 %v27766_v23  ;;  %25021 = vmatprep.subr.mxu1 %v30027_v0 }
  0xa4   : > { %601 = vmatpush1.msra.mxu0 %v27773_v30  ;;  %664 = vmatprep.mubr.f32.mxu0 %v30027_v0  ;;  %v4640_v18 = vsub.f32 %v4638_v13, %v4639_v16  ;;  %v5017_v15 = vpop.permute.xlu0 %5016 }
  0xa5   : > { %677 = vmatprep.subr.mxu0 %v441_v46  ;;  %25019 = vmatmul.mubr.f32.vlgmr.msra.gmra.mrb[4].mxu1 %v27869_v17 }
  0xa6   : > { %v4641_v20 = vand.u32 4294901760, %v4640_v18  ;;  %25023 = vmatprep.mubr.msk.f32.mxu1 %vm27630_vm0, %v30027_v0 }
  0xa8   : > { %25022 = vmatpush3.msra.mxu1 %v4641_v20 }
  0xa9   : > { %25024 = vmatmul.mubr.f32.vlgmr.msra.gmra.mrb[6].mxu1 %v27838_v6  ;;  %25026 = vmatprep.subr.mxu1 %v30027_v0 }
  0xaa   : > { %25027 = vmatpush3.msra.mxu1 %v4638_v13  ;;  %25028 = vmatprep.mubr.msk.f32.mxu1 %vm27630_vm0, %v30027_v0 }
  0xab   : > { %668 = vmatmul.mubr.f32.vlgmr.msra.gmra.mrb[0].mxu0 %v27769_v25  ;;  %25031 = vmatprep.subr.mxu1 %v30027_v0 }
  0xac   : > { %681 = vmatpush1.msra.mxu0 %v447_v42  ;;  %744 = vmatprep.mubr.f32.mxu0 %v30027_v0 }
  0xad   : > { %753 = vmatprep.subr.mxu0 %v361_v39  ;;  %25029 = vmatmul.mubr.f32.vlgmr.msra.gmra.mrb[8].mxu1 %v27847_v9  ;;  %v5032_v39 = vsel %vm354_vm3, %v5021_v38, 0 }
  0xae   : > { %25032 = vmatpush3.msra.mxu1 %v27852_v11  ;;  %25033 = vmatprep.mubr.msk.f32.mxu1 %vm27630_vm0, %v30027_v0  ;;  %v27938_v42 = vand.u32 4294901760, %v5032_v39 }
  0xaf   : > { %25036 = vmatprep.subr.mxu1 %v30027_v0 }
  0xb0   : > { %v5577_v48 = vsub.f32 %v5032_v39, %v27938_v42  ;;  %v5956_v39 = vpop.permute.xlu1 %5955 }
  0xb1   : > { %25034 = vmatmul.mubr.f32.vlgmr.msra.gmra.mrb[10].mxu1 %v27857_v12 }
  0xb2   : > { %25037 = vmatpush3.msra.mxu1 %v4639_v16  ;;  %25038 = vmatprep.mubr.msk.f32.mxu1 %vm27630_vm0, %v30027_v0  ;;  %v5578_v51 = vand.u32 4294901760, %v5577_v48  ;;  %v28022_v16 = vsel %vm5022_vm7, %v5017_v15, %v5019_v8 }
  0xb3   : > { %746 = vmatmul.mubr.f32.vlgmr.msra.gmra.mrb[0].mxu0 %v27763_v22  ;;  %25041 = vmatprep.subr.mxu1 %v30027_v0 }
  0xb4   : > { %755 = vmatpush1.msra.mxu0 %v27773_v30  ;;  %818 = vmatprep.mubr.f32.mxu0 %v30027_v0  ;;  %v1277_v30 = vsel %vm354_vm3, %v27727_v2, 0  ;;  %v1273_v2 = vsel %vm350_vm1, %v333_v28, 0  ;;  %v5579_v54 = vsub.f32 %v5577_v48, %v5578_v51 }
  0xb5   : > { %24896 = vmatprep.subr.mxu0 %v30027_v0  ;;  %v27924_v37 = vand.u32 4294901760, %v1277_v30  ;;  %25039 = vmatmul.mubr.f32.vlgmr.msra.gmra.mrb[12].mxu1 %v27838_v6  ;;  %v27936_v1 = vand.u32 4294901760, %v1273_v2 }
  0xb6   : > { %25042 = vmatpush3.msra.mxu1 %v27852_v11  ;;  %25043 = vmatprep.mubr.msk.f32.mxu1 %vm27630_vm0, %v30027_v0  ;;  %v5580_v59 = vand.u32 4294901760, %v5579_v54  ;;  %v28009_v11 = vsel %vm5022_vm7, %v5019_v8, %v5021_v38 }
  0xb7   : > { %v27950_v47 = vsub.f32 %v1277_v30, %v27924_v37  ;;  %25046 = vmatprep.subr.mxu1 %v30027_v0  ;;  %v27962_v50 = vsub.f32 %v1273_v2, %v27936_v1 }
  0xb9   : > { %25044 = vmatmul.mubr.f32.vlgmr.msra.gmra.mrb[14].mxu1 %v27838_v6  ;;  %v27981_v58 = vand.u32 4294901760, %v27962_v50 }
  0xba   : > { %25047 = vmatpush3.msra.mxu1 %v27938_v42  ;;  %25048 = vmatprep.mubr.msk.f32.mxu1 %vm27630_vm0, %v30027_v0 }
  0xbb   : > { %820 = vmatmul.mubr.f32.vlgmr.msra.gmra.mrb[0].mxu0 %v27763_v22  ;;  %25051 = vmatprep.subr.mxu1 %v30027_v0  ;;  %v1351_v4 = vsub.f32 %v27962_v50, %v27981_v58 }
  0xbc   : > { %24897 = vmatpush3.msra.mxu0 %v27861_v14  ;;  %24898 = vmatprep.mubr.msk.f32.mxu0 %vm27630_vm0, %v30027_v0 }
  0xbd   : > { %24901 = vmatprep.subr.mxu0 %v30027_v0  ;;  %v28014_v13 = vand.u32 4294901760, %v1351_v4 }
  0xbf   : > { %24899 = vmatmul.mubr.f32.vlgmr.msra.gmra.mrb[2].mxu0 %v27787_v40  ;;  %v27933_v40 = vsub.f32 %v5026_v34, %v27920_v35 }
  0xc0   : > { %24902 = vmatpush3.msra.mxu0 %v907_v31  ;;  %24903 = vmatprep.mubr.msk.f32.mxu0 %vm27630_vm0, %v30027_v0 }
  0xc1   : > { %24906 = vmatprep.subr.mxu0 %v30027_v0  ;;  %v27947_v46 = vand.u32 4294901760, %v27933_v40 }
  0xc3   : > { %24904 = vmatmul.mubr.f32.vlgmr.msra.gmra.mrb[4].mxu0 %v27763_v22  ;;  %v5104_v49 = vsub.f32 %v27933_v40, %v27947_v46 }
  0xc4   : > { %24907 = vmatpush3.msra.mxu0 %v27872_v19  ;;  %24908 = vmatprep.mubr.msk.f32.mxu0 %vm27630_vm0, %v30027_v0  ;;  %v5960_v19 = vpop.permute.xlu0 %5959 }
  0xc5   : > { %24911 = vmatprep.subr.mxu0 %v30027_v0  ;;  %v27971_v53 = vand.u32 4294901760, %v5104_v49  ;;  %v28072_v38 = vsel %vm5961_vm8, %v5958_v36, %v5960_v19 }
  0xc7   : > { %24909 = vmatmul.mubr.f32.vlgmr.msra.gmra.mrb[6].mxu0 %v27766_v23  ;;  %v1361_v23 = vand.u32 4294901760, %v27950_v47  ;;  %25049 = vmatmul.mubr.f32.vlgmr.msra.gmra.mrb[16].mxu1 %v27971_v53 }
  0xc8   : > { %24912 = vmatpush3.msra.mxu0 %v27861_v14  ;;  %24913 = vmatprep.mubr.msk.f32.mxu0 %vm27630_vm0, %v30027_v0 }
  0xc9   : > { %24916 = vmatprep.subr.mxu0 %v30027_v0  ;;  %25053 = vmatprep.mubr.msk.f32.mxu1 %vm27630_vm0, %v30027_v0 }
  0xca   : > { %25052 = vmatpush3.msra.mxu1 %v5580_v59 }
  0xcb   : > { %24914 = vmatmul.mubr.f32.vlgmr.msra.gmra.mrb[8].mxu0 %v27769_v25  ;;  %v1362_v25 = vsub.f32 %v27950_v47, %v1361_v23  ;;  %25054 = vmatmul.mubr.f32.vlgmr.msra.gmra.mrb[18].mxu1 %v27920_v35 }
  0xcc   : > { %24917 = vmatpush3.msra.mxu0 %v905_v21  ;;  %24918 = vmatprep.mubr.msk.f32.mxu0 %vm27630_vm0, %v30027_v0  ;;  %v5971_v21 = vsel %vm354_vm3, %v5960_v19, 0  ;;  %v23844_v19 = vld [vmem:[%s30018_s1 + $0x10] sm:$0xff] }
  0xcd   : > { %24921 = vmatprep.subr.mxu0 %v30027_v0  ;;  %25056 = vmatprep.subr.mxu1 %v30027_v0  ;;  %v1363_v10 = vand.u32 4294901760, %v1362_v25  ;;  %v6439_v24 = vand.u32 4294901760, %v5971_v21 }
  0xce   : > { %25057 = vmatpush3.msra.mxu1 %v5577_v48  ;;  %25058 = vmatprep.mubr.msk.f32.mxu1 %vm27630_vm0, %v30027_v0  ;;  %v23849_v48 = vld [vmem:[%s30018_s1 + $0x38] sm:$0xff] }
  0xcf   : > { %24919 = vmatmul.mubr.f32.vlgmr.msra.gmra.mrb[10].mxu0 %v27763_v22  ;;  %25059 = vmatmul.mubr.f32.vlgmr.msra.gmra.mrb[20].mxu1 %v27933_v40  ;;  %v6516_v28 = vsub.f32 %v5971_v21, %v6439_v24  ;;  %v6904_v49 = vsel %vm350_vm1, %v23849_v48, 0  ;;  %v2213_v21 = vsel %vm354_vm3, %v27795_v45, 0  ;;  %v2211_v45 = vsel %vm354_vm3, %v27789_v41, 0 }
  0xd0   : > { %24922 = vmatpush3.msra.mxu0 %v27861_v14  ;;  %24923 = vmatprep.mubr.msk.f32.mxu0 %vm27630_vm0, %v30027_v0  ;;  %v1369_v14 = vand.u32 4294901760, %v1368_v7 }
  0xd1   : > { %1282 = vmatprep.subr.mxu0 %v27924_v37  ;;  %25061 = vmatprep.subr.mxu1 %v30027_v0  ;;  %v6517_v30 = vand.u32 4294901760, %v6516_v28 }
  0xd2   : > { %25062 = vmatpush3.msra.mxu1 %v27938_v42  ;;  %25063 = vmatprep.mubr.msk.f32.mxu1 %vm27630_vm0, %v30027_v0 }
  0xd3   : > { %24924 = vmatmul.mubr.f32.vlgmr.msra.gmra.mrb[12].mxu0 %v27763_v22  ;;  %25064 = vmatmul.mubr.f32.vlgmr.msra.gmra.mrb[22].mxu1 %v27947_v46  ;;  %v23848_v22 = vld [vmem:[%s30018_s1 + $0x30] sm:$0xff]  ;;  %v6518_v33 = vsub.f32 %v6516_v28, %v6517_v30 }
  0xd4   : > { %1284 = vmatpush1.msra.mxu0 %v27941_v44  ;;  %1347 = vmatprep.mubr.f32.mxu0 %v30027_v0  ;;  %v5965_v18 = vsel %vm350_vm1, %v23848_v22, 0 }
  0xd5   : > { %1364 = vmatprep.subr.mxu0 %v1363_v10  ;;  %25066 = vmatprep.subr.mxu1 %v30027_v0  ;;  %v28032_v20 = vand.u32 4294901760, %v5965_v18  ;;  %v6519_v2 = vand.u32 4294901760, %v6518_v33 }
  0xd6   : > { %25067 = vmatpush3.msra.mxu1 %v5578_v51  ;;  %25068 = vmatprep.mubr.msk.f32.mxu1 %vm27630_vm0, %v30027_v0 }
  0xd7   : > { %1353 = vmatmul.mubr.f32.vlgmr.msra.gmra.mrb[0].mxu0 %v28014_v13  ;;  %25069 = vmatmul.mubr.f32.vlgmr.msra.gmra.mrb[24].mxu1 %v27920_v35  ;;  %v28041_v26 = vsub.f32 %v5965_v18, %v28032_v20  ;;  %v28148_v18 = vpop.permute.xlu0 %6896 }
  0xd8   : > { %1370 = vmatpush1.msra.mxu0 %v1369_v14  ;;  %1433 = vmatprep.mubr.f32.mxu0 %v30027_v0 }
  0xd9   : > { %1443 = vmatprep.subr.mxu0 %v27950_v47  ;;  %25071 = vmatprep.subr.mxu1 %v30027_v0  ;;  %v28048_v29 = vand.u32 4294901760, %v28041_v26  ;;  %v28083_v47 = vsel %vm5961_vm8, %v5956_v39, %v5958_v36 }
  0xda   : > { %25072 = vmatpush3.msra.mxu1 %v27938_v42  ;;  %25073 = vmatprep.mubr.msk.f32.mxu1 %vm27630_vm0, %v30027_v0  ;;  %v1279_v42 = vsel %vm354_vm3, %v27733_v5, 0  ;;  %v28096_v5 = vpop.permute.xlu1 %6898 }
  0xdb   : > { %25076 = vmatprep.subr.mxu1 %v30027_v0  ;;  %25074 = vmatmul.mubr.f32.vlgmr.msra.gmra.mrb[26].mxu1 %v27920_v35  ;;  %v6043_v31 = vsub.f32 %v28041_v26, %v28048_v29  ;;  %v28091_v51 = vand.u32 4294901760, %v1279_v42  ;;  %v6910_v54 = vsel %vm354_vm3, %v28096_v5, 0 }
  0xdc   : > { %25077 = vmatpush3.msra.mxu1 %v6439_v24  ;;  %25078 = vmatprep.mubr.msk.f32.mxu1 %vm27630_vm0, %v30027_v0  ;;  %v28105_v59 = vand.u32 4294901760, %v6910_v54 }
  0xdd   : > { %v28056_v34 = vand.u32 4294901760, %v6043_v31  ;;  %25081 = vmatprep.subr.mxu1 %v30027_v0  ;;  %v23850_v31 = vld [vmem:[%s30018_s1 + $0x40] sm:$0xff] }
  0xde   : > { %v7843_v33 = vsel %vm350_vm1, %v23850_v31, 0 }
  0xdf   : > { %1435 = vmatmul.mubr.f32.vlgmr.msra.gmra.mrb[0].mxu0 %v27936_v1  ;;  %25079 = vmatmul.mubr.f32.vlgmr.msra.gmra.mrb[28].mxu1 %v28056_v34  ;;  %v28192_v39 = vand.u32 4294901760, %v7843_v33 }
  0xe0   : > { %1446 = vmatpush1.msra.mxu0 %v27966_v52  ;;  %1509 = vmatprep.mubr.f32.mxu0 %v30027_v0 }
  0xe1   : > { %1519 = vmatprep.subr.mxu0 %v27924_v37  ;;  %25083 = vmatprep.mubr.msk.f32.mxu1 %vm27630_vm0, %v30027_v0 }
  0xe2   : > { %25082 = vmatpush3.msra.mxu1 %v6519_v2  ;;  %v28188_v2 = vand.u32 4294901760, %v2211_v45 }
  0xe3   : > { %25086 = vmatprep.subr.mxu1 %v30027_v0  ;;  %25084 = vmatmul.mubr.f32.vlgmr.msra.gmra.mrb[30].mxu1 %v28032_v20 }
  0xe4   : > { %25087 = vmatpush3.msra.mxu1 %v6516_v28  ;;  %25088 = vmatprep.mubr.msk.f32.mxu1 %vm27630_vm0, %v30027_v0  ;;  %v6895_v28 = vpop.permute.xlu0 %6894 }
  0xe5   : > { %25091 = vmatprep.subr.mxu1 %v30027_v0 }
  0xe7   : > { %1512 = vmatmul.mubr.f32.vlgmr.msra.gmra.mrb[0].mxu0 %v27962_v50  ;;  %25089 = vmatmul.mubr.f32.vlgmr.msra.gmra.mrb[32].mxu1 %v28041_v26 }
  0xe8   : > { %1521 = vmatpush1.msra.mxu0 %v27941_v44  ;;  %1584 = vmatprep.mubr.f32.mxu0 %v30027_v0  ;;  %v28190_v36 = vpop.permute.xlu0 %7837 }
  0xe9   : > { %1597 = vmatprep.subr.mxu0 %v1361_v23  ;;  %25092 = vmatpush3.msra.mxu1 %v6439_v24  ;;  %v28098_v23 = vand.u32 4294901760, %v6904_v49  ;;  %v7849_v48 = vsel %vm354_vm3, %v28190_v36, 0 }
  0xea   : > { %25093 = vmatprep.mubr.msk.f32.mxu1 %vm27630_vm0, %v30027_v0  ;;  %25096 = vmatprep.subr.mxu1 %v30027_v0 }
  0xeb   : > { %25094 = vmatmul.mubr.f32.vlgmr.msra.gmra.mrb[34].mxu1 %v28048_v29  ;;  %v28110_v52 = vsub.f32 %v6904_v49, %v28098_v23  ;;  %v28202_v49 = vand.u32 4294901760, %v7849_v48 }
  0xec   : > { %25097 = vmatpush3.msra.mxu1 %v6517_v30  ;;  %25098 = vmatprep.mubr.msk.f32.mxu1 %vm27630_vm0, %v30027_v0  ;;  %v28168_v30 = vand.u32 4294901760, %v2213_v21 }
  0xed   : > { %25101 = vmatprep.subr.mxu1 %v30027_v0  ;;  %v28120_v25 = vand.u32 4294901760, %v28110_v52 }
  0xef   : > { %1588 = vmatmul.mubr.f32.vlgmr.msra.gmra.mrb[0].mxu0 %v27981_v58  ;;  %25099 = vmatmul.mubr.f32.vlgmr.msra.gmra.mrb[36].mxu1 %v28032_v20  ;;  %v6982_v7 = vsub.f32 %v28110_v52, %v28120_v25 }
  0xf0   : > { %1601 = vmatpush1.msra.mxu0 %v1367_v63  ;;  %1664 = vmatprep.mubr.f32.mxu0 %v30027_v0  ;;  %v7455_v63 = vsub.f32 %v6910_v54, %v28105_v59  ;;  %v28207_v54 = vsub.f32 %v7843_v33, %v28192_v39 }
  0xf1   : > { %1673 = vmatprep.subr.mxu0 %v27924_v37  ;;  %25102 = vmatpush3.msra.mxu1 %v6439_v24  ;;  %v28115_v37 = vsub.f32 %v1279_v42, %v28091_v51  ;;  %v28130_v14 = vand.u32 4294901760, %v6982_v7  ;;  %v2209_v24 = vsel %vm350_vm1, %v23844_v19, 0  ;;  %v28195_v42 = vsub.f32 %v2213_v21, %v28168_v30 }
  0xf2   : > { %25103 = vmatprep.mubr.msk.f32.mxu1 %vm27630_vm0, %v30027_v0  ;;  %25106 = vmatprep.subr.mxu1 %v30027_v0  ;;  %v7456_v4 = vand.u32 4294901760, %v7455_v63  ;;  %v28182_v41 = vand.u32 4294901760, %v2209_v24  ;;  %v8394_v7 = vsub.f32 %v7849_v48, %v28202_v49  ;;  %vm14828_vm1 = vcmask 728064  }
  0xf3   : > { %25104 = vmatmul.mubr.f32.vlgmr.msra.gmra.mrb[38].mxu1 %v28032_v20  ;;  %v1825_v8 = vand.u32 4294901760, %v28115_v37 }
  0xf4   : > { %25107 = vmatpush3.msra.mxu1 %v28105_v59  ;;  %v7457_v10 = vsub.f32 %v7455_v63, %v7456_v4  ;;  %25108 = vmatprep.mubr.msk.f32.mxu1 %vm27630_vm0, %v30027_v0 }
  0xf5   : > { %25111 = vmatprep.subr.mxu1 %v30027_v0 }
  0xf6   : > { %v7458_v15 = vand.u32 4294901760, %v7457_v10  ;;  %v28222_v10 = vand.u32 4294901760, %v28207_v54 }
  0xf7   : > { %1666 = vmatmul.mubr.f32.vlgmr.msra.gmra.mrb[0].mxu0 %v27936_v1  ;;  %25109 = vmatmul.mubr.f32.vlgmr.msra.gmra.mrb[40].mxu1 %v28130_v14 }
  0xf8   : > { %1675 = vmatpush1.msra.mxu0 %v27941_v44  ;;  %1738 = vmatprep.mubr.f32.mxu0 %v30027_v0  ;;  %v1826_v44 = vsub.f32 %v28115_v37, %v1825_v8 }
  0xf9   : > { %24926 = vmatprep.subr.mxu0 %v30027_v0  ;;  %25113 = vmatprep.mubr.msk.f32.mxu1 %vm27630_vm0, %v30027_v0 }
  0xfa   : > { %25112 = vmatpush3.msra.mxu1 %v7458_v15  ;;  %v1827_v22 = vand.u32 4294901760, %v1826_v44  ;;  %v7921_v15 = vsub.f32 %v28207_v54, %v28222_v10 }
  0xfb   : > { %25116 = vmatprep.subr.mxu1 %v30027_v0  ;;  %25114 = vmatmul.mubr.f32.vlgmr.msra.gmra.mrb[42].mxu1 %v28098_v23 }
  0xfc   : > { %25117 = vmatpush3.msra.mxu1 %v7455_v63  ;;  %25118 = vmatprep.mubr.msk.f32.mxu1 %vm27630_vm0, %v30027_v0  ;;  %v28211_v63 = vsub.f32 %v2209_v24, %v28182_v41  ;;  %v28242_v21 = vand.u32 4294901760, %v7921_v15 }
  0xfd   : > { %25121 = vmatprep.subr.mxu1 %v30027_v0 }
  0xfe   : > { %v28234_v44 = vand.u32 4294901760, %v28211_v63 }
  0xff   : > { %1740 = vmatmul.mubr.f32.vlgmr.msra.gmra.mrb[0].mxu0 %v27936_v1  ;;  %25119 = vmatmul.mubr.f32.vlgmr.msra.gmra.mrb[44].mxu1 %v28110_v52 }
 0x100   : > { %24927 = vmatpush3.msra.mxu0 %v28091_v51  ;;  %24928 = vmatprep.mubr.msk.f32.mxu0 %vm27630_vm0, %v30027_v0 }
 0x101   : > { %24931 = vmatprep.subr.mxu0 %v30027_v0  ;;  %25122 = vmatpush3.msra.mxu1 %v28105_v59 }
 0x102   : > { %25123 = vmatprep.mubr.msk.f32.mxu1 %vm27630_vm0, %v30027_v0  ;;  %25126 = vmatprep.subr.mxu1 %v30027_v0 }
 0x103   : > { %24929 = vmatmul.mubr.f32.vlgmr.msra.gmra.mrb[14].mxu0 %v28014_v13  ;;  %v28174_v13 = vsel %vm6900_vm9, %v6895_v28, %v28148_v18  ;;  %25124 = vmatmul.mubr.f32.vlgmr.msra.gmra.mrb[46].mxu1 %v28120_v25 }
 0x104   : > { %24932 = vmatpush3.msra.mxu0 %v1827_v22  ;;  %24933 = vmatprep.mubr.msk.f32.mxu0 %vm27630_vm0, %v30027_v0 }
 0x105   : > { %24936 = vmatprep.subr.mxu0 %v30027_v0  ;;  %25127 = vmatpush3.msra.mxu1 %v7456_v4  ;;  %v28215_v4 = vsub.f32 %v2211_v45, %v28188_v2 }
 0x106   : > { %25128 = vmatprep.mubr.msk.f32.mxu1 %vm27630_vm0, %v30027_v0  ;;  %25131 = vmatprep.subr.mxu1 %v30027_v0 }
 0x107   : > { %24934 = vmatmul.mubr.f32.vlgmr.msra.gmra.mrb[16].mxu0 %v27936_v1  ;;  %25129 = vmatmul.mubr.f32.vlgmr.msra.gmra.mrb[48].mxu1 %v28098_v23  ;;  %v2303_v22 = vand.u32 4294901760, %v28215_v4 }
 0x108   : > { %24937 = vmatpush3.msra.mxu0 %v28115_v37  ;;  %24938 = vmatprep.mubr.msk.f32.mxu0 %vm27630_vm0, %v30027_v0  ;;  %v2287_v37 = vsub.f32 %v28211_v63, %v28234_v44 }
 0x109   : > { %24941 = vmatprep.subr.mxu0 %v30027_v0  ;;  %25132 = vmatpush3.msra.mxu1 %v28105_v59  ;;  %v8395_v59 = vand.u32 4294901760, %v8394_v7  ;;  %v2304_v24 = vsub.f32 %v28215_v4, %v2303_v22 }
 0x10a   : > { %25133 = vmatprep.mubr.msk.f32.mxu1 %vm27630_vm0, %v30027_v0  ;;  %25136 = vmatprep.subr.mxu1 %v30027_v0  ;;  %v2288_v45 = vand.u32 4294901760, %v2287_v37 }
 0x10b   : > { %24939 = vmatmul.mubr.f32.vlgmr.msra.gmra.mrb[18].mxu0 %v27962_v50  ;;  %v2297_v50 = vand.u32 4294901760, %v28195_v42  ;;  %25134 = vmatmul.mubr.f32.vlgmr.msra.gmra.mrb[50].mxu1 %v28098_v23  ;;  %v8396_v19 = vsub.f32 %v8394_v7, %v8395_v59 }
 0x10c   : > { %24942 = vmatpush3.msra.mxu0 %v28091_v51  ;;  %24943 = vmatprep.mubr.msk.f32.mxu0 %vm27630_vm0, %v30027_v0 }
 0x10d   : > { %24946 = vmatprep.subr.mxu0 %v30027_v0  ;;  %25137 = vmatpush3.msra.mxu1 %v28202_v49 }
 0x10e   : > { %25138 = vmatprep.mubr.msk.f32.mxu1 %vm27630_vm0, %v30027_v0  ;;  %25141 = vmatprep.subr.mxu1 %v30027_v0 }
 0x10f   : > { %24944 = vmatmul.mubr.f32.vlgmr.msra.gmra.mrb[20].mxu0 %v27981_v58  ;;  %v2298_v58 = vsub.f32 %v28195_v42, %v2297_v50  ;;  %25139 = vmatmul.mubr.f32.vlgmr.msra.gmra.mrb[52].mxu1 %v28242_v21 }
 0x110   : > { %24947 = vmatpush3.msra.mxu0 %v1825_v8  ;;  %24948 = vmatprep.mubr.msk.f32.mxu0 %vm27630_vm0, %v30027_v0  ;;  %v8397_v8 = vand.u32 4294901760, %v8396_v19 }
 0x111   : > { %24951 = vmatprep.subr.mxu0 %v30027_v0  ;;  %25143 = vmatprep.mubr.msk.f32.mxu1 %vm27630_vm0, %v30027_v0  ;;  %v2299_v28 = vand.u32 4294901760, %v2298_v58 }
 0x112   : > { %25142 = vmatpush3.msra.mxu1 %v8397_v8 }
 0x113   : > { %24949 = vmatmul.mubr.f32.vlgmr.msra.gmra.mrb[22].mxu0 %v27936_v1  ;;  %25144 = vmatmul.mubr.f32.vlgmr.msra.gmra.mrb[54].mxu1 %v28192_v39 }
 0x114   : > { %24952 = vmatpush3.msra.mxu0 %v28091_v51  ;;  %24953 = vmatprep.mubr.msk.f32.mxu0 %vm27630_vm0, %v30027_v0  ;;  %v2305_v51 = vand.u32 4294901760, %v2304_v24  ;;  %v8765_v24 = vld [vmem:[%s30019_s2] sm:$0xff] }
 0x115   : > { %2218 = vmatprep.subr.mxu0 %v28168_v30  ;;  %25146 = vmatprep.subr.mxu1 %v30027_v0 }
 0x116   : > { %25147 = vmatpush3.msra.mxu1 %v8394_v7  ;;  %25148 = vmatprep.mubr.msk.f32.mxu1 %vm27630_vm0, %v30027_v0  ;;  %v28318_v7 = vsub.f32 %v27827_v62, %v27833_v3 }
 0x117   : > { %24954 = vmatmul.mubr.f32.vlgmr.msra.gmra.mrb[24].mxu0 %v27936_v1  ;;  %25149 = vmatmul.mubr.f32.vlgmr.msra.gmra.mrb[56].mxu1 %v28207_v54  ;;  %v2215_v1 = vsel %vm354_vm3, %v27792_v43, 0  ;;  %v3152_v43 = vsel %vm354_vm3, %v27811_v56, 0 }
 0x118   : > { %2220 = vmatpush1.msra.mxu0 %v28188_v2  ;;  %2283 = vmatprep.mubr.f32.mxu0 %v30027_v0  ;;  %v2683_v31 = vand.u32 4294901760, %v2215_v1 }
 0x119   : > { %2300 = vmatprep.subr.mxu0 %v2299_v28  ;;  %25151 = vmatprep.subr.mxu1 %v30027_v0  ;;  %v4091_v28 = vsel %vm354_vm3, %v27891_v27, 0 }
 0x11a   : > { %25152 = vmatpush3.msra.mxu1 %v28202_v49  ;;  %25153 = vmatprep.mubr.msk.f32.mxu1 %vm27630_vm0, %v30027_v0  ;;  %v2760_v33 = vsub.f32 %v2215_v1, %v2683_v31  ;;  %v3701_v1 = vsub.f32 %v27817_v57, %v3700_v61 }
 0x11b   : > { %2289 = vmatmul.mubr.f32.vlgmr.msra.gmra.mrb[0].mxu0 %v2288_v45  ;;  %25154 = vmatmul.mubr.f32.vlgmr.msra.gmra.mrb[58].mxu1 %v28222_v10 }
 0x11c   : > { %2306 = vmatpush1.msra.mxu0 %v2305_v51  ;;  %2369 = vmatprep.mubr.f32.mxu0 %v30027_v0  ;;  %v4089_v51 = vsel %vm354_vm3, %v27908_v32, 0 }
 0x11d   : > { %2379 = vmatprep.subr.mxu0 %v28195_v42  ;;  %25156 = vmatprep.subr.mxu1 %v30027_v0  ;;  %v2761_v42 = vand.u32 4294901760, %v2760_v33 }
 0x11e   : > { %25157 = vmatpush3.msra.mxu1 %v8395_v59  ;;  %25158 = vmatprep.mubr.msk.f32.mxu1 %vm27630_vm0, %v30027_v0  ;;  %v28325_v59 = vand.u32 4294901760, %v28318_v7 }
 0x11f   : > { %25161 = vmatprep.subr.mxu1 %v30027_v0  ;;  %25159 = vmatmul.mubr.f32.vlgmr.msra.gmra.mrb[60].mxu1 %v28192_v39  ;;  %v2762_v48 = vsub.f32 %v2760_v33, %v2761_v42 }
 0x120   : > { %25162 = vmatpush3.msra.mxu1 %v28202_v49  ;;  %25163 = vmatprep.mubr.msk.f32.mxu1 %vm27630_vm0, %v30027_v0  ;;  %v3150_v49 = vsel %vm354_vm3, %v27823_v60, 0  ;;  %v3226_v19 = vsub.f32 %v28318_v7, %v28325_v59 }
 0x122   : > { %v3227_v37 = vand.u32 4294901760, %v3226_v19 }
 0x123   : > { %2371 = vmatmul.mubr.f32.vlgmr.msra.gmra.mrb[0].mxu0 %v28182_v41  ;;  %25164 = vmatmul.mubr.f32.vlgmr.msra.gmra.mrb[62].mxu1 %v28192_v39 }
 0x124   : > { %2382 = vmatpush1.msra.mxu0 %v28215_v4  ;;  %2445 = vmatprep.mubr.f32.mxu0 %v30027_v0  ;;  %v3158_v4 = vand.u32 4294901760, %v3150_v49 }
 0x125   : > { %2455 = vmatprep.subr.mxu0 %v28168_v30 }
 0x126   : > { %v3241_v60 = vsub.f32 %v3150_v49, %v3158_v4 }
 0x128   : > { %v3242_v15 = vand.u32 4294901760, %v3241_v60 }
 0x12b   : > { %2448 = vmatmul.mubr.f32.vlgmr.msra.gmra.mrb[0].mxu0 %v28211_v63 }
 0x12c   : > { %2457 = vmatpush1.msra.mxu0 %v28188_v2  ;;  %2520 = vmatprep.mubr.f32.mxu0 %v30027_v0 }
 0x12d   : > { %2533 = vmatprep.subr.mxu0 %v2297_v50 }
 0x133   : > { %2524 = vmatmul.mubr.f32.vlgmr.msra.gmra.mrb[0].mxu0 %v28234_v44 }
 0x134   : > { %2537 = vmatpush1.msra.mxu0 %v2303_v22  ;;  %2600 = vmatprep.mubr.f32.mxu0 %v30027_v0 }
 0x135   : > { %2609 = vmatprep.subr.mxu0 %v28168_v30  ;;  %v2763_v30 = vand.u32 4294901760, %v2762_v48 }
 0x13b   : > { %2602 = vmatmul.mubr.f32.vlgmr.msra.gmra.mrb[0].mxu0 %v28182_v41 }
 0x13c   : > { %2611 = vmatpush1.msra.mxu0 %v28188_v2  ;;  %2674 = vmatprep.mubr.f32.mxu0 %v30027_v0  ;;  %v3156_v2 = vand.u32 4294901760, %v3152_v43 }
 0x13d   : > { %24956 = vmatprep.subr.mxu0 %v30027_v0 }
 0x13e   : > { %v3235_v56 = vsub.f32 %v3152_v43, %v3156_v2 }
 0x140   : > { %v3236_v50 = vand.u32 4294901760, %v3235_v56 }
 0x142   : > { %v3237_v62 = vsub.f32 %v3235_v56, %v3236_v50 }
 0x143   : > { %2676 = vmatmul.mubr.f32.vlgmr.msra.gmra.mrb[0].mxu0 %v28182_v41 }
 0x144   : > { %24957 = vmatpush3.msra.mxu0 %v2683_v31  ;;  %24958 = vmatprep.mubr.msk.f32.mxu0 %vm27630_vm0, %v30027_v0  ;;  %v3238_v58 = vand.u32 4294901760, %v3237_v62 }
 0x145   : > { %24961 = vmatprep.subr.mxu0 %v30027_v0 }
 0x147   : > { %24959 = vmatmul.mubr.f32.vlgmr.msra.gmra.mrb[26].mxu0 %v2288_v45  ;;  %v28355_v45 = vand.u32 4294901760, %v4091_v28 }
 0x148   : > { %24962 = vmatpush3.msra.mxu0 %v2763_v30  ;;  %24963 = vmatprep.mubr.msk.f32.mxu0 %vm27630_vm0, %v30027_v0 }
 0x149   : > { %24966 = vmatprep.subr.mxu0 %v30027_v0  ;;  %v4174_v27 = vsub.f32 %v4091_v28, %v28355_v45 }
 0x14b   : > { %24964 = vmatmul.mubr.f32.vlgmr.msra.gmra.mrb[28].mxu0 %v28182_v41  ;;  %v4175_v61 = vand.u32 4294901760, %v4174_v27 }
 0x14c   : > { %24967 = vmatpush3.msra.mxu0 %v2760_v33  ;;  %24968 = vmatprep.mubr.msk.f32.mxu0 %vm27630_vm0, %v30027_v0  ;;  %v3702_v33 = vand.u32 4294901760, %v3701_v1 }
 0x14d   : > { %24971 = vmatprep.subr.mxu0 %v30027_v0  ;;  %v4176_v48 = vsub.f32 %v4174_v27, %v4175_v61 }
 0x14f   : > { %24969 = vmatmul.mubr.f32.vlgmr.msra.gmra.mrb[30].mxu0 %v28211_v63  ;;  %v7828_v63 = vld [vmem:[%s27716_s14] sm:$0x77] }
 0x150   : > { %24972 = vmatpush3.msra.mxu0 %v2683_v31  ;;  %24973 = vmatprep.mubr.msk.f32.mxu0 %vm27630_vm0, %v30027_v0  ;;  %v7832_v22 = vcombine.high %v7828_v63, %v7828_v63 }
 0x151   : > { %24976 = vmatprep.subr.mxu0 %v30027_v0 }
 0x152   : > { %7835 = vrot.lane.b32.xlu1 %v7832_v22, %s27634_s24 }
 0x153   : > { %24974 = vmatmul.mubr.f32.vlgmr.msra.gmra.mrb[32].mxu0 %v28234_v44  ;;  %v3243_v44 = vsub.f32 %v3241_v60, %v3242_v15 }
 0x154   : > { %24977 = vmatpush3.msra.mxu0 %v2761_v42  ;;  %24978 = vmatprep.mubr.msk.f32.mxu0 %vm27630_vm0, %v30027_v0 }
 0x155   : > { %24981 = vmatprep.subr.mxu0 %v30027_v0  ;;  %v3244_v8 = vand.u32 4294901760, %v3243_v44 }
 0x156   : > { %7833 = vrot.lane.b32.xlu1 %v7828_v63, %s27634_s24 }
 0x157   : > { %24979 = vmatmul.mubr.f32.vlgmr.msra.gmra.mrb[34].mxu0 %v28182_v41 }
 0x158   : > { %24982 = vmatpush3.msra.mxu0 %v2683_v31  ;;  %24983 = vmatprep.mubr.msk.f32.mxu0 %vm27630_vm0, %v30027_v0  ;;  %v28363_v31 = vand.u32 4294901760, %v4089_v51 }
 0x159   : > { %3157 = vmatprep.subr.mxu0 %v3156_v2 }
 0x15a   : > { %v4180_v32 = vsub.f32 %v4089_v51, %v28363_v31 }
 0x15b   : > { %24984 = vmatmul.mubr.f32.vlgmr.msra.gmra.mrb[36].mxu0 %v28182_v41  ;;  %v27635_v41 = vmov 0  }
 0x15c   : > { %3159 = vmatpush1.msra.mxu0 %v3158_v4  ;;  %3222 = vmatprep.mubr.f32.mxu0 %v30027_v0  ;;  %v4181_v42 = vand.u32 4294901760, %v4180_v32 }
 0x15d   : > { %3239 = vmatprep.subr.mxu0 %v3238_v58  ;;  %27607 = vset.pattern.permute.xlu0 %v27635_v41  ;;  %v5030_v58 = vsel %vm354_vm3, %v28009_v11, 0 }
 0x15e   : > { %27608 = vset.pattern.permute.xlu1 %v27635_v41  ;;  %8768 = vperm.xlu0 %27607, %v8765_v24  }
 0x15f   : > { %3228 = vmatmul.mubr.f32.vlgmr.msra.gmra.mrb[0].mxu0 %v3227_v37 }
 0x160   : > { %3245 = vmatpush1.msra.mxu0 %v3244_v8  ;;  %3308 = vmatprep.mubr.f32.mxu0 %v30027_v0 }
 0x161   : > { %3318 = vmatprep.subr.mxu0 %v3235_v56 }
 0x167   : > { %3310 = vmatmul.mubr.f32.vlgmr.msra.gmra.mrb[0].mxu0 %v27833_v3 }
 0x168   : > { %3321 = vmatpush1.msra.mxu0 %v3241_v60  ;;  %3384 = vmatprep.mubr.f32.mxu0 %v30027_v0 }
 0x169   : > { %3394 = vmatprep.subr.mxu0 %v3156_v2 }
 0x16f   : > { %3387 = vmatmul.mubr.f32.vlgmr.msra.gmra.mrb[0].mxu0 %v28318_v7 }
 0x170   : > { %3396 = vmatpush1.msra.mxu0 %v3158_v4  ;;  %3459 = vmatprep.mubr.f32.mxu0 %v30027_v0  ;;  %v28409_v41 = vpop.f32.mrb[0].mxu1 }
 0x171   : > { %3472 = vmatprep.subr.mxu0 %v3236_v50  ;;  %v25010_v24 = vpop.f32.mrb[1].mxu1 }
 0x174   : > { %v28420_v51 = vpop.f32.mrb[2].mxu1 }
 0x177   : > { %3463 = vmatmul.mubr.f32.vlgmr.msra.gmra.mrb[0].mxu0 %v28325_v59 }
 0x178   : > { %3476 = vmatpush1.msra.mxu0 %v3242_v15  ;;  %3539 = vmatprep.mubr.f32.mxu0 %v30027_v0 }
 0x179   : > { %3548 = vmatprep.subr.mxu0 %v3156_v2  ;;  %v4182_v2 = vsub.f32 %v4180_v32, %v4181_v42 }
 0x17b   : > { %v4183_v56 = vand.u32 4294901760, %v4182_v2 }
 0x17f   : > { %3541 = vmatmul.mubr.f32.vlgmr.msra.gmra.mrb[0].mxu0 %v27833_v3 }
 0x180   : > { %3550 = vmatpush1.msra.mxu0 %v3158_v4  ;;  %3613 = vmatprep.mubr.f32.mxu0 %v30027_v0 }
 0x181   : > { %24986 = vmatprep.subr.mxu0 %v30027_v0 }
 0x187   : > { %3615 = vmatmul.mubr.f32.vlgmr.msra.gmra.mrb[0].mxu0 %v27833_v3 }
 0x188   : > { %24987 = vmatpush3.msra.mxu0 %v27808_v55  ;;  %24988 = vmatprep.mubr.msk.f32.mxu0 %vm27630_vm0, %v30027_v0 }
 0x189   : > { %24991 = vmatprep.subr.mxu0 %v30027_v0 }
 0x18b   : > { %24989 = vmatmul.mubr.f32.vlgmr.msra.gmra.mrb[38].mxu0 %v3227_v37  ;;  %v28399_v37 = vand.u32 4294901760, %v5030_v58 }
 0x18c   : > { %24992 = vmatpush3.msra.mxu0 %v3702_v33  ;;  %24993 = vmatprep.mubr.msk.f32.mxu0 %vm27630_vm0, %v30027_v0 }
 0x18d   : > { %24996 = vmatprep.subr.mxu0 %v30027_v0  ;;  %v28404_v8 = vsub.f32 %v5030_v58, %v28399_v37 }
 0x18f   : > { %24994 = vmatmul.mubr.f32.vlgmr.msra.gmra.mrb[40].mxu0 %v27833_v3  ;;  %v4177_v3 = vand.u32 4294901760, %v4176_v48  ;;  %v5114_v11 = vand.u32 4294901760, %v28404_v8 }
 0x190   : > { %24997 = vmatpush3.msra.mxu0 %v27817_v57  ;;  %24998 = vmatprep.mubr.msk.f32.mxu0 %vm27630_vm0, %v30027_v0 }
 0x191   : > { %25001 = vmatprep.subr.mxu0 %v30027_v0 }
 0x192   : > { %v898_v43 = vpop.f32.mrb[2].mxu0 }
 0x193   : > { %v24900_v30 = vpop.f32.mrb[3].mxu0  ;;  %24999 = vmatmul.mubr.f32.vlgmr.msra.gmra.mrb[42].mxu0 %v28318_v7 }
 0x194   : > { %25002 = vmatpush3.msra.mxu0 %v27808_v55  ;;  %25003 = vmatprep.mubr.msk.f32.mxu0 %vm27630_vm0, %v30027_v0 }
 0x195   : > { %4096 = vmatprep.subr.mxu0 %v28355_v45 }
 0x196   : > { %v974_v57 = vpop.f32.mrb[4].mxu0 }
 0x197   : > { %v975_v49 = vadd.f32 %v974_v57, %v898_v43  ;;  %v24905_v4 = vpop.f32.mrb[5].mxu0  ;;  %25004 = vmatmul.mubr.f32.vlgmr.msra.gmra.mrb[44].mxu0 %v28325_v59 }
 0x198   : > { %4098 = vmatpush1.msra.mxu0 %v28363_v31  ;;  %4161 = vmatprep.mubr.f32.mxu0 %v30027_v0 }
 0x199   : > { %4178 = vmatprep.subr.mxu0 %v4177_v3 }
 0x19a   : > { %v1048_v7 = vpop.f32.mrb[6].mxu0 }
 0x19b   : > { %v1049_v55 = vadd.f32 %v1048_v7, %v975_v49  ;;  %v24910_v60 = vpop.f32.mrb[7].mxu0  ;;  %4167 = vmatmul.mubr.f32.vlgmr.msra.gmra.mrb[0].mxu0 %v27869_v17 }
 0x19c   : > { %4184 = vmatpush1.msra.mxu0 %v4183_v56  ;;  %4247 = vmatprep.mubr.f32.mxu0 %v30027_v0 }
 0x19d   : > { %4257 = vmatprep.subr.mxu0 %v4174_v27 }
 0x19e   : > { %v1122_v50 = vpop.f32.mrb[8].mxu0 }
 0x19f   : > { %v1123_v15 = vadd.f32 %v1122_v50, %v1049_v55  ;;  %v24915_v62 = vpop.f32.mrb[9].mxu0 }
 0x1a2   : > { %v1196_v63 = vpop.f32.mrb[10].mxu0 }
 0x1a3   : > { %v1197_v59 = vadd.f32 %v1196_v63, %v1123_v15  ;;  %v24920_v22 = vpop.f32.mrb[11].mxu0  ;;  %4249 = vmatmul.mubr.f32.vlgmr.msra.gmra.mrb[0].mxu0 %v27838_v6 }
 0x1a4   : > { %4260 = vmatpush1.msra.mxu0 %v4180_v32  ;;  %4323 = vmatprep.mubr.f32.mxu0 %v30027_v0 }
 0x1a5   : > { %4333 = vmatprep.subr.mxu0 %v28355_v45 }
 0x1a6   : > { %v1268_v19 = vpop.f32.mrb[12].mxu0 }
 0x1a7   : > { %v28392_v44 = vadd.f32 %v1268_v19, %v1197_v59  ;;  %v24925_v17 = vpop.f32.mrb[13].mxu0 }
 0x1ab   : > { %4326 = vmatmul.mubr.f32.vlgmr.msra.gmra.mrb[0].mxu0 %v27847_v9  ;;  %v5028_v9 = vsel %vm354_vm3, %v28022_v16, 0  ;;  %v5115_v16 = vsub.f32 %v28404_v8, %v5114_v11 }
 0x1ac   : > { %4335 = vmatpush1.msra.mxu0 %v28363_v31  ;;  %4398 = vmatprep.mubr.f32.mxu0 %v30027_v0  ;;  %v28411_v28 = vand.u32 4294901760, %v5028_v9 }
 0x1ad   : > { %4411 = vmatprep.subr.mxu0 %v4175_v61  ;;  %v5116_v61 = vand.u32 4294901760, %v5115_v16 }
 0x1b3   : > { %4402 = vmatmul.mubr.f32.vlgmr.msra.gmra.mrb[0].mxu0 %v27857_v12  ;;  %v28416_v12 = vsub.f32 %v5028_v9, %v28411_v28 }
 0x1b4   : > { %4415 = vmatpush1.msra.mxu0 %v4181_v42  ;;  %4478 = vmatprep.mubr.f32.mxu0 %v30027_v0 }
 0x1b5   : > { %4487 = vmatprep.subr.mxu0 %v28355_v45  ;;  %v25015_v45 = vpop.f32.mrb[3].mxu1  ;;  %v5120_v33 = vand.u32 4294901760, %v28416_v12 }
 0x1b6   : > { %v4632_v1 = vpop.f32.mrb[4].mxu1 }
 0x1b7   : > { %v25020_v27 = vpop.f32.mrb[5].mxu1  ;;  %v5121_v2 = vsub.f32 %v28416_v12, %v5120_v33 }
 0x1b8   : > { %v4708_v32 = vpop.f32.mrb[6].mxu1 }
 0x1b9   : > { %v4709_v42 = vadd.f32 %v4708_v32, %v4632_v1  ;;  %v25025_v48 = vpop.f32.mrb[7].mxu1  ;;  %v5122_v55 = vand.u32 4294901760, %v5121_v2 }
 0x1bb   : > { %4480 = vmatmul.mubr.f32.vlgmr.msra.gmra.mrb[0].mxu0 %v27838_v6 }
 0x1bc   : > { %4489 = vmatpush1.msra.mxu0 %v28363_v31  ;;  %4552 = vmatprep.mubr.f32.mxu0 %v30027_v0  ;;  %v4782_v31 = vpop.f32.mrb[8].mxu1 }
 0x1bd   : > { %5035 = vmatprep.subr.mxu0 %v28399_v37  ;;  %v4783_v43 = vadd.f32 %v4782_v31, %v4709_v42  ;;  %v25030_v30 = vpop.f32.mrb[9].mxu1 }
 0x1be   : > { %v4856_v3 = vpop.f32.mrb[10].mxu1 }
 0x1bf   : > { %v4857_v57 = vadd.f32 %v4856_v3, %v4783_v43  ;;  %v25035_v49 = vpop.f32.mrb[11].mxu1 }
 0x1c0   : > { %v4930_v4 = vpop.f32.mrb[12].mxu1 }
 0x1c1   : > { %v4931_v56 = vadd.f32 %v4930_v4, %v4857_v57  ;;  %v25040_v7 = vpop.f32.mrb[13].mxu1 }
 0x1c2   : > { %v5002_v60 = vpop.f32.mrb[14].mxu1 }
 0x1c3   : > { %4554 = vmatmul.mubr.f32.vlgmr.msra.gmra.mrb[0].mxu0 %v27838_v6  ;;  %v28433_v6 = vadd.f32 %v5002_v60, %v4931_v56  ;;  %v25045_v50 = vpop.f32.mrb[15].mxu1 }
 0x1c4   : > { %5037 = vmatpush1.msra.mxu0 %v28411_v28  ;;  %5100 = vmatprep.mubr.f32.mxu0 %v30027_v0  ;;  %v5571_v15 = vpop.f32.mrb[16].mxu1 }
 0x1c5   : > { %5117 = vmatprep.subr.mxu0 %v5116_v61  ;;  %v25050_v62 = vpop.f32.mrb[17].mxu1 }
 0x1c6   : > { %v5647_v63 = vpop.f32.mrb[18].mxu1  ;;  %v5969_v62 = vsel %vm354_vm3, %v28072_v38, 0 }
 0x1c7   : > { %v5648_v59 = vadd.f32 %v5647_v63, %v5571_v15  ;;  %v25055_v22 = vpop.f32.mrb[19].mxu1 }
 0x1c8   : > { %v5721_v19 = vpop.f32.mrb[20].mxu1 }
 0x1c9   : > { %v5722_v17 = vadd.f32 %v5721_v19, %v5648_v59  ;;  %v25060_v58 = vpop.f32.mrb[21].mxu1 }
 0x1ca   : > { %v5795_v9 = vpop.f32.mrb[22].mxu1 }
 0x1cb   : > { %5106 = vmatmul.mubr.f32.vlgmr.msra.gmra.mrb[0].mxu0 %v27971_v53  ;;  %v5796_v24 = vadd.f32 %v5795_v9, %v5722_v17  ;;  %v25065_v16 = vpop.f32.mrb[23].mxu1  ;;  %v28452_v9 = vand.u32 4294901760, %v5969_v62 }
 0x1cc   : > { %5123 = vmatpush1.msra.mxu0 %v5122_v55  ;;  %5186 = vmatprep.mubr.f32.mxu0 %v30027_v0  ;;  %v5869_v45 = vpop.f32.mrb[24].mxu1 }
 0x1cd   : > { %5196 = vmatprep.subr.mxu0 %v28404_v8  ;;  %v5870_v1 = vadd.f32 %v5869_v45, %v5796_v24  ;;  %v25070_v53 = vpop.f32.mrb[25].mxu1 }
 0x1ce   : > { %v5941_v27 = vpop.f32.mrb[26].mxu1  ;;  %v28461_v53 = vsub.f32 %v5969_v62, %v28452_v9 }
 0x1cf   : > { %v28442_v32 = vadd.f32 %v5941_v27, %v5870_v1  ;;  %v25075_v61 = vpop.f32.mrb[27].mxu1  ;;  %v5967_v27 = vsel %vm354_vm3, %v28083_v47, 0 }
 0x1d0   : > { %v6510_v48 = vpop.f32.mrb[28].mxu1 }
 0x1d1   : > { %v25080_v30 = vpop.f32.mrb[29].mxu1 }
 0x1d2   : > { %v6586_v2 = vpop.f32.mrb[30].mxu1 }
 0x1d3   : > { %5188 = vmatmul.mubr.f32.vlgmr.msra.gmra.mrb[0].mxu0 %v27920_v35  ;;  %v6587_v3 = vadd.f32 %v6586_v2, %v6510_v48  ;;  %v25085_v57 = vpop.f32.mrb[31].mxu1 }
 0x1d4   : > { %5199 = vmatpush1.msra.mxu0 %v28416_v12  ;;  %5262 = vmatprep.mubr.f32.mxu0 %v30027_v0  ;;  %v6660_v4 = vpop.f32.mrb[32].mxu1  ;;  %v28466_v12 = vand.u32 4294901760, %v5967_v27 }
 0x1d5   : > { %5272 = vmatprep.subr.mxu0 %v28399_v37  ;;  %v6661_v55 = vadd.f32 %v6660_v4, %v6587_v3  ;;  %v25090_v60 = vpop.f32.mrb[33].mxu1  ;;  %v6053_v3 = vand.u32 4294901760, %v28461_v53 }
 0x1d6   : > { %v1818_v42 = vpop.f32.mrb[14].mxu0  ;;  %v6734_v50 = vpop.f32.mrb[34].mxu1 }
 0x1d7   : > { %v1819_v31 = vadd.f32 %v1818_v42, %v28392_v44  ;;  %v24930_v43 = vpop.f32.mrb[15].mxu0  ;;  %v6735_v44 = vadd.f32 %v6734_v50, %v6661_v55  ;;  %v25095_v15 = vpop.f32.mrb[35].mxu1  ;;  %v6058_v55 = vsub.f32 %v5967_v27, %v28466_v12  ;;  %v6054_v50 = vsub.f32 %v28461_v53, %v6053_v3 }
 0x1d8   : > { %v6808_v59 = vpop.f32.mrb[36].mxu1 }
 0x1d9   : > { %v25100_v17 = vpop.f32.mrb[37].mxu1 }
 0x1da   : > { %v1894_v49 = vpop.f32.mrb[16].mxu0  ;;  %v6880_v58 = vpop.f32.mrb[38].mxu1 }
 0x1db   : > { %v1895_v56 = vadd.f32 %v1894_v49, %v1819_v31  ;;  %v24935_v7 = vpop.f32.mrb[17].mxu0  ;;  %5265 = vmatmul.mubr.f32.vlgmr.msra.gmra.mrb[0].mxu0 %v27933_v40  ;;  %v6809_v40 = vadd.f32 %v6808_v59, %v6735_v44  ;;  %v25105_v16 = vpop.f32.mrb[39].mxu1 }
 0x1dc   : > { %5274 = vmatpush1.msra.mxu0 %v28411_v28  ;;  %5337 = vmatprep.mubr.f32.mxu0 %v30027_v0  ;;  %v7449_v1 = vpop.f32.mrb[40].mxu1 }
 0x1dd   : > { %5350 = vmatprep.subr.mxu0 %v5114_v11  ;;  %v28454_v24 = vadd.f32 %v6880_v58, %v6809_v40  ;;  %v25110_v38 = vpop.f32.mrb[41].mxu1 }
 0x1de   : > { %v1968_v63 = vpop.f32.mrb[18].mxu0  ;;  %v7525_v61 = vpop.f32.mrb[42].mxu1 }
 0x1df   : > { %v1969_v22 = vadd.f32 %v1968_v63, %v1895_v56  ;;  %v24940_v19 = vpop.f32.mrb[19].mxu0  ;;  %v7526_v48 = vadd.f32 %v7525_v61, %v7449_v1  ;;  %v25115_v31 = vpop.f32.mrb[43].mxu1  ;;  %v6059_v63 = vand.u32 4294901760, %v6058_v55 }
 0x1e0   : > { %v7599_v30 = vpop.f32.mrb[44].mxu1 }
 0x1e1   : > { %v25120_v2 = vpop.f32.mrb[45].mxu1  ;;  %v6060_v16 = vsub.f32 %v6058_v55, %v6059_v63 }
 0x1e2   : > { %v2042_v45 = vpop.f32.mrb[20].mxu0  ;;  %v7673_v57 = vpop.f32.mrb[46].mxu1  ;;  %v6906_v2 = vsel %vm354_vm3, %v28174_v13, 0 }
 0x1e3   : > { %v2043_v8 = vadd.f32 %v2042_v45, %v1969_v22  ;;  %v24945_v11 = vpop.f32.mrb[21].mxu0  ;;  %5341 = vmatmul.mubr.f32.vlgmr.msra.gmra.mrb[0].mxu0 %v27947_v46  ;;  %v25125_v56 = vpop.f32.mrb[47].mxu1  ;;  %v6055_v22 = vand.u32 4294901760, %v6054_v50 }
 0x1e4   : > { %5354 = vmatpush1.msra.mxu0 %v5120_v33  ;;  %5417 = vmatprep.mubr.f32.mxu0 %v30027_v0  ;;  %v7600_v33 = vadd.f32 %v7599_v30, %v7526_v48  ;;  %v7747_v7 = vpop.f32.mrb[48].mxu1  ;;  %v6902_v30 = vsel %vm6900_vm9, %v28148_v18, %v28096_v5 }
 0x1e5   : > { %5426 = vmatprep.subr.mxu0 %v28399_v37  ;;  %v25130_v60 = vpop.f32.mrb[49].mxu1 }
 0x1e6   : > { %v2116_v42 = vpop.f32.mrb[22].mxu0  ;;  %v7674_v4 = vadd.f32 %v7673_v57, %v7600_v33  ;;  %v7819_v44 = vpop.f32.mrb[50].mxu1 }
 0x1e7   : > { %v2117_v46 = vadd.f32 %v2116_v42, %v2043_v8  ;;  %v24950_v43 = vpop.f32.mrb[23].mxu0  ;;  %v25135_v15 = vpop.f32.mrb[51].mxu1  ;;  %v6061_v42 = vand.u32 4294901760, %v6060_v16 }
 0x1e8   : > { %v8388_v62 = vpop.f32.mrb[52].mxu1  ;;  %v7748_v19 = vadd.f32 %v7747_v7, %v7674_v4 }
 0x1e9   : > { %v25140_v59 = vpop.f32.mrb[53].mxu1 }
 0x1ea   : > { %v2188_v49 = vpop.f32.mrb[24].mxu0  ;;  %v8464_v40 = vpop.f32.mrb[54].mxu1  ;;  %v28480_v27 = vadd.f32 %v7819_v44, %v7748_v19 }
 0x1eb   : > { %v28469_v47 = vadd.f32 %v2188_v49, %v2117_v46  ;;  %v24955_v37 = vpop.f32.mrb[25].mxu0  ;;  %5419 = vmatmul.mubr.f32.vlgmr.msra.gmra.mrb[0].mxu0 %v27920_v35  ;;  %v8465_v17 = vadd.f32 %v8464_v40, %v8388_v62  ;;  %v25145_v58 = vpop.f32.mrb[55].mxu1 }
 0x1ec   : > { %5428 = vmatpush1.msra.mxu0 %v28411_v28  ;;  %5491 = vmatprep.mubr.f32.mxu0 %v30027_v0  ;;  %v8538_v28 = vpop.f32.mrb[56].mxu1 }
 0x1ed   : > { %5974 = vmatprep.subr.mxu0 %v28452_v9  ;;  %v8539_v45 = vadd.f32 %v8538_v28, %v8465_v17  ;;  %v25150_v8 = vpop.f32.mrb[57].mxu1  ;;  %v7836_v17 = vpop.permute.xlu1 %7835 }
 0x1ee   : > { %v8612_v11 = vpop.f32.mrb[58].mxu1 }
 0x1ef   : > { %v8613_v1 = vadd.f32 %v8612_v11, %v8539_v45  ;;  %v25155_v38 = vpop.f32.mrb[59].mxu1 }
 0x1f2   : > { %v8686_v61 = vpop.f32.mrb[60].mxu1 }
 0x1f3   : > { %5493 = vmatmul.mubr.f32.vlgmr.msra.gmra.mrb[0].mxu0 %v27920_v35  ;;  %v8687_v48 = vadd.f32 %v8686_v61, %v8613_v1  ;;  %v25160_v31 = vpop.f32.mrb[61].mxu1 }
 0x1f4   : > { %5976 = vmatpush1.msra.mxu0 %v28466_v12  ;;  %6039 = vmatprep.mubr.f32.mxu0 %v30027_v0 }
 0x1f5   : > { %6056 = vmatprep.subr.mxu0 %v6055_v22 }
 0x1f6   : > { %v8758_v46 = vpop.f32.mrb[62].mxu1 }
 0x1f7   : > { %v28482_v35 = vadd.f32 %v8758_v46, %v8687_v48  ;;  %v25165_v43 = vpop.f32.mrb[63].mxu1 }
 0x1fb   : > { %6045 = vmatmul.mubr.f32.vlgmr.msra.gmra.mrb[0].mxu0 %v28056_v34  ;;  %v6908_v34 = vsel %vm354_vm3, %v6902_v30, 0 }
 0x1fc   : > { %6062 = vmatpush1.msra.mxu0 %v6061_v42  ;;  %6125 = vmatprep.mubr.f32.mxu0 %v30027_v0 }
 0x1fd   : > { %6135 = vmatprep.subr.mxu0 %v28461_v53  ;;  %v6912_v53 = vand.u32 4294901760, %v6908_v34 }
 0x1ff   : > { %v6991_v33 = vsub.f32 %v6908_v34, %v6912_v53 }
 0x201   : > { %v6992_v5 = vand.u32 4294901760, %v6991_v33 }
 0x203   : > { %6127 = vmatmul.mubr.f32.vlgmr.msra.gmra.mrb[0].mxu0 %v28032_v20 }
 0x204   : > { %6138 = vmatpush1.msra.mxu0 %v6058_v55  ;;  %6201 = vmatprep.mubr.f32.mxu0 %v30027_v0 }
 0x205   : > { %6211 = vmatprep.subr.mxu0 %v28452_v9 }
 0x20b   : > { %6204 = vmatmul.mubr.f32.vlgmr.msra.gmra.mrb[0].mxu0 %v28041_v26  ;;  %v6914_v26 = vand.u32 4294901760, %v6906_v2 }
 0x20c   : > { %6213 = vmatpush1.msra.mxu0 %v28466_v12  ;;  %6276 = vmatprep.mubr.f32.mxu0 %v30027_v0 }
 0x20d   : > { %6289 = vmatprep.subr.mxu0 %v6053_v3  ;;  %v6997_v3 = vsub.f32 %v6906_v2, %v6914_v26 }
 0x20f   : > { %v6998_v37 = vand.u32 4294901760, %v6997_v3 }
 0x211   : > { %v6999_v60 = vsub.f32 %v6997_v3, %v6998_v37 }
 0x213   : > { %6280 = vmatmul.mubr.f32.vlgmr.msra.gmra.mrb[0].mxu0 %v28048_v29  ;;  %v6993_v29 = vsub.f32 %v6991_v33, %v6992_v5  ;;  %v7000_v15 = vand.u32 4294901760, %v6999_v60  ;;  %v8836_v60 = vld [vmem:[%s30020_s3 + $0x90] sm:$0xff] }
 0x214   : > { %6293 = vmatpush1.msra.mxu0 %v6059_v63  ;;  %6356 = vmatprep.mubr.f32.mxu0 %v30027_v0 }
 0x215   : > { %6365 = vmatprep.subr.mxu0 %v28452_v9  ;;  %v6994_v13 = vand.u32 4294901760, %v6993_v29 }
 0x21a   : > { %v2754_v18 = vpop.f32.mrb[26].mxu0 }
 0x21b   : > { %v24960_v57 = vpop.f32.mrb[27].mxu0  ;;  %6358 = vmatmul.mubr.f32.vlgmr.msra.gmra.mrb[0].mxu0 %v28032_v20 }
 0x21c   : > { %6367 = vmatpush1.msra.mxu0 %v28466_v12  ;;  %6430 = vmatprep.mubr.f32.mxu0 %v30027_v0 }
 0x21d   : > { %6913 = vmatprep.subr.mxu0 %v6912_v53 }
 0x21e   : > { %v2830_v49 = vpop.f32.mrb[28].mxu0 }
 0x21f   : > { %v2831_v4 = vadd.f32 %v2830_v49, %v2754_v18  ;;  %v24965_v56 = vpop.f32.mrb[29].mxu0 }
 0x220   : > { %v8834_v56 = vld [vmem:[%s30020_s3 + $0x80] sm:$0xff] }
 0x222   : > { %v2904_v7 = vpop.f32.mrb[30].mxu0 }
 0x223   : > { %v2905_v9 = vadd.f32 %v2904_v7, %v2831_v4  ;;  %v24970_v55 = vpop.f32.mrb[31].mxu0  ;;  %6432 = vmatmul.mubr.f32.vlgmr.msra.gmra.mrb[0].mxu0 %v28032_v20 }
 0x224   : > { %6915 = vmatpush1.msra.mxu0 %v6914_v26  ;;  %6978 = vmatprep.mubr.f32.mxu0 %v30027_v0 }
 0x225   : > { %6995 = vmatprep.subr.mxu0 %v6994_v13  ;;  %v8914_v13 = vand.u32 4294901760, %v8834_v56 }
 0x226   : > { %v2978_v12 = vpop.f32.mrb[32].mxu0 }
 0x227   : > { %v2979_v50 = vadd.f32 %v2978_v12, %v2905_v9  ;;  %v24975_v44 = vpop.f32.mrb[33].mxu0  ;;  %v8819_v9 = vld [vmem:[%s30020_s3 + $0x8] sm:$0xff]  ;;  %v8837_v12 = vld [vmem:[%s30020_s3 + $0x98] sm:$0xff] }
 0x228   : > { %v8920_v44 = vand.u32 4294901760, %v8836_v60 }
 0x22a   : > { %v3052_v62 = vpop.f32.mrb[34].mxu0 }
 0x22b   : > { %v3053_v63 = vadd.f32 %v3052_v62, %v2979_v50  ;;  %v24980_v59 = vpop.f32.mrb[35].mxu0  ;;  %6984 = vmatmul.mubr.f32.vlgmr.msra.gmra.mrb[0].mxu0 %v28130_v14  ;;  %v7841_v14 = vsel %vm7839_vm10, %v7836_v17, %v28190_v36  ;;  %v8869_v50 = vand.u32 4294901760, %v8819_v9  ;;  %v8820_v62 = vld [vmem:[%s30020_s3 + $0x10] sm:$0xff] }
 0x22c   : > { %7001 = vmatpush1.msra.mxu0 %v7000_v15  ;;  %7064 = vmatprep.mubr.f32.mxu0 %v30027_v0  ;;  %v7847_v58 = vsel %vm354_vm3, %v7841_v14, 0  ;;  %v8923_v15 = vand.u32 4294901760, %v8837_v12  ;;  %v8838_v59 = vld [vmem:[%s30020_s3 + $0xa0] sm:$0xff] }
 0x22d   : > { %7074 = vmatprep.subr.mxu0 %v6991_v33  ;;  %v7851_v28 = vand.u32 4294901760, %v7847_v58  ;;  %v8822_v14 = vld [vmem:[%s30020_s3 + $0x20] sm:$0xff] }
 0x22e   : > { %v3124_v22 = vpop.f32.mrb[36].mxu0 }
 0x22f   : > { %v3125_v20 = vadd.f32 %v3124_v22, %v3053_v63  ;;  %v24985_v19 = vpop.f32.mrb[37].mxu0  ;;  %v7930_v45 = vsub.f32 %v7847_v58, %v7851_v28  ;;  %v8821_v63 = vld [vmem:[%s30020_s3 + $0x18] sm:$0xff]  ;;  %v8823_v58 = vld [vmem:[%s30020_s3 + $0x28] sm:$0xff] }
 0x231   : > { %v28510_v40 = vadd.f32 %v3125_v20, %v28469_v47  ;;  %v7834_v47 = vpop.permute.xlu1 %7833  ;;  %v7931_v36 = vand.u32 4294901760, %v7930_v45  ;;  %v28585_v20 = vsub.f32 %v8834_v56, %v8914_v13 }
 0x232   : > { %v7840_v16 = vsel %vm7839_vm10, %v7834_v47, %v7836_v17  ;;  %v8839_v17 = vld [vmem:[%s30020_s3 + $0xa8] sm:$0xff] }
 0x233   : > { %7066 = vmatmul.mubr.f32.vlgmr.msra.gmra.mrb[0].mxu0 %v28098_v23  ;;  %v7932_v1 = vsub.f32 %v7930_v45, %v7931_v36 }
 0x234   : > { %7077 = vmatpush1.msra.mxu0 %v6997_v3  ;;  %7140 = vmatprep.mubr.f32.mxu0 %v30027_v0 }
 0x235   : > { %7150 = vmatprep.subr.mxu0 %v6912_v53  ;;  %v7933_v61 = vand.u32 4294901760, %v7932_v1  ;;  %v8875_v1 = vand.u32 4294901760, %v8821_v63 }
 0x23b   : > { %7143 = vmatmul.mubr.f32.vlgmr.msra.gmra.mrb[0].mxu0 %v28110_v52  ;;  %v7845_v52 = vsel %vm354_vm3, %v7840_v16, 0  ;;  %v28604_v16 = vpack.c.bf16 %v8923_v15, %v8920_v44  ;;  %vm23778_vm3 = vcmask 1024  }
 0x23c   : > { %7152 = vmatpush1.msra.mxu0 %v6914_v26  ;;  %7215 = vmatprep.mubr.f32.mxu0 %v30027_v0  ;;  %v7853_v8 = vand.u32 4294901760, %v7845_v52 }
 0x23d   : > { %7228 = vmatprep.subr.mxu0 %v6992_v5  ;;  %30112 = vst [vmem:[#allocation8_spill] sm:$0xff] %v28604_v16 }
 0x23e   : > { %v7936_v11 = vsub.f32 %v7845_v52, %v7853_v8  ;;  %v8840_v52 = vld [vmem:[%s30020_s3 + $0xb0] sm:$0xff] }
 0x240   : > { %v7937_v38 = vand.u32 4294901760, %v7936_v11 }
 0x243   : > { %7219 = vmatmul.mubr.f32.vlgmr.msra.gmra.mrb[0].mxu0 %v28120_v25  ;;  %v7938_v25 = vsub.f32 %v7936_v11, %v7937_v38 }
 0x244   : > { %7232 = vmatpush1.msra.mxu0 %v6998_v37  ;;  %7295 = vmatprep.mubr.f32.mxu0 %v30027_v0  ;;  %v8835_v37 = vld [vmem:[%s30020_s3 + $0x88] sm:$0xff] }
 0x245   : > { %7304 = vmatprep.subr.mxu0 %v6912_v53  ;;  %v7939_v42 = vand.u32 4294901760, %v7938_v25  ;;  %v8917_v7 = vand.u32 4294901760, %v8835_v37  ;;  %v8878_v25 = vand.u32 4294901760, %v8822_v14 }
 0x247   : > { %v28583_v22 = vpack.c.bf16 %v8917_v7, %v8914_v13  ;;  %v28587_v19 = vsub.f32 %v8835_v37, %v8917_v7  ;;  %v8827_v13 = vld [vmem:[%s30020_s3 + $0x48] sm:$0xff] }
 0x249   : > { %30110 = vst [vmem:[#allocation6_spill] sm:$0xff] %v28583_v22 }
 0x24b   : > { %7297 = vmatmul.mubr.f32.vlgmr.msra.gmra.mrb[0].mxu0 %v28098_v23 }
 0x24c   : > { %7306 = vmatpush1.msra.mxu0 %v6914_v26  ;;  %7369 = vmatprep.mubr.f32.mxu0 %v30027_v0 }
 0x24d   : > { %7852 = vmatprep.subr.mxu0 %v7851_v28 }
 0x253   : > { %7371 = vmatmul.mubr.f32.vlgmr.msra.gmra.mrb[0].mxu0 %v28098_v23 }
 0x254   : > { %7854 = vmatpush1.msra.mxu0 %v7853_v8  ;;  %7917 = vmatprep.mubr.f32.mxu0 %v30027_v0 }
 0x255   : > { %7934 = vmatprep.subr.mxu0 %v7933_v61  ;;  %v8929_v61 = vand.u32 4294901760, %v8839_v17 }
 0x25b   : > { %7923 = vmatmul.mubr.f32.vlgmr.msra.gmra.mrb[0].mxu0 %v28242_v21 }
 0x25c   : > { %7940 = vmatpush1.msra.mxu0 %v7939_v42  ;;  %8003 = vmatprep.mubr.f32.mxu0 %v30027_v0  ;;  %v8881_v42 = vand.u32 4294901760, %v8823_v58 }
 0x25d   : > { %8013 = vmatprep.subr.mxu0 %v7930_v45  ;;  %v28606_v45 = vsub.f32 %v8836_v60, %v8920_v44 }
 0x25e   : > { %v3693_v48 = vpop.f32.mrb[38].mxu0 }
 0x25f   : > { %v24990_v31 = vpop.f32.mrb[39].mxu0 }
 0x260   : > { %v8932_v31 = vand.u32 4294901760, %v8840_v52 }
 0x262   : > { %v3769_v46 = vpop.f32.mrb[40].mxu0 }
 0x263   : > { %v3770_v43 = vadd.f32 %v3769_v46, %v3693_v48  ;;  %v24995_v30 = vpop.f32.mrb[41].mxu0  ;;  %8005 = vmatmul.mubr.f32.vlgmr.msra.gmra.mrb[0].mxu0 %v28192_v39  ;;  %v8841_v48 = vld [vmem:[%s30020_s3 + $0xb8] sm:$0xff]  ;;  %v8824_v46 = vld [vmem:[%s30020_s3 + $0x30] sm:$0xff] }
 0x264   : > { %8016 = vmatpush1.msra.mxu0 %v7936_v11  ;;  %8079 = vmatprep.mubr.f32.mxu0 %v30027_v0  ;;  %v8872_v11 = vand.u32 4294901760, %v8820_v62 }
 0x265   : > { %8089 = vmatprep.subr.mxu0 %v7851_v28 }
 0x266   : > { %v3843_v23 = vpop.f32.mrb[42].mxu0  ;;  %v28628_v30 = vsub.f32 %v8820_v62, %v8872_v11  ;;  %v8828_v62 = vld [vmem:[%s30020_s3 + $0x50] sm:$0xff] }
 0x267   : > { %v3844_v34 = vadd.f32 %v3843_v23, %v3770_v43  ;;  %v25000_v53 = vpop.f32.mrb[43].mxu0  ;;  %v28626_v43 = vpack.c.bf16 %v8875_v1, %v8872_v11  ;;  %v28630_v23 = vsub.f32 %v8821_v63, %v8875_v1  ;;  %v8829_v63 = vld [vmem:[%s30020_s3 + $0x58] sm:$0xff]  ;;  %v8846_v11 = vld [vmem:[%s30020_s3 + $0xe0] sm:$0xff]  ;;  %v8847_v1 = vld [vmem:[%s30020_s3 + $0xe8] sm:$0xff] }
 0x268   : > { %v8825_v53 = vld [vmem:[%s30020_s3 + $0x38] sm:$0xff] }
 0x269   : > { %30113 = vst [vmem:[#allocation9_spill] sm:$0xff] %v28626_v43 }
 0x26a   : > { %v3917_v33 = vpop.f32.mrb[44].mxu0 }
 0x26b   : > { %v3918_v21 = vadd.f32 %v3917_v33, %v3844_v34  ;;  %v25005_v2 = vpop.f32.mrb[45].mxu0  ;;  %8082 = vmatmul.mubr.f32.vlgmr.msra.gmra.mrb[0].mxu0 %v28207_v54 }
 0x26c   : > { %8091 = vmatpush1.msra.mxu0 %v7853_v8  ;;  %8154 = vmatprep.mubr.f32.mxu0 %v30027_v0  ;;  %v28641_v2 = vsub.f32 %v8822_v14, %v8878_v25 }
 0x26d   : > { %v3992_v26 = vadd.f32 %v28409_v41, %v3918_v21  ;;  %8167 = vmatprep.subr.mxu0 %v7931_v36  ;;  %v8769_v41 = vpop.permute.xlu0 %8768  ;;  %v28614_v36 = vsub.f32 %v8837_v12, %v8923_v15  ;;  %v28639_v21 = vsub.f32 %v8839_v17, %v8929_v61  ;;  %v8844_v12 = vld [vmem:[%s30020_s3 + $0xd0] sm:$0xff]  ;;  %v8899_v17 = vand.u32 4294901760, %v8829_v63 }
 0x26e   : > { %v8944_v44 = vand.u32 4294901760, %v8844_v12 }
 0x26f   : > { %v4064_v5 = vadd.f32 %v28420_v51, %v3992_v26  ;;  %v28643_v26 = vsub.f32 %v8823_v58, %v8881_v42 }
 0x271   : > { %v4069_v18 = vadd.f32 %v4064_v5, %v28510_v40  ;;  %v8935_v5 = vand.u32 4294901760, %v8841_v48 }
 0x273   : > { %v5008_v57 = vadd.f32 %v28433_v6, %v4069_v18  ;;  %8158 = vmatmul.mubr.f32.vlgmr.msra.gmra.mrb[0].mxu0 %v28222_v10  ;;  %v28645_v18 = vsub.f32 %v8840_v52, %v8932_v31 }
 0x274   : > { %8171 = vmatpush1.msra.mxu0 %v7937_v38  ;;  %8234 = vmatprep.mubr.f32.mxu0 %v30027_v0  ;;  %v8926_v38 = vand.u32 4294901760, %v8838_v59 }
 0x275   : > { %v5947_v3 = vadd.f32 %v28442_v32, %v5008_v57  ;;  %8243 = vmatprep.subr.mxu0 %v7851_v28  ;;  %v28602_v28 = vsub.f32 %v8819_v9, %v8869_v50  ;;  %v8884_v57 = vand.u32 4294901760, %v8824_v46  ;;  %v8893_v9 = vand.u32 4294901760, %v8827_v13 }
 0x276   : > { %v28632_v34 = vsub.f32 %v8838_v59, %v8926_v38  ;;  %v28637_v33 = vpack.c.bf16 %v8929_v61, %v8926_v38  ;;  %v8896_v59 = vand.u32 4294901760, %v8828_v62  ;;  %v8950_v61 = vand.u32 4294901760, %v8846_v11 }
 0x277   : > { %v6886_v54 = vadd.f32 %v28454_v24, %v5947_v3  ;;  %v28648_v3 = vpack.c.bf16 %v8881_v42, %v8878_v25  ;;  %v8953_v25 = vand.u32 4294901760, %v8847_v1  ;;  %v8830_v42 = vld [vmem:[%s30020_s3 + $0x60] sm:$0xff] }
 0x278   : > { %30114 = vst [vmem:[#allocation10_spill] sm:$0xff] %v28637_v33  ;;  %v28696_v52 = vpack.c.bf16 %v8899_v17, %v8896_v59 }
 0x279   : > { %v7825_v29 = vadd.f32 %v28480_v27, %v6886_v54  ;;  %30115 = vst [vmem:[#allocation11_spill] sm:$0xff] %v28648_v3  ;;  %v8887_v54 = vand.u32 4294901760, %v8825_v53 }
 0x27a   : > { %30121 = vst [vmem:[#allocation17_spill] sm:$0xff] %v28696_v52 }
 0x27b   : > { %v8764_v49 = vadd.f32 %v28482_v35, %v7825_v29  ;;  %8236 = vmatmul.mubr.f32.vlgmr.msra.gmra.mrb[0].mxu0 %v28192_v39  ;;  %v28651_v29 = vpack.c.bf16 %v8935_v5, %v8932_v31 }
 0x27c   : > { %8245 = vmatpush1.msra.mxu0 %v7853_v8  ;;  %8308 = vmatprep.mubr.f32.mxu0 %v30027_v0  ;;  %v8902_v0 = vand.u32 4294901760, %v8830_v42 }
 0x27d   : > { %v8773_v51 = vadd.f32 %v8769_v41, %v8764_v49  ;;  %26373 = vmatprep.subr.bf16.mxu0 %v28583_v22  ;;  %30116 = vst [vmem:[#allocation12_spill] sm:$0xff] %v28651_v29  ;;  %v28655_v49 = vsub.f32 %v8824_v46, %v8884_v57 }
 0x27f   : > { %v8776_v10 = vmax.f32 %v8773_v51, 0.0  ;;  %v28657_v51 = vsub.f32 %v8825_v53, %v8887_v54 }
 0x281   : > { %8780 = vst.msk [vmem:[#allocation2 + $0x10] sm:$0xff] %vm8779_vm11, %v8776_v10  ;;  %v28660_v10 = vpack.c.bf16 %v8887_v54, %v8884_v57  ;;  %v28719_v57 = vsub.f32 %v8827_v13, %v8893_v9  ;;  %v28721_v54 = vpack.c.bf16 %v8953_v25, %v8950_v61  ;;  %v30048_v13 = vand.u32 4294901760, %v28585_v20 }
 0x283   : > { %8310 = vmatmul.mubr.f32.vlgmr.msra.gmra.mrb[0].mxu0 %v28192_v39  ;;  %v8818_v39 = vld [vmem:[%s30020_s3] sm:$0xff]  ;;  %30117 = vst [vmem:[#allocation13_spill] sm:$0xff] %v28660_v10  ;;  %30123 = vst [vmem:[#allocation19_spill] sm:$0xff] %v28719_v57 }
 0x284   : > { %v8866_v55 = vand.u32 4294901760, %v8818_v39  ;;  %30124 = vst [vmem:[#allocation20_spill] sm:$0xff] %v28721_v54 }
 0x286   : > { %v28589_v40 = vsub.f32 %v8818_v39, %v8866_v55  ;;  %v28600_v47 = vpack.c.bf16 %v8869_v50, %v8866_v55  ;;  %v8826_v39 = vld [vmem:[%s30020_s3 + $0x40] sm:$0xff]  ;;  %v8845_v50 = vld [vmem:[%s30020_s3 + $0xd8] sm:$0xff] }
 0x287   : > { %v8890_v7 = vand.u32 4294901760, %v8826_v39  ;;  %v8947_v15 = vand.u32 4294901760, %v8845_v50 }
 0x288   : > { %30111 = vst [vmem:[#allocation7_spill] sm:$0xff] %v28600_v47  ;;  %v28611_v8 = vld [vmem:[#allocation2 + $0x10] sm:$0xff]  ;;  %26375 = vmatpush3.bf16.msra.mxu0 %v28600_v47 }
 0x289   : > { %26377 = vmatprep.subr.bf16.mxu0 %v28604_v16  ;;  %v28678_v60 = vpack.c.bf16 %v8893_v9, %v8890_v7  ;;  %v28694_v14 = vpack.c.bf16 %v8947_v15, %v8944_v44 }
 0x28b   : > { %30119 = vst [vmem:[#allocation15_spill] sm:$0xff] %v28678_v60  ;;  %30120 = vst [vmem:[#allocation16_spill] sm:$0xff] %v28694_v14 }
 0x28c   : > { %26379 = vmatpush3.bf16.msra.mxu0 %v28626_v43 }
 0x28d   : > { %26381 = vmatprep.subr.bf16.mxu0 %v28637_v33 }
 0x290   : > { %26383 = vmatpush3.bf16.msra.mxu0 %v28648_v3 }
 0x291   : > { %26385 = vmatprep.subr.bf16.mxu0 %v28651_v29  ;;  %v28756_v29 = vsub.f32 %v8828_v62, %v8896_v59 }
 0x293   : > { %30130 = vst [vmem:[#allocation25_spill] sm:$0xff] %v28756_v29 }
 0x294   : > { %26387 = vmatpush3.bf16.msra.mxu0 %v28660_v10  ;;  %v28754_v10 = vsub.f32 %v8845_v50, %v8947_v15 }
 0x296   : > { %30129 = vst [vmem:[#allocation24_spill] sm:$0xff] %v28754_v10 }
 0x356   : > { %v8311_v6 = vpop.f32.mrb[0].mxu0 }
 0x357   : > { %v28544_v32 = vadd.f32 %v8769_v41, %v8311_v6  ;;  %v8313_v24 = vpop.f32.mrb[1].mxu0  ;;  %v8842_v6 = vld [vmem:[%s30020_s3 + $0xc0] sm:$0xff] }
 0x358   : > { %v28546_v4 = vadd.f32 %v8769_v41, %v8313_v24  ;;  %v28653_v41 = vsub.f32 %v8841_v48, %v8935_v5  ;;  %v8843_v24 = vld [vmem:[%s30020_s3 + $0xc8] sm:$0xff]  ;;  %v8938_v56 = vand.u32 4294901760, %v8842_v6  ;;  %v28716_v5 = vsub.f32 %v8826_v39, %v8890_v7 }
 0x359   : > { %v8774_v27 = vmax.f32 %v28544_v32, 0.0  ;;  %v8941_v37 = vand.u32 4294901760, %v8843_v24  ;;  %v8831_v48 = vld [vmem:[%s30020_s3 + $0x68] sm:$0xff]  ;;  %v8832_v32 = vld [vmem:[%s30020_s3 + $0x70] sm:$0xff]  ;;  %v30047_v7 = vand.u32 4294901760, %v28587_v19 }
 0x35a   : > { %v30029_v35 = vmax.f32 %v28546_v4, 0.0  ;;  %v28712_v46 = vsub.f32 %v8842_v6, %v8938_v56  ;;  %v8848_v6 = vld [vmem:[%s30020_s3 + $0xf0] sm:$0xff] }
 0x35b   : > { %8787 = vrot.lane.b32.xlu0 %v8774_v27, %s27626_s15  ;;  %v28676_v55 = vpack.c.bf16 %v8941_v37, %v8938_v56  ;;  %v28714_v53 = vsub.f32 %v8843_v24, %v8941_v37  ;;  %v8849_v24 = vld [vmem:[%s30020_s3 + $0xf8] sm:$0xff]  ;;  %v8956_v37 = vand.u32 4294901760, %v8848_v6 }
 0x35c   : > { %8789 = vrot.lane.b32.xlu1 %v30029_v35, %s27626_s15  ;;  %v8959_v39 = vand.u32 4294901760, %v8849_v24 }
 0x35d   : > { %30118 = vst [vmem:[#allocation14_spill] sm:$0xff] %v28676_v55  ;;  %26389 = vmatprep.subr.bf16.mxu0 %v28676_v55  ;;  %30122 = vst [vmem:[#allocation18_spill] sm:$0xff] %v28714_v53  ;;  %v28752_v55 = vsub.f32 %v8844_v12, %v8944_v44  ;;  %v28769_v12 = vsub.f32 %v8830_v42, %v8902_v0  ;;  %v28775_v15 = vsub.f32 %v8848_v6, %v8956_v37 }
 0x35e   : > { %26391 = vmatpush3.bf16.msra.mxu0 %v28678_v60  ;;  %v28773_v44 = vpack.c.bf16 %v8959_v39, %v8956_v37  ;;  %v28777_v62 = vsub.f32 %v8849_v24, %v8959_v39  ;;  %v30051_v42 = vand.u32 4294901760, %v28630_v23 }
 0x35f   : > { %26393 = vmatprep.subr.bf16.mxu0 %v28694_v14  ;;  %v8905_v14 = vand.u32 4294901760, %v8831_v48  ;;  %30128 = vst [vmem:[#allocation23_spill] sm:$0xff] %v28752_v55  ;;  %30134 = vst [vmem:[#allocation29_spill] sm:$0xff] %v28769_v12 }
 0x360   : > { %8791 = vrot.lane.b32.xlu1 %v28611_v8, %s27626_s15  ;;  %30136 = vst [vmem:[#allocation31_spill] sm:$0xff] %v28773_v44  ;;  %30137 = vst [vmem:[#allocation32_spill] sm:$0xff] %v28775_v15 }
 0x361   : > { %v28771_v50 = vsub.f32 %v8831_v48, %v8905_v14  ;;  %30138 = vst [vmem:[#allocation33_spill] sm:$0xff] %v28777_v62 }
 0x362   : > { %26395 = vmatpush3.bf16.msra.mxu0 %v28696_v52  ;;  %v30127_v52 = vmax.f32 %v28546_v4, 0.0 }
 0x363   : > { %26397 = vmatprep.subr.bf16.mxu0 %v28721_v54  ;;  %v8908_v54 = vand.u32 4294901760, %v8832_v32  ;;  %30135 = vst [vmem:[#allocation30_spill] sm:$0xff] %v28771_v50 }
 0x365   : > { %v28781_v59 = vsub.f32 %v8832_v32, %v8908_v54 }
 0x367   : > { %30140 = vst [vmem:[#allocation35_spill] sm:$0xff] %v28781_v59 }
 0x3cd   : > { %v8788_v58 = vpop.permute.xlu0 %8787 }
 0x3ce   : > { %v8790_v38 = vpop.permute.xlu1 %8789 }
 0x3cf   : > { %v8793_v31 = vsel %vm347_vm2, %v8788_v58, %v8790_v38 }
 0x3d0   : > { %v28725_v35 = vmax.f32 %v8774_v27, %v8793_v31  ;;  %v8833_v27 = vld [vmem:[%s30020_s3 + $0x78] sm:$0xff]  ;;  %v28746_v31 = vpack.c.bf16 %v8905_v14, %v8902_v0  ;;  %v9093_v0 = vsub.f32 %v28585_v20, %v30048_v13  ;;  %v9100_v14 = vsub.f32 %v28587_v19, %v30047_v7 }
 0x3d1   : > { %v8911_v4 = vand.u32 4294901760, %v8833_v27 }
 0x3d2   : > { %v8792_v56 = vpop.permute.xlu1 %8791  ;;  %30126 = vst [vmem:[#allocation22_spill] sm:$0xff] %v28746_v31  ;;  %26399 = vmatpush3.bf16.msra.mxu0 %v28746_v31  ;;  %v9094_v48 = vand.u32 4294901760, %v9093_v0 }
 0x3d3   : > { %v8794_v9 = vsel %vm347_vm2, %v8790_v38, %v8792_v56  ;;  %v28744_v58 = vmax.f32 %v28611_v8, %v8792_v56  ;;  %v28760_v38 = vsub.f32 %v8829_v63, %v8899_v17  ;;  %v28762_v8 = vsub.f32 %v8846_v11, %v8950_v61  ;;  %26401 = vmatprep.subr.bf16.mxu0 %v28773_v44 }
 0x3d4   : > { %v28750_v60 = vmax.f32 %v30127_v52, %v8794_v9  ;;  %v28764_v56 = vsub.f32 %v8847_v1, %v8953_v25  ;;  %v28779_v63 = vpack.c.bf16 %v8911_v4, %v8908_v54  ;;  %v28783_v17 = vsub.f32 %v8833_v27, %v8911_v4 }
 0x3d5   : > { %30125 = vst [vmem:[#allocation21_spill] sm:$0xff] %v28744_v58  ;;  %8808 = vrot.lane.b32.xlu0 %v28744_v58, %s27628_s17  ;;  %30131 = vst [vmem:[#allocation26_spill] sm:$0xff] %v28760_v38  ;;  %v30045_v52 = vand.u32 4294901760, %v28589_v40  ;;  %v30044_v11 = vand.u32 4294901760, %v28602_v28  ;;  %v30046_v1 = vand.u32 4294901760, %v28606_v45  ;;  %v30050_v61 = vand.u32 4294901760, %v28614_v36 }
 0x3d6   : > { %30132 = vst [vmem:[#allocation27_spill] sm:$0xff] %v28762_v8  ;;  %30133 = vst [vmem:[#allocation28_spill] sm:$0xff] %v28764_v56  ;;  %8806 = vrot.lane.b32.xlu1 %v28750_v60, %s27628_s17  ;;  %26403 = vmatpush3.bf16.msra.mxu0 %v28779_v63  ;;  %v30049_v25 = vand.u32 4294901760, %v28628_v30  ;;  %v9101_v54 = vand.u32 4294901760, %v9100_v14  ;;  %v9002_v27 = vsub.f32 %v28630_v23, %v30051_v42  ;;  %v30056_v14 = vand.u32 4294901760, %v28632_v34 }
 0x3d7   : > { %30139 = vst [vmem:[#allocation34_spill] sm:$0xff] %v28779_v63  ;;  %30141 = vst [vmem:[#allocation36_spill] sm:$0xff] %v28783_v17  ;;  %v8981_v6 = vsub.f32 %v28589_v40, %v30045_v52  ;;  %v8988_v24 = vsub.f32 %v28602_v28, %v30044_v11  ;;  %v9107_v37 = vsub.f32 %v28606_v45, %v30046_v1  ;;  %v30052_v42 = vand.u32 4294901760, %v28641_v2 }
 0x3d8   : > { %v9114_v39 = vsub.f32 %v28614_v36, %v30050_v61  ;;  %v8995_v32 = vsub.f32 %v28628_v30, %v30049_v25  ;;  %v26404_v9 = vpack.c.bf16 %v9101_v54, %v9094_v48  ;;  %v9003_v7 = vand.u32 4294901760, %v9002_v27 }
 0x3d9   : > { %v8982_v4 = vand.u32 4294901760, %v8981_v6  ;;  %v8989_v0 = vand.u32 4294901760, %v8988_v24  ;;  %v9108_v11 = vand.u32 4294901760, %v9107_v37  ;;  %v9121_v25 = vsub.f32 %v28632_v34, %v30056_v14 }
 0x3da   : > { %8804 = vrot.lane.b32.xlu1 %v28725_v35, %s27628_s17  ;;  %v9115_v52 = vand.u32 4294901760, %v9114_v39  ;;  %v8996_v1 = vand.u32 4294901760, %v8995_v32  ;;  %26405 = vmatprep.subr.bf16.mxu0 %v26404_v9  ;;  %v30053_v61 = vand.u32 4294901760, %v28639_v21  ;;  %v30054_v6 = vand.u32 4294901760, %v28643_v26  ;;  %s27637_s17 = smov 117  }
 0x3db   : > { %v28820_v13 = vpack.c.bf16 %v8989_v0, %v8982_v4  ;;  %v30055_v24 = vand.u32 4294901760, %v28645_v18  ;;  %v9122_v37 = vand.u32 4294901760, %v9121_v25  ;;  %v9009_v32 = vsub.f32 %v28641_v2, %v30052_v42 }
 0x3dc   : > { %v28827_v48 = vpack.c.bf16 %v9115_v52, %v9108_v11  ;;  %v28829_v54 = vpack.c.bf16 %v9003_v7, %v8996_v1  ;;  %v9128_v39 = vsub.f32 %v28639_v21, %v30053_v61  ;;  %v30057_v27 = vand.u32 4294901760, %v28653_v41 }
 0x3dd   : > { %v9016_v7 = vsub.f32 %v28643_v26, %v30054_v6  ;;  %v9135_v52 = vsub.f32 %v28645_v18, %v30055_v24  ;;  %v30061_v11 = vand.u32 4294901760, %v28655_v49  ;;  %v30068_v1 = vand.u32 4294901760, %v28657_v51 }
 0x3de   : > { %v9129_v25 = vand.u32 4294901760, %v9128_v39  ;;  %v9010_v9 = vand.u32 4294901760, %v9009_v32  ;;  %v9142_v4 = vsub.f32 %v28653_v41, %v30057_v27  ;;  %v30067_v0 = vand.u32 4294901760, %v28712_v46 }
 0x3df   : > { %v9017_v42 = vand.u32 4294901760, %v9016_v7  ;;  %v9136_v61 = vand.u32 4294901760, %v9135_v52  ;;  %v9023_v6 = vsub.f32 %v28655_v49, %v30061_v11  ;;  %v9030_v24 = vsub.f32 %v28657_v51, %v30068_v1 }
 0x3e0   : > { %v28858_v14 = vpack.c.bf16 %v9129_v25, %v9122_v37  ;;  %v9143_v39 = vand.u32 4294901760, %v9142_v4  ;;  %v9149_v32 = vsub.f32 %v28712_v46, %v30067_v0  ;;  %v30064_v27 = vand.u32 4294901760, %v28714_v53 }
 0x3e1   : > { %v28864_v58 = vpack.c.bf16 %v9017_v42, %v9010_v9  ;;  %v9024_v7 = vand.u32 4294901760, %v9023_v6  ;;  %v9031_v52 = vand.u32 4294901760, %v9030_v24  ;;  %v30065_v63 = vand.u32 4294901760, %v28716_v5 }
 0x3e2   : > { %v28867_v11 = vpack.c.bf16 %v9143_v39, %v9136_v61  ;;  %v9150_v44 = vand.u32 4294901760, %v9149_v32  ;;  %v9156_v37 = vsub.f32 %v28714_v53, %v30064_v27  ;;  %v30066_v25 = vand.u32 4294901760, %v28719_v57 }
 0x3e3   : > { %v28873_v4 = vpack.c.bf16 %v9031_v52, %v9024_v7  ;;  %v9037_v42 = vsub.f32 %v28716_v5, %v30065_v63  ;;  %v30071_v6 = vand.u32 4294901760, %v28752_v55  ;;  %v30074_v24 = vand.u32 4294901760, %v28754_v10 }
 0x3e4   : > { %v9157_v9 = vand.u32 4294901760, %v9156_v37  ;;  %v9044_v61 = vsub.f32 %v28719_v57, %v30066_v25  ;;  %v30075_v39 = vand.u32 4294901760, %v28756_v29  ;;  %v30076_v32 = vand.u32 4294901760, %v28760_v38 }
 0x3e5   : > { %v9038_v27 = vand.u32 4294901760, %v9037_v42  ;;  %v9163_v7 = vsub.f32 %v28752_v55, %v30071_v6  ;;  %v9170_v52 = vsub.f32 %v28754_v10, %v30074_v24  ;;  %v30078_v31 = vand.u32 4294901760, %v28762_v8 }
 0x3e6   : > { %v28891_v63 = vpack.c.bf16 %v9157_v9, %v9150_v44  ;;  %v9045_v37 = vand.u32 4294901760, %v9044_v61  ;;  %v9051_v25 = vsub.f32 %v28756_v29, %v30075_v39  ;;  %v9058_v0 = vsub.f32 %v28760_v38, %v30076_v32 }
 0x3e7   : > { %v9164_v42 = vand.u32 4294901760, %v9163_v7  ;;  %v9171_v1 = vand.u32 4294901760, %v9170_v52  ;;  %v30077_v6 = vand.u32 4294901760, %v28764_v56  ;;  %v30079_v9 = vand.u32 4294901760, %v28769_v12 }
 0x3e8   : > { %v28901_v3 = vpack.c.bf16 %v9045_v37, %v9038_v27  ;;  %v9052_v24 = vand.u32 4294901760, %v9051_v25  ;;  %v9059_v44 = vand.u32 4294901760, %v9058_v0  ;;  %v9177_v39 = vsub.f32 %v28762_v8, %v30078_v31 }
 0x3e9   : > { %v28904_v61 = vpack.c.bf16 %v9171_v1, %v9164_v42  ;;  %v9184_v7 = vsub.f32 %v28764_v56, %v30077_v6  ;;  %v30082_v52 = vand.u32 4294901760, %v28771_v50  ;;  %v9065_v27 = vsub.f32 %v28769_v12, %v30079_v9 }
 0x3ea   : > { %v28913_v32 = vpack.c.bf16 %v9059_v44, %v9052_v24  ;;  %v30087_v0 = vand.u32 4294901760, %v28775_v15  ;;  %v30092_v1 = vand.u32 4294901760, %v28777_v62  ;;  %v9178_v25 = vand.u32 4294901760, %v9177_v39 }
 0x3eb   : > { %v9185_v37 = vand.u32 4294901760, %v9184_v7  ;;  %v9072_v42 = vsub.f32 %v28771_v50, %v30082_v52  ;;  %v30094_v6 = vand.u32 4294901760, %v28781_v59  ;;  %v9066_v31 = vand.u32 4294901760, %v9065_v27 }
 0x3ec   : > { %30142 = vst [vmem:[#allocation37_spill] sm:$0xff] %v28913_v32  ;;  %v9191_v24 = vsub.f32 %v28775_v15, %v30087_v0  ;;  %v9198_v44 = vsub.f32 %v28777_v62, %v30092_v1  ;;  %v30093_v9 = vand.u32 4294901760, %v28783_v17  ;;  %v26436_v1 = vpack.c.bf16 %v28587_v19, %v28585_v20 }
 0x3ed   : > { %v26428_v33 = vpack.c.bf16 %v9185_v37, %v9178_v25  ;;  %v9073_v39 = vand.u32 4294901760, %v9072_v42  ;;  %v9079_v7 = vsub.f32 %v28781_v59, %v30094_v6  ;;  %v26438_v25 = vpack.c.bf16 %v28602_v28, %v28589_v40 }
 0x3ee   : > { %v9192_v52 = vand.u32 4294901760, %v9191_v24  ;;  %v9199_v43 = vand.u32 4294901760, %v9198_v44  ;;  %v9086_v27 = vsub.f32 %v28783_v17, %v30093_v9  ;;  %v26440_v37 = vpack.c.bf16 %v28614_v36, %v28606_v45 }
 0x3ef   : > { %v26430_v16 = vpack.c.bf16 %v9073_v39, %v9066_v31  ;;  %v9080_v0 = vand.u32 4294901760, %v9079_v7  ;;  %v26442_v42 = vpack.c.bf16 %v28630_v23, %v28628_v30  ;;  %v26444_v24 = vpack.c.bf16 %v28639_v21, %v28632_v34 }
 0x3f0   : > { %v26432_v47 = vpack.c.bf16 %v9199_v43, %v9192_v52  ;;  %v9087_v22 = vand.u32 4294901760, %v9086_v27  ;;  %v26446_v43 = vpack.c.bf16 %v28643_v26, %v28641_v2  ;;  %v26450_v31 = vpack.c.bf16 %v28657_v51, %v28655_v49 }
 0x3f1   : > { %v26452_v52 = vpack.c.bf16 %v28714_v53, %v28712_v46  ;;  %v26456_v44 = vpack.c.bf16 %v28754_v10, %v28752_v55  ;;  %v26458_v39 = vpack.c.bf16 %v28760_v38, %v28756_v29  ;;  %v26460_v7 = vpack.c.bf16 %v28764_v56, %v28762_v8 }
 0x3f2   : > { %v26434_v32 = vpack.c.bf16 %v9087_v22, %v9080_v0  ;;  %v26448_v22 = vpack.c.bf16 %v28653_v41, %v28645_v18  ;;  %v26454_v0 = vpack.c.bf16 %v28719_v57, %v28716_v5  ;;  %v26462_v27 = vpack.c.bf16 %v28771_v50, %v28769_v12 }
 0x3f3   : > { %v26464_v9 = vpack.c.bf16 %v28777_v62, %v28775_v15  ;;  %v26466_v6 = vpack.c.bf16 %v28783_v17, %v28781_v59  ;;  %vm15470_vm2 = vcmask 130048  }
 0x447   : > { %v28969_v53 = vpop.permute.xlu0 %8808 }
 0x448   : > { %30143 = vst [vmem:[#allocation38_spill] sm:$0xff] %v28969_v53  ;;  %v8807_v57 = vpop.permute.xlu1 %8806 }
 0x449   : > { %v8811_v10 = vsel %vm3144_vm5, %v8807_v57, %v28969_v53 }
 0x44a   : > { %v8816_v38 = vmax.f32 %v28750_v60, %v8811_v10 }
 0x44c   : > { %v28974_v29 = vand.u32 4294901760, %v8816_v38  ;;  %v8805_v56 = vpop.permute.xlu1 %8804 }
 0x44d   : > { %v8810_v8 = vsel %vm3144_vm5, %v8805_v56, %v8807_v57  ;;  %v30150_v57 = vld [vmem:[#allocation11_spill] sm:$0xff]  ;;  %v30155_v56 = vld [vmem:[#allocation16_spill] sm:$0xff] }
 0x44e   : > { %v8962_v50 = vsub.f32 %v8816_v38, %v28974_v29  ;;  %v8815_v62 = vmax.f32 %v28725_v35, %v8810_v8  ;;  %v30144_v35 = vld [vmem:[#allocation37_spill] sm:$0xff]  ;;  %v30153_v38 = vld [vmem:[#allocation14_spill] sm:$0xff]  ;;  %v30154_v8 = vld [vmem:[#allocation15_spill] sm:$0xff] }
 0x450   : > { %v28979_v15 = vand.u32 4294901760, %v8815_v62  ;;  %v8963_v17 = vand.u32 4294901760, %v8962_v50 }
 0x452   : > { %v28982_v59 = vsub.f32 %v8815_v62, %v28979_v15  ;;  %v8964_v12 = vsub.f32 %v8962_v50, %v8963_v17  ;;  %v30158_v62 = vld [vmem:[#allocation22_spill] sm:$0xff] }
 0x454   : > { %v8969_v53 = vand.u32 4294901760, %v28982_v59  ;;  %v8965_v55 = vand.u32 4294901760, %v8964_v12  ;;  %v30156_v12 = vld [vmem:[#allocation17_spill] sm:$0xff] }
 0x456   : > { %8966 = vmatprep.mubr.f32.mxu0 %v8965_v55  ;;  %v8970_v10 = vsub.f32 %v28982_v59, %v8969_v53  ;;  %v30149_v55 = vld [vmem:[#allocation10_spill] sm:$0xff] }
 0x458   : > { %v8971_v60 = vand.u32 4294901760, %v8970_v10  ;;  %v30191_v10 = vld [vmem:[#allocation27_spill] sm:$0xff] }
 0x45a   : > { %8972 = vmatmul.mubr.f32.vlgmr.msra.gmra.mrb[46].mxu0 %v8971_v60  ;;  %v30192_v60 = vand.u32 4294901760, %v30191_v10 }
 0x45b   : > { %26407 = vmatpush3.bf16.msra.mxu0 %v28820_v13  ;;  %9202 = vmatprep.mubr.f32.mxu0 %v28974_v29  ;;  %v30151_v13 = vld [vmem:[#allocation12_spill] sm:$0xff] }
 0x45c   : > { %26409 = vmatprep.subr.bf16.mxu0 %v28827_v48  ;;  %v30162_v48 = vld [vmem:[#allocation34_spill] sm:$0xff] }
 0x45f   : > { %26411 = vmatpush3.bf16.msra.mxu0 %v28829_v54  ;;  %v30163_v54 = vand.u32 4294901760, %v28589_v40  ;;  %v30169_v40 = vand.u32 4294901760, %v28632_v34  ;;  %v30176_v34 = vand.u32 4294901760, %v28657_v51  ;;  %v30187_v51 = vld [vmem:[#allocation25_spill] sm:$0xff] }
 0x460   : > { %26413 = vmatprep.subr.bf16.mxu0 %v28858_v14 }
 0x463   : > { %26415 = vmatpush3.bf16.msra.mxu0 %v28864_v58  ;;  %v30152_v58 = vld [vmem:[#allocation13_spill] sm:$0xff] }
 0x464   : > { %26417 = vmatprep.subr.bf16.mxu0 %v28867_v11  ;;  %v30164_v11 = vand.u32 4294901760, %v28602_v28  ;;  %v30170_v28 = vand.u32 4294901760, %v28639_v21  ;;  %v30177_v21 = vand.u32 4294901760, %v28712_v46 }
 0x467   : > { %26419 = vmatpush3.bf16.msra.mxu0 %v28873_v4  ;;  %v26502_v4 = vpack.c.bf16 %v30164_v11, %v30163_v54  ;;  %v30197_v54 = vld [vmem:[#allocation30_spill] sm:$0xff] }
 0x468   : > { %26421 = vmatprep.subr.bf16.mxu0 %v28891_v63  ;;  %v30159_v63 = vld [vmem:[#allocation31_spill] sm:$0xff]  ;;  %v30198_v11 = vand.u32 4294901760, %v30197_v54 }
 0x46b   : > { %26423 = vmatpush3.bf16.msra.mxu0 %v28901_v3  ;;  %v30148_v3 = vld [vmem:[#allocation9_spill] sm:$0xff] }
 0x46c   : > { %26425 = vmatprep.subr.bf16.mxu0 %v28904_v61 }
 0x46f   : > { %26427 = vmatpush3.bf16.msra.mxu0 %v30144_v35  ;;  %v30193_v35 = vld [vmem:[#allocation28_spill] sm:$0xff] }
 0x470   : > { %26429 = vmatprep.subr.bf16.mxu0 %v26428_v33  ;;  %v30147_v33 = vld [vmem:[#allocation8_spill] sm:$0xff] }
 0x473   : > { %26431 = vmatpush3.bf16.msra.mxu0 %v26430_v16  ;;  %v30146_v16 = vld [vmem:[#allocation7_spill] sm:$0xff] }
 0x474   : > { %26433 = vmatprep.subr.bf16.mxu0 %v26432_v47  ;;  %v30145_v47 = vld [vmem:[#allocation6_spill] sm:$0xff] }
 0x477   : > { %26435 = vmatpush3.bf16.msra.mxu0 %v26434_v32  ;;  %v30166_v32 = vand.u32 4294901760, %v28614_v36  ;;  %v30172_v36 = vand.u32 4294901760, %v28643_v26  ;;  %v30180_v26 = vand.u32 4294901760, %v28716_v5  ;;  %v30194_v5 = vand.u32 4294901760, %v30193_v35 }
 0x478   : > { %26437 = vmatprep.subr.bf16.mxu0 %v26436_v1  ;;  %v26508_v1 = vpack.c.bf16 %v30170_v28, %v30169_v40  ;;  %v30205_v28 = vld [vmem:[#allocation36_spill] sm:$0xff] }
 0x47a   : > { %9204 = vmatmul.mubr.f32.vlgmr.msra.gmra.mrb[48].mxu0 %v28979_v15 }
 0x47b   : > { %26439 = vmatpush3.bf16.msra.mxu0 %v26438_v25  ;;  %9339 = vmatprep.mubr.f32.mxu0 %v8962_v50  ;;  %v30157_v50 = vld [vmem:[#allocation20_spill] sm:$0xff]  ;;  %v30173_v25 = vand.u32 4294901760, %v28645_v18 }
 0x47c   : > { %26441 = vmatprep.subr.bf16.mxu0 %v26440_v37 }
 0x47f   : > { %26443 = vmatpush3.bf16.msra.mxu0 %v26442_v42 }
 0x480   : > { %26445 = vmatprep.subr.bf16.mxu0 %v26444_v24  ;;  %v30178_v24 = vld [vmem:[#allocation18_spill] sm:$0xff] }
 0x483   : > { %26447 = vmatpush3.bf16.msra.mxu0 %v26446_v43 }
 0x484   : > { %26449 = vmatprep.subr.bf16.mxu0 %v26448_v22  ;;  %v30181_v22 = vld [vmem:[#allocation19_spill] sm:$0xff] }
 0x485   : > { %v30182_v18 = vand.u32 4294901760, %v30181_v22 }
 0x487   : > { %26451 = vmatpush3.bf16.msra.mxu0 %v26450_v31  ;;  %v26518_v31 = vpack.c.bf16 %v30182_v18, %v30180_v26 }
 0x488   : > { %26453 = vmatprep.subr.bf16.mxu0 %v26452_v52 }
 0x48b   : > { %26455 = vmatpush3.bf16.msra.mxu0 %v26454_v0  ;;  %v30185_v0 = vld [vmem:[#allocation24_spill] sm:$0xff] }
 0x48c   : > { %26457 = vmatprep.subr.bf16.mxu0 %v26456_v44 }
 0x48f   : > { %26459 = vmatpush3.bf16.msra.mxu0 %v26458_v39  ;;  %v30188_v39 = vand.u32 4294901760, %v30187_v51 }
 0x490   : > { %26461 = vmatprep.subr.bf16.mxu0 %v26460_v7  ;;  %v30189_v7 = vld [vmem:[#allocation26_spill] sm:$0xff] }
 0x491   : > { %v30190_v46 = vand.u32 4294901760, %v30189_v7 }
 0x493   : > { %26463 = vmatpush3.bf16.msra.mxu0 %v26462_v27  ;;  %v26522_v27 = vpack.c.bf16 %v30190_v46, %v30188_v39 }
 0x494   : > { %26465 = vmatprep.subr.bf16.mxu0 %v26464_v9 }
 0x497   : > { %26467 = vmatpush3.bf16.msra.mxu0 %v26466_v6  ;;  %v30165_v6 = vand.u32 4294901760, %v28606_v45  ;;  %v30171_v45 = vand.u32 4294901760, %v28641_v2  ;;  %v30179_v2 = vand.u32 4294901760, %v30178_v24 }
 0x498   : > { %26469 = vmatprep.subr.bf16.mxu0 %v30145_v47 }
 0x499   : > { %v26504_v9 = vpack.c.bf16 %v30166_v32, %v30165_v6  ;;  %v26516_v43 = vpack.c.bf16 %v30179_v2, %v30177_v21  ;;  %v30199_v6 = vld [vmem:[#allocation32_spill] sm:$0xff]  ;;  %v30209_v2 = vmov 0.0  }
 0x49a   : > { %9342 = vmatmul.mubr.f32.vlgmr.msra.gmra.mrb[50].mxu0 %v28982_v59  ;;  %v30160_v59 = vand.u32 4294901760, %v28585_v20  ;;  %v30167_v20 = vand.u32 4294901760, %v28628_v30  ;;  %v30174_v30 = vand.u32 4294901760, %v28653_v41  ;;  %v30183_v41 = vld [vmem:[#allocation23_spill] sm:$0xff]  ;;  %v30200_v32 = vand.u32 4294901760, %v30199_v6 }
 0x49b   : > { %26471 = vmatpush3.bf16.msra.mxu0 %v30146_v16  ;;  %9446 = vmatprep.mubr.f32.mxu0 %v8963_v17  ;;  %v30161_v17 = vand.u32 4294901760, %v28587_v19  ;;  %v30168_v19 = vand.u32 4294901760, %v28630_v23  ;;  %v30175_v23 = vand.u32 4294901760, %v28655_v49  ;;  %v30184_v52 = vand.u32 4294901760, %v30183_v41 }
 0x49c   : > { %26473 = vmatprep.subr.bf16.mxu0 %v30147_v33  ;;  %v26512_v37 = vpack.c.bf16 %v30174_v30, %v30173_v25  ;;  %v30186_v49 = vand.u32 4294901760, %v30185_v0  ;;  %v8855_v25 = vld [vmem:[%s30020_s3 + $0x128] sm:$0xff] }
 0x49d   : > { %v26500_v14 = vpack.c.bf16 %v30161_v17, %v30160_v59  ;;  %v26506_v61 = vpack.c.bf16 %v30168_v19, %v30167_v20  ;;  %v26514_v42 = vpack.c.bf16 %v30176_v34, %v30175_v23  ;;  %v26524_v59 = vpack.c.bf16 %v30194_v5, %v30192_v60  ;;  %v30195_v17 = vld [vmem:[#allocation29_spill] sm:$0xff] }
 0x49e   : > { %v26520_v44 = vpack.c.bf16 %v30186_v49, %v30184_v52  ;;  %v9743_v24 = vand.u32 4294901760, %v8855_v25 }
 0x49f   : > { %26475 = vmatpush3.bf16.msra.mxu0 %v30148_v3 }
 0x4a0   : > { %26477 = vmatprep.subr.bf16.mxu0 %v30149_v55  ;;  %v29155_v18 = vsub.f32 %v8855_v25, %v9743_v24 }
 0x4a3   : > { %26479 = vmatpush3.bf16.msra.mxu0 %v30150_v57 }
 0x4a4   : > { %26481 = vmatprep.subr.bf16.mxu0 %v30151_v13 }
 0x4a7   : > { %26483 = vmatpush3.bf16.msra.mxu0 %v30152_v58 }
 0x4a8   : > { %26485 = vmatprep.subr.bf16.mxu0 %v30153_v38 }
 0x4ab   : > { %26487 = vmatpush3.bf16.msra.mxu0 %v30154_v8 }
 0x4ac   : > { %26489 = vmatprep.subr.bf16.mxu0 %v30155_v56 }
 0x4af   : > { %26491 = vmatpush3.bf16.msra.mxu0 %v30156_v12 }
 0x4b0   : > { %26493 = vmatprep.subr.bf16.mxu0 %v30157_v50 }
 0x4b3   : > { %26495 = vmatpush3.bf16.msra.mxu0 %v30158_v62 }
 0x4b4   : > { %26497 = vmatprep.subr.bf16.mxu0 %v30159_v63 }
 0x4b7   : > { %26499 = vmatpush3.bf16.msra.mxu0 %v30162_v48 }
 0x4b8   : > { %26501 = vmatprep.subr.bf16.mxu0 %v26500_v14  ;;  %v30196_v14 = vand.u32 4294901760, %v30195_v17 }
 0x4ba   : > { %9450 = vmatmul.mubr.f32.vlgmr.msra.gmra.mrb[52].mxu0 %v8969_v53  ;;  %v26510_v53 = vpack.c.bf16 %v30172_v36, %v30171_v45  ;;  %v27636_v36 = vmov 0.0|0.0  }
 0x4bb   : > { %26503 = vmatpush3.bf16.msra.mxu0 %v26502_v4  ;;  %9616 = vmatprep.mubr.f32.mxu0 %v28974_v29  ;;  %v26526_v4 = vpack.c.bf16 %v30198_v11, %v30196_v14 }
 0x4bc   : > { %26505 = vmatprep.subr.bf16.mxu0 %v26504_v9  ;;  %v30201_v9 = vld [vmem:[#allocation33_spill] sm:$0xff] }
 0x4bd   : > { %v30202_v20 = vand.u32 4294901760, %v30201_v9 }
 0x4bf   : > { %26507 = vmatpush3.bf16.msra.mxu0 %v26506_v61  ;;  %v26528_v19 = vpack.c.bf16 %v30202_v20, %v30200_v32  ;;  %v30203_v61 = vld [vmem:[#allocation35_spill] sm:$0xff] }
 0x4c0   : > { %26509 = vmatprep.subr.bf16.mxu0 %v26508_v1  ;;  %v30204_v40 = vand.u32 4294901760, %v30203_v61  ;;  %v30206_v1 = vand.u32 4294901760, %v30205_v28 }
 0x4c2   : > { %v26530_v45 = vpack.c.bf16 %v30206_v1, %v30204_v40 }
 0x4c3   : > { %26511 = vmatpush3.bf16.msra.mxu0 %v26510_v53  ;;  %v8854_v53 = vld [vmem:[%s30020_s3 + $0x120] sm:$0xff] }
 0x4c4   : > { %26513 = vmatprep.subr.bf16.mxu0 %v26512_v37  ;;  %v9740_v21 = vand.u32 4294901760, %v8854_v53 }
 0x4c6   : > { %v29153_v22 = vsub.f32 %v8854_v53, %v9740_v21  ;;  %v29161_v0 = vpack.c.bf16 %v9743_v24, %v9740_v21 }
 0x4c7   : > { %26515 = vmatpush3.bf16.msra.mxu0 %v26514_v42 }
 0x4c8   : > { %26517 = vmatprep.subr.bf16.mxu0 %v26516_v43  ;;  %v8856_v43 = vld [vmem:[%s30020_s3 + $0x130] sm:$0x1]  ;;  %v9840_v46 = vand.u32 4294901760, %v29153_v22  ;;  %v26589_v1 = vpack.c.bf16 %v29155_v18, %v29153_v22 }
 0x4c9   : > { %v8863_v49 = vsel %vm8861_vm13, %v8856_v43, 0 }
 0x4ca   : > { %v29173_v10 = vand.u32 4294901760, %v8863_v49  ;;  %v9841_v14 = vsub.f32 %v29153_v22, %v9840_v46 }
 0x4cb   : > { %26519 = vmatpush3.bf16.msra.mxu0 %v26518_v31 }
 0x4cc   : > { %26521 = vmatprep.subr.bf16.mxu0 %v26520_v44  ;;  %v29181_v35 = vsub.f32 %v8863_v49, %v29173_v10  ;;  %v9842_v6 = vand.u32 4294901760, %v9841_v14  ;;  %v23852_v49 = vld [vmem:[%s30021_s4 + $0x18] sm:$0xff]  ;;  %v10253_v14 = vld [vmem:[%s30021_s4] sm:$0xff] }
 0x4ce   : > { %v9854_v9 = vand.u32 4294901760, %v29181_v35 }
 0x4cf   : > { %26523 = vmatpush3.bf16.msra.mxu0 %v26522_v27  ;;  %v9847_v27 = vand.u32 4294901760, %v29155_v18 }
 0x4d0   : > { %26525 = vmatprep.subr.bf16.mxu0 %v26524_v59 }
 0x4d1   : > { %v9848_v54 = vsub.f32 %v29155_v18, %v9847_v27 }
 0x4d3   : > { %26527 = vmatpush3.bf16.msra.mxu0 %v26526_v4  ;;  %v9849_v32 = vand.u32 4294901760, %v9848_v54  ;;  %v10760_v54 = vsel %vm10263_vm14, %v10253_v14, 0 }
 0x4d4   : > { %26529 = vmatprep.subr.bf16.mxu0 %v26528_v19  ;;  %v9855_v19 = vsub.f32 %v29181_v35, %v9854_v9 }
 0x4d5   : > { %v26580_v20 = vpack.c.bf16 %v9849_v32, %v9842_v6 }
 0x4d6   : > { %v9856_v61 = vand.u32 4294901760, %v9855_v19 }
 0x4d7   : > { %26531 = vmatpush3.bf16.msra.mxu0 %v26530_v45 }
 0x4d8   : > { %26533 = vmatprep.subr.bf16.mxu0 %v30145_v47  ;;  %v30207_v47 = vld [vmem:[#allocation38_spill] sm:$0xff] }
 0x4da   : > { %9618 = vmatmul.mubr.f32.vlgmr.msra.gmra.mrb[54].mxu0 %v28979_v15 }
 0x4db   : > { %26535 = vmatpush3.bf16.msra.mxu0 %v30146_v16  ;;  %9720 = vmatprep.mubr.f32.mxu0 %v28974_v29  ;;  %v30208_v29 = vld [vmem:[#allocation21_spill] sm:$0xff] }
 0x4dc   : > { %26537 = vmatprep.subr.bf16.mxu0 %v30147_v33  ;;  %v8817_v16 = vmax.f32 %v30208_v29, %v30207_v47  ;;  %v8850_v33 = vld [vmem:[%s30020_s3 + $0x100] sm:$0xff] }
 0x4df   : > { %26539 = vmatpush3.bf16.msra.mxu0 %v30148_v3  ;;  %v8851_v3 = vld [vmem:[%s30020_s3 + $0x108] sm:$0xff] }
 0x4e0   : > { %26541 = vmatprep.subr.bf16.mxu0 %v30149_v55  ;;  %v9728_v55 = vand.u32 4294901760, %v8850_v33 }
 0x4e3   : > { %26543 = vmatpush3.bf16.msra.mxu0 %v30150_v57  ;;  %v9731_v57 = vand.u32 4294901760, %v8851_v3 }
 0x4e4   : > { %26545 = vmatprep.subr.bf16.mxu0 %v30151_v13  ;;  %v8859_v13 = vsel %vm8857_vm12, %v8817_v16, 0 }
 0x4e7   : > { %26547 = vmatpush3.bf16.msra.mxu0 %v30152_v58  ;;  %v29106_v58 = vsub.f32 %v8850_v33, %v9728_v55 }
 0x4e8   : > { %26549 = vmatprep.subr.bf16.mxu0 %v30153_v38  ;;  %v29108_v38 = vsub.f32 %v8851_v3, %v9731_v57  ;;  %v26607_v3 = vpack.c.bf16 %v9847_v27, %v9840_v46 }
 0x4e9   : > { %v9812_v30 = vand.u32 4294901760, %v29106_v58 }
 0x4ea   : > { %v9819_v37 = vand.u32 4294901760, %v29108_v38  ;;  %v26583_v40 = vpack.c.bf16 %v29108_v38, %v29106_v58 }
 0x4eb   : > { %26551 = vmatpush3.bf16.msra.mxu0 %v30154_v8  ;;  %v8852_v8 = vld [vmem:[%s30020_s3 + $0x110] sm:$0xff] }
 0x4ec   : > { %26553 = vmatprep.subr.bf16.mxu0 %v30155_v56  ;;  %v8853_v56 = vld [vmem:[%s30020_s3 + $0x118] sm:$0xff]  ;;  %v9820_v26 = vsub.f32 %v29108_v38, %v9819_v37  ;;  %v26601_v16 = vpack.c.bf16 %v9819_v37, %v9812_v30 }
 0x4ee   : > { %v9821_v51 = vand.u32 4294901760, %v9820_v26 }
 0x4ef   : > { %26555 = vmatpush3.bf16.msra.mxu0 %v30156_v12  ;;  %v29116_v12 = vand.u32 4294901760, %v8859_v13 }
 0x4f0   : > { %26557 = vmatprep.subr.bf16.mxu0 %v30157_v50  ;;  %v29119_v50 = vpack.c.bf16 %v9731_v57, %v9728_v55 }
 0x4f1   : > { %v29135_v34 = vsub.f32 %v8859_v13, %v29116_v12 }
 0x4f3   : > { %26559 = vmatpush3.bf16.msra.mxu0 %v30158_v62  ;;  %v9734_v62 = vand.u32 4294901760, %v8852_v8  ;;  %v9801_v52 = vand.u32 4294901760, %v29135_v34 }
 0x4f4   : > { %26561 = vmatprep.subr.bf16.mxu0 %v30159_v63  ;;  %v9737_v63 = vand.u32 4294901760, %v8853_v56 }
 0x4f5   : > { %v9802_v60 = vsub.f32 %v29135_v34, %v9801_v52 }
 0x4f6   : > { %v29132_v23 = vsub.f32 %v8853_v56, %v9737_v63  ;;  %v29139_v42 = vpack.c.bf16 %v9737_v63, %v9734_v62 }
 0x4f7   : > { %26563 = vmatpush3.bf16.msra.mxu0 %v30162_v48  ;;  %v29130_v48 = vsub.f32 %v8852_v8, %v9734_v62  ;;  %v9803_v11 = vand.u32 4294901760, %v9802_v60 }
 0x4f8   : > { %26564 = vmatprep.subr.bf16.mxu0 %v27636_v36  ;;  %v9833_v41 = vand.u32 4294901760, %v29132_v23 }
 0x4f9   : > { %v9826_v31 = vand.u32 4294901760, %v29130_v48  ;;  %v26586_v28 = vpack.c.bf16 %v29132_v23, %v29130_v48 }
 0x4fa   : > { %9722 = vmatmul.mubr.f32.vlgmr.msra.gmra.mrb[56].mxu0 %v28979_v15  ;;  %v9813_v15 = vsub.f32 %v29106_v58, %v9812_v30  ;;  %v9834_v7 = vsub.f32 %v29132_v23, %v9833_v41 }
 0x4fb   : > { %26566 = vmatpush3.bf16.msra.mxu0 %v29119_v50  ;;  %25180 = vmatprep.mubr.msk.f32.mxu0 %vm27630_vm0, %v30209_v2  ;;  %v9827_v39 = vsub.f32 %v29130_v48, %v9826_v31  ;;  %v26604_v33 = vpack.c.bf16 %v9833_v41, %v9826_v31 }
 0x4fc   : > { %26567 = vmatprep.subr.bf16.mxu0 %v27636_v36  ;;  %v9814_v44 = vand.u32 4294901760, %v9813_v15  ;;  %v9835_v17 = vand.u32 4294901760, %v9834_v7 }
 0x4fd   : > { %v9828_v59 = vand.u32 4294901760, %v9827_v39 }
 0x4fe   : > { %v26574_v5 = vpack.c.bf16 %v9821_v51, %v9814_v44  ;;  %v10268_v44 = vsel %vm10263_vm14, %v23852_v49, 0 }
 0x4ff   : > { %26569 = vmatpush3.bf16.msra.mxu0 %v29139_v42  ;;  %v26577_v4 = vpack.c.bf16 %v9835_v17, %v9828_v59  ;;  %v10346_v51 = vand.u32 4294901760, %v10268_v44 }
 0x500   : > { %26570 = vmatprep.subr.bf16.mxu0 %v27636_v36 }
 0x501   : > { %v10347_v39 = vsub.f32 %v10268_v44, %v10346_v51 }
 0x503   : > { %26572 = vmatpush3.bf16.msra.mxu0 %v29161_v0  ;;  %v10348_v7 = vand.u32 4294901760, %v10347_v39 }
 0x504   : > { %25178 = vmatprep.subr.mxu0 %v30209_v2 }
 0x505   : > { %v10349_v46 = vsub.f32 %v10347_v39, %v10348_v7 }
 0x507   : > { %25179 = vmatpush3.msra.mxu0 %v29173_v10  ;;  %v10350_v60 = vand.u32 4294901760, %v10349_v46 }
 0x508   : > { %25181 = vmatmul.mubr.f32.vlgmr.msra.gmra.mrb[58].mxu0 %v9803_v11  ;;  %26573 = vmatprep.subr.bf16.mxu0 %v27636_v36  ;;  %v10831_v11 = vand.u32 4294901760, %v10760_v54 }
 0x509   : > { %26575 = vmatpush3.bf16.msra.mxu0 %v26574_v5  ;;  %25197 = vmatprep.mubr.msk.f32.mxu0 %vm27630_vm0, %v30209_v2 }
 0x50a   : > { %26576 = vmatprep.subr.bf16.mxu0 %v27636_v36  ;;  %v10832_v32 = vsub.f32 %v10760_v54, %v10831_v11 }
 0x50d   : > { %26578 = vmatpush3.bf16.msra.mxu0 %v26577_v4  ;;  %v10254_v4 = vld [vmem:[%s30021_s4 + $0x8] sm:$0xff] }
 0x50e   : > { %26579 = vmatprep.subr.bf16.mxu0 %v27636_v36 }
 0x511   : > { %26581 = vmatpush3.bf16.msra.mxu0 %v26580_v20 }
 0x512   : > { %25195 = vmatprep.subr.mxu0 %v30209_v2 }
 0x515   : > { %25196 = vmatpush3.msra.mxu0 %v9856_v61  ;;  %v10833_v61 = vand.u32 4294901760, %v10832_v32 }
 0x516   : > { %25198 = vmatmul.mubr.f32.vlgmr.msra.gmra.mrb[58].mxu0 %v29116_v12  ;;  %26582 = vmatprep.subr.bf16.mxu0 %v27636_v36 }
 0x517   : > { %26584 = vmatpush3.bf16.msra.mxu0 %v26583_v40  ;;  %25214 = vmatprep.mubr.msk.f32.mxu0 %vm27630_vm0, %v30209_v2 }
 0x518   : > { %26585 = vmatprep.subr.bf16.mxu0 %v27636_v36 }
 0x51b   : > { %26587 = vmatpush3.bf16.msra.mxu0 %v26586_v28 }
 0x51c   : > { %26588 = vmatprep.subr.bf16.mxu0 %v27636_v36 }
 0x51f   : > { %26590 = vmatpush3.bf16.msra.mxu0 %v26589_v1  ;;  %v10834_v1 = vsub.f32 %v10832_v32, %v10833_v61 }
 0x520   : > { %25212 = vmatprep.subr.mxu0 %v30209_v2 }
 0x523   : > { %25213 = vmatpush3.msra.mxu0 %v29181_v35 }
 0x524   : > { %25215 = vmatmul.mubr.f32.vlgmr.msra.gmra.mrb[58].mxu0 %v29135_v34  ;;  %26591 = vmatprep.subr.bf16.mxu0 %v27636_v36 }
 0x525   : > { %26593 = vmatpush3.bf16.msra.mxu0 %v29119_v50  ;;  %25231 = vmatprep.mubr.msk.f32.mxu0 %vm27630_vm0, %v30209_v2 }
 0x526   : > { %26594 = vmatprep.subr.bf16.mxu0 %v27636_v36 }
 0x529   : > { %26596 = vmatpush3.bf16.msra.mxu0 %v29139_v42 }
 0x52a   : > { %26597 = vmatprep.subr.bf16.mxu0 %v27636_v36 }
 0x52d   : > { %26599 = vmatpush3.bf16.msra.mxu0 %v29161_v0  ;;  %v24040_v45 = vpop.f32.mrb[46].mxu0 }
 0x52e   : > { %v24041_v47 = vpop.f32.mrb[47].mxu0  ;;  %25229 = vmatprep.subr.mxu0 %v30209_v2 }
 0x52f   : > { %v24042_v29 = vadd.f32 %v24041_v47, %v24040_v45 }
 0x531   : > { %25230 = vmatpush3.msra.mxu0 %v29173_v10 }
 0x532   : > { %25232 = vmatmul.mubr.f32.vlgmr.msra.gmra.mrb[58].mxu0 %v9801_v52  ;;  %26600 = vmatprep.subr.bf16.mxu0 %v27636_v36 }
 0x533   : > { %26602 = vmatpush3.bf16.msra.mxu0 %v26601_v16  ;;  %25248 = vmatprep.mubr.msk.f32.mxu0 %vm27630_vm0, %v30209_v2 }
 0x534   : > { %26603 = vmatprep.subr.bf16.mxu0 %v27636_v36 }
 0x537   : > { %26605 = vmatpush3.bf16.msra.mxu0 %v26604_v33 }
 0x538   : > { %26606 = vmatprep.subr.bf16.mxu0 %v27636_v36 }
 0x53b   : > { %26608 = vmatpush3.bf16.msra.mxu0 %v26607_v3 }
 0x53c   : > { %25246 = vmatprep.subr.mxu0 %v30209_v2 }
 0x53f   : > { %25247 = vmatpush3.msra.mxu0 %v9854_v9  ;;  %v10763_v9 = vsel %vm10263_vm14, %v10254_v4, 0 }
 0x540   : > { %25249 = vmatmul.mubr.f32.vlgmr.msra.gmra.mrb[58].mxu0 %v29116_v12  ;;  %26609 = vmatprep.subr.bf16.mxu0 %v27636_v36  ;;  %v10841_v19 = vand.u32 4294901760, %v10763_v9 }
 0x541   : > { %26611 = vmatpush3.bf16.msra.mxu0 %v29119_v50  ;;  %25265 = vmatprep.mubr.msk.f32.mxu0 %vm27630_vm0, %v30209_v2  ;;  %vm14791_vm0 = vcmask 818176  }
 0x542   : > { %26612 = vmatprep.subr.bf16.mxu0 %v27636_v36  ;;  %v10842_v28 = vsub.f32 %v10763_v9, %v10841_v19 }
 0x544   : > { %v10843_v47 = vand.u32 4294901760, %v10842_v28 }
 0x545   : > { %26614 = vmatpush3.bf16.msra.mxu0 %v29139_v42 }
 0x546   : > { %26615 = vmatprep.subr.bf16.mxu0 %v27636_v36  ;;  %v10844_v33 = vsub.f32 %v10842_v28, %v10843_v47 }
 0x548   : > { %v10845_v3 = vand.u32 4294901760, %v10844_v33 }
 0x549   : > { %26617 = vmatpush3.bf16.msra.mxu0 %v29161_v0  ;;  %v14775_v0 = vld [vmem:[%s30022_s5] sm:$0xff] }
 0x54a   : > { %25263 = vmatprep.subr.mxu0 %v30209_v2 }
 0x54d   : > { %v24075_v55 = vpop.f32.mrb[48].mxu0  ;;  %25264 = vmatpush3.msra.mxu0 %v29173_v10 }
 0x54e   : > { %v24076_v57 = vpop.f32.mrb[49].mxu0  ;;  %25266 = vmatmul.mubr.f32.vlgmr.msra.gmra.mrb[58].mxu0 %v29116_v12  ;;  %v23851_v12 = vld [vmem:[%s30021_s4 + $0x10] sm:$0xff] }
 0x54f   : > { %v24077_v13 = vadd.f32 %v24076_v57, %v24075_v55  ;;  %v10265_v24 = vsel %vm10263_vm14, %v23851_v12, 0  ;;  %v23853_v55 = vld [vmem:[%s30021_s4 + $0x20] sm:$0xff]  ;;  %v23855_v12 = vld [vmem:[%s30021_s4 + $0x30] sm:$0xff] }
 0x550   : > { %v29259_v2 = vand.u32 4294901760, %v10265_v24  ;;  %v11261_v57 = vsel %vm10263_vm14, %v23853_v55, 0  ;;  %v23860_v55 = vld [vmem:[%s30021_s4 + $0x58] sm:$0xff] }
 0x551   : > { %v9206_v58 = vadd.f32 %v24077_v13, %v24042_v29  ;;  %v10835_v29 = vand.u32 4294901760, %v10834_v1 }
 0x552   : > { %v10337_v43 = vsub.f32 %v10265_v24, %v29259_v2  ;;  %v11764_v24 = vsel %vm10263_vm14, %v23855_v12, 0  ;;  %v23862_v12 = vld [vmem:[%s30021_s4 + $0x68] sm:$0xff] }
 0x554   : > { %v10338_v15 = vand.u32 4294901760, %v10337_v43 }
 0x556   : > { %v10339_v26 = vsub.f32 %v10337_v43, %v10338_v15 }
 0x558   : > { %v10340_v22 = vand.u32 4294901760, %v10339_v26 }
 0x55a   : > { %25270 = vmatprep.mubr.f32.mxu1 %v10340_v22 }
 0x56d   : > { %v24110_v38 = vpop.f32.mrb[50].mxu0 }
 0x56e   : > { %v24111_v8 = vpop.f32.mrb[51].mxu0 }
 0x56f   : > { %v24112_v56 = vadd.f32 %v24111_v8, %v24110_v38  ;;  %v23854_v38 = vld [vmem:[%s30021_s4 + $0x28] sm:$0xff] }
 0x571   : > { %v9344_v50 = vadd.f32 %v24112_v56, %v9206_v58  ;;  %v11332_v58 = vand.u32 4294901760, %v11261_v57 }
 0x573   : > { %v11333_v56 = vsub.f32 %v11261_v57, %v11332_v58 }
 0x58d   : > { %v24145_v62 = vpop.f32.mrb[52].mxu0 }
 0x58e   : > { %v24146_v63 = vpop.f32.mrb[53].mxu0 }
 0x58f   : > { %v24147_v53 = vadd.f32 %v24146_v63, %v24145_v62 }
 0x591   : > { %v9452_v36 = vadd.f32 %v24147_v53, %v9344_v50  ;;  %v11264_v50 = vsel %vm10263_vm14, %v23854_v38, 0  ;;  %v11334_v53 = vand.u32 4294901760, %v11333_v56 }
 0x592   : > { %v11342_v63 = vand.u32 4294901760, %v11264_v50 }
 0x5ad   : > { %v24180_v25 = vpop.f32.mrb[54].mxu0 }
 0x5ae   : > { %v24181_v30 = vpop.f32.mrb[55].mxu0 }
 0x5af   : > { %v24182_v37 = vadd.f32 %v24181_v30, %v24180_v25  ;;  %v11343_v25 = vsub.f32 %v11264_v50, %v11342_v63  ;;  %v11335_v30 = vsub.f32 %v11333_v56, %v11334_v53 }
 0x5b1   : > { %v9620_v48 = vadd.f32 %v24182_v37, %v9452_v36 }
 0x5cd   : > { %v24215_v23 = vpop.f32.mrb[56].mxu0 }
 0x5ce   : > { %v24216_v34 = vpop.f32.mrb[57].mxu0 }
 0x5cf   : > { %v24217_v42 = vadd.f32 %v24216_v34, %v24215_v23  ;;  %v11336_v23 = vand.u32 4294901760, %v11335_v30 }
 0x5d1   : > { %v9724_v21 = vadd.f32 %v24217_v42, %v9620_v48  ;;  %v11344_v48 = vand.u32 4294901760, %v11343_v25 }
 0x5d3   : > { %v11345_v42 = vsub.f32 %v11343_v25, %v11344_v48 }
 0x621   : > { %v10247_v18 = vpop.f32.mrb[58].mxu0 }
 0x622   : > { %v27146_v31 = vadd.f32 %v10247_v18, %v9724_v21  ;;  %v25267_v41 = vpop.f32.mrb[59].mxu0  ;;  %v11346_v21 = vand.u32 4294901760, %v11345_v42 }
 0x624   : > { %10252 = vst.msk [vmem:[#allocation3] sm:$0xff] %vm10251_vm15, %v27146_v31 }
 0x62b   : > { %v10255_v52 = vld [vmem:[#allocation3] sm:$0xff] }
 0x62c   : > { %11257 = vrot.lane.b32.xlu1 %v10255_v52, %s27627_s16  ;;  %10260 = vrot.lane.b32.xlu0 %v10255_v52, %s27626_s15  ;;  %v10766_v6 = vand.u32 4294901760, %v10255_v52 }
 0x62e   : > { %v10853_v20 = vsub.f32 %v10255_v52, %v10766_v6 }
 0x630   : > { %12263 = vrot.lane.b32.xlu1 %v10255_v52, %s27637_s17  ;;  %11760 = vrot.lane.b32.xlu0 %v10255_v52, %s27638_s13  ;;  %v10854_v40 = vand.u32 4294901760, %v10853_v20 }
 0x632   : > { %v10855_v45 = vsub.f32 %v10853_v20, %v10854_v40 }
 0x634   : > { %13269 = vrot.lane.b32.xlu1 %v10255_v52, %s27631_s19  ;;  %12766 = vrot.lane.b32.xlu0 %v10255_v52, %s27639_s18  ;;  %v10856_v16 = vand.u32 4294901760, %v10855_v45  ;;  %s23899_s19 = sshll.u32 %s30211_s10, 4 }
 0x638   : > { %14275 = vrot.lane.b32.xlu1 %v10255_v52, %s27640_s20  ;;  %13772 = vrot.lane.b32.xlu0 %v10255_v52, %s27641_s21  ;;  %s27646_s20 = smov 121  }
 0x63c   : > { %14779 = vperm.xlu0 %27607, %v14775_v0  }
 0x69e   : > { %v10261_v27 = vpop.permute.xlu0 %10260  ;;  %v11258_v13 = vpop.permute.xlu1 %11257 }
 0x69f   : > { %v10271_v10 = vand.u32 4294901760, %v10261_v27  ;;  %v11267_v8 = vand.u32 4294901760, %v11258_v13 }
 0x6a1   : > { %v10358_v35 = vsub.f32 %v10261_v27, %v10271_v10  ;;  %25268 = vmatprep.subr.mxu1 %v10271_v10  ;;  %v11354_v62 = vsub.f32 %v11258_v13, %v11267_v8 }
 0x6a2   : > { %25269 = vmatpush3.msra.mxu1 %v10271_v10 }
 0x6a3   : > { %25271 = vmatmul.mubr.f32.vlgmr.msra.gmra.mrb[64].mxu1 %v10350_v60  ;;  %v10359_v5 = vand.u32 4294901760, %v10358_v35  ;;  %v11355_v36 = vand.u32 4294901760, %v11354_v62  ;;  %v23857_v60 = vld [vmem:[%s30021_s4 + $0x40] sm:$0xff] }
 0x6a4   : > { %25275 = vmatprep.mubr.f32.mxu1 %v29259_v2 }
 0x6a5   : > { %v10360_v59 = vsub.f32 %v10358_v35, %v10359_v5  ;;  %v11356_v37 = vsub.f32 %v11354_v62, %v11355_v36 }
 0x6a7   : > { %v10361_v17 = vand.u32 4294901760, %v10360_v59  ;;  %v11357_v34 = vand.u32 4294901760, %v11356_v37 }
 0x6a9   : > { %25273 = vmatprep.subr.mxu1 %v10361_v17 }
 0x6aa   : > { %25274 = vmatpush3.msra.mxu1 %v10361_v17  ;;  %v23858_v17 = vld [vmem:[%s30021_s4 + $0x48] sm:$0xff] }
 0x6ab   : > { %25276 = vmatmul.mubr.f32.vlgmr.msra.gmra.mrb[64].mxu1 %v10346_v51  ;;  %25278 = vmatprep.subr.mxu1 %v10358_v35 }
 0x6ac   : > { %25279 = vmatpush3.msra.mxu1 %v10358_v35  ;;  %25280 = vmatprep.mubr.f32.mxu1 %v10337_v43  ;;  %v11835_v43 = vand.u32 4294901760, %v11764_v24  ;;  %v12267_v35 = vsel %vm10263_vm14, %v23857_v60, 0 }
 0x6ad   : > { %25283 = vmatprep.subr.mxu1 %v10271_v10  ;;  %v12338_v59 = vand.u32 4294901760, %v12267_v35 }
 0x6ae   : > { %v11836_v22 = vsub.f32 %v11764_v24, %v11835_v43 }
 0x6af   : > { %v12339_v54 = vsub.f32 %v12267_v35, %v12338_v59  ;;  %v23864_v35 = vld [vmem:[%s30021_s4 + $0x78] sm:$0xff] }
 0x6b0   : > { %v11837_v52 = vand.u32 4294901760, %v11836_v22 }
 0x6b2   : > { %v11838_v44 = vsub.f32 %v11836_v22, %v11837_v52 }
 0x6b3   : > { %25281 = vmatmul.mubr.f32.vlgmr.msra.gmra.mrb[64].mxu1 %v10347_v39 }
 0x6b4   : > { %25284 = vmatpush3.msra.mxu1 %v10271_v10  ;;  %25285 = vmatprep.mubr.f32.mxu1 %v10338_v15  ;;  %v23856_v15 = vld [vmem:[%s30021_s4 + $0x38] sm:$0xff] }
 0x6b5   : > { %25288 = vmatprep.subr.mxu1 %v10359_v5  ;;  %v11767_v18 = vsel %vm10263_vm14, %v23856_v15, 0 }
 0x6b6   : > { %v11845_v41 = vand.u32 4294901760, %v11767_v18 }
 0x6b8   : > { %v11846_v49 = vsub.f32 %v11767_v18, %v11845_v41 }
 0x6ba   : > { %v11847_v39 = vand.u32 4294901760, %v11846_v49 }
 0x6bb   : > { %25286 = vmatmul.mubr.f32.vlgmr.msra.gmra.mrb[64].mxu1 %v10348_v7  ;;  %v11839_v7 = vand.u32 4294901760, %v11838_v44 }
 0x6bc   : > { %25289 = vmatpush3.msra.mxu1 %v10359_v5  ;;  %25290 = vmatprep.mubr.f32.mxu1 %v29259_v2  ;;  %v11848_v27 = vsub.f32 %v11846_v49, %v11847_v39  ;;  %v12264_v5 = vpop.permute.xlu1 %12263 }
 0x6bd   : > { %25293 = vmatprep.subr.mxu1 %v10271_v10  ;;  %v12273_v14 = vand.u32 4294901760, %v12264_v5 }
 0x6bf   : > { %v12360_v4 = vsub.f32 %v12264_v5, %v12273_v14 }
 0x6c0   : > { %v13270_v42 = vpop.permute.xlu1 %13269 }
 0x6c1   : > { %v12361_v9 = vand.u32 4294901760, %v12360_v4  ;;  %v13279_v24 = vand.u32 4294901760, %v13270_v42 }
 0x6c3   : > { %25291 = vmatmul.mubr.f32.vlgmr.msra.gmra.mrb[64].mxu1 %v10346_v51  ;;  %v13366_v15 = vsub.f32 %v13270_v42, %v13279_v24 }
 0x6c4   : > { %25294 = vmatpush3.msra.mxu1 %v10271_v10  ;;  %25295 = vmatprep.mubr.f32.mxu1 %v29259_v2  ;;  %v11761_v2 = vpop.permute.xlu0 %11760  ;;  %v11849_v10 = vand.u32 4294901760, %v11848_v27 }
 0x6c5   : > { %25298 = vmatprep.subr.mxu1 %v10766_v6  ;;  %v11770_v26 = vand.u32 4294901760, %v11761_v2  ;;  %v13367_v18 = vand.u32 4294901760, %v13366_v15 }
 0x6c7   : > { %v11857_v31 = vsub.f32 %v11761_v2, %v11770_v26 }
 0x6c8   : > { %v12767_v33 = vpop.permute.xlu0 %12766 }
 0x6c9   : > { %v11858_v0 = vand.u32 4294901760, %v11857_v31  ;;  %v12776_v57 = vand.u32 4294901760, %v12767_v33 }
 0x6cb   : > { %25296 = vmatmul.mubr.f32.vlgmr.msra.gmra.mrb[64].mxu1 %v10346_v51  ;;  %v11859_v51 = vsub.f32 %v11857_v31, %v11858_v0  ;;  %v12863_v38 = vsub.f32 %v12767_v33, %v12776_v57 }
 0x6cc   : > { %25299 = vmatpush3.msra.mxu1 %v10766_v6  ;;  %25300 = vmatprep.mubr.f32.mxu1 %v10835_v29  ;;  %v23859_v29 = vld [vmem:[%s30021_s4 + $0x50] sm:$0xff] }
 0x6cd   : > { %25303 = vmatprep.subr.mxu1 %v10856_v16  ;;  %v11860_v46 = vand.u32 4294901760, %v11859_v51  ;;  %v12864_v50 = vand.u32 4294901760, %v12863_v38 }
 0x6d3   : > { %25301 = vmatmul.mubr.f32.vlgmr.msra.gmra.mrb[64].mxu1 %v10845_v3 }
 0x6d4   : > { %25304 = vmatpush3.msra.mxu1 %v10856_v16  ;;  %25305 = vmatprep.mubr.f32.mxu1 %v10831_v11  ;;  %v12770_v16 = vsel %vm10263_vm14, %v23859_v29, 0 }
 0x6d5   : > { %25308 = vmatprep.subr.mxu1 %v10853_v20  ;;  %v12841_v3 = vand.u32 4294901760, %v12770_v16 }
 0x6d7   : > { %v12842_v13 = vsub.f32 %v12770_v16, %v12841_v3  ;;  %v23866_v16 = vld [vmem:[%s30021_s4 + $0x88] sm:$0xff] }
 0x6db   : > { %25306 = vmatmul.mubr.f32.vlgmr.msra.gmra.mrb[64].mxu1 %v10841_v19 }
 0x6dc   : > { %25309 = vmatpush3.msra.mxu1 %v10853_v20  ;;  %25310 = vmatprep.mubr.f32.mxu1 %v10832_v32  ;;  %v12340_v32 = vand.u32 4294901760, %v12339_v54 }
 0x6dd   : > { %25313 = vmatprep.subr.mxu1 %v10766_v6 }
 0x6e3   : > { %25311 = vmatmul.mubr.f32.vlgmr.msra.gmra.mrb[64].mxu1 %v10842_v28 }
 0x6e4   : > { %25314 = vmatpush3.msra.mxu1 %v10766_v6  ;;  %25315 = vmatprep.mubr.f32.mxu1 %v10833_v61  ;;  %v12362_v61 = vsub.f32 %v12360_v4, %v12361_v9 }
 0x6e5   : > { %25318 = vmatprep.subr.mxu1 %v10854_v40 }
 0x6e6   : > { %v12363_v1 = vand.u32 4294901760, %v12362_v61 }
 0x6eb   : > { %25316 = vmatmul.mubr.f32.vlgmr.msra.gmra.mrb[64].mxu1 %v10843_v47 }
 0x6ec   : > { %25319 = vmatpush3.msra.mxu1 %v10854_v40  ;;  %25320 = vmatprep.mubr.f32.mxu1 %v10831_v11 }
 0x6ed   : > { %25323 = vmatprep.subr.mxu1 %v10766_v6 }
 0x6f3   : > { %25321 = vmatmul.mubr.f32.vlgmr.msra.gmra.mrb[64].mxu1 %v10841_v19 }
 0x6f4   : > { %25324 = vmatpush3.msra.mxu1 %v10766_v6  ;;  %25325 = vmatprep.mubr.f32.mxu1 %v10831_v11  ;;  %v12270_v11 = vsel %vm10263_vm14, %v23858_v17, 0  ;;  %v13779_v17 = vsel %vm10263_vm14, %v23864_v35, 0  ;;  %v14822_v35 = vld [vmem:[%s30023_s6 + $0x30] sm:$0xff] }
 0x6f5   : > { %25328 = vmatprep.subr.mxu1 %v11267_v8  ;;  %v12348_v6 = vand.u32 4294901760, %v12270_v11 }
 0x6f7   : > { %v12349_v20 = vsub.f32 %v12270_v11, %v12348_v6 }
 0x6f9   : > { %v12350_v40 = vand.u32 4294901760, %v12349_v20 }
 0x6fb   : > { %25326 = vmatmul.mubr.f32.vlgmr.msra.gmra.mrb[64].mxu1 %v10841_v19  ;;  %v12341_v19 = vsub.f32 %v12339_v54, %v12340_v32  ;;  %v12351_v45 = vsub.f32 %v12349_v20, %v12350_v40 }
 0x6fc   : > { %25329 = vmatpush3.msra.mxu1 %v11267_v8  ;;  %25330 = vmatprep.mubr.f32.mxu1 %v11336_v23  ;;  %v23861_v23 = vld [vmem:[%s30021_s4 + $0x60] sm:$0xff] }
 0x6fd   : > { %25333 = vmatprep.subr.mxu1 %v11357_v34  ;;  %v12342_v28 = vand.u32 4294901760, %v12341_v19  ;;  %v12352_v47 = vand.u32 4294901760, %v12351_v45 }
 0x703   : > { %25331 = vmatmul.mubr.f32.vlgmr.msra.gmra.mrb[64].mxu1 %v11346_v21 }
 0x704   : > { %25334 = vmatpush3.msra.mxu1 %v11357_v34  ;;  %25335 = vmatprep.mubr.f32.mxu1 %v11332_v58  ;;  %v13273_v34 = vsel %vm10263_vm14, %v23861_v23, 0 }
 0x705   : > { %25338 = vmatprep.subr.mxu1 %v11354_v62  ;;  %v13344_v21 = vand.u32 4294901760, %v13273_v34 }
 0x707   : > { %v13345_v2 = vsub.f32 %v13273_v34, %v13344_v21 }
 0x70b   : > { %25336 = vmatmul.mubr.f32.vlgmr.msra.gmra.mrb[64].mxu1 %v11342_v63 }
 0x70c   : > { %25339 = vmatpush3.msra.mxu1 %v11354_v62  ;;  %25340 = vmatprep.mubr.f32.mxu1 %v11333_v56  ;;  %v12843_v56 = vand.u32 4294901760, %v12842_v13 }
 0x70d   : > { %25343 = vmatprep.subr.mxu1 %v11267_v8 }
 0x713   : > { %25341 = vmatmul.mubr.f32.vlgmr.msra.gmra.mrb[64].mxu1 %v11343_v25 }
 0x714   : > { %25344 = vmatpush3.msra.mxu1 %v11267_v8  ;;  %25345 = vmatprep.mubr.f32.mxu1 %v11334_v53  ;;  %v12865_v53 = vsub.f32 %v12863_v38, %v12864_v50 }
 0x715   : > { %25348 = vmatprep.subr.mxu1 %v11355_v36 }
 0x716   : > { %v12866_v30 = vand.u32 4294901760, %v12865_v53 }
 0x71b   : > { %25346 = vmatmul.mubr.f32.vlgmr.msra.gmra.mrb[64].mxu1 %v11344_v48 }
 0x71c   : > { %25349 = vmatpush3.msra.mxu1 %v11355_v36  ;;  %25350 = vmatprep.mubr.f32.mxu1 %v11332_v58 }
 0x71d   : > { %25353 = vmatprep.subr.mxu1 %v11267_v8 }
 0x723   : > { %25351 = vmatmul.mubr.f32.vlgmr.msra.gmra.mrb[64].mxu1 %v11342_v63 }
 0x724   : > { %25354 = vmatpush3.msra.mxu1 %v11267_v8  ;;  %25355 = vmatprep.mubr.f32.mxu1 %v11332_v58  ;;  %v12773_v58 = vsel %vm10263_vm14, %v23860_v55, 0  ;;  %v14282_v55 = vsel %vm10263_vm14, %v23866_v16, 0 }
 0x725   : > { %25358 = vmatprep.subr.mxu1 %v11770_v26  ;;  %v12851_v8 = vand.u32 4294901760, %v12773_v58 }
 0x727   : > { %v12852_v62 = vsub.f32 %v12773_v58, %v12851_v8 }
 0x729   : > { %v12853_v36 = vand.u32 4294901760, %v12852_v62 }
 0x72b   : > { %25356 = vmatmul.mubr.f32.vlgmr.msra.gmra.mrb[64].mxu1 %v11342_v63  ;;  %v12844_v63 = vsub.f32 %v12842_v13, %v12843_v56  ;;  %v12854_v37 = vsub.f32 %v12852_v62, %v12853_v36 }
 0x72c   : > { %25359 = vmatpush3.msra.mxu1 %v11770_v26  ;;  %25360 = vmatprep.mubr.f32.mxu1 %v11839_v7  ;;  %v14776_v7 = vld [vmem:[%s30022_s5 + $0x8] sm:$0xff] }
 0x72d   : > { %25363 = vmatprep.subr.mxu1 %v11860_v46  ;;  %v12845_v25 = vand.u32 4294901760, %v12844_v63  ;;  %v12855_v48 = vand.u32 4294901760, %v12854_v37  ;;  %14784 = vperm.xlu1 %27608, %v14776_v7  }
 0x733   : > { %25361 = vmatmul.mubr.f32.vlgmr.msra.gmra.mrb[64].mxu1 %v11849_v10  ;;  %v13773_v10 = vpop.permute.xlu0 %13772 }
 0x734   : > { %25364 = vmatpush3.msra.mxu1 %v11860_v46  ;;  %25365 = vmatprep.mubr.f32.mxu1 %v11835_v43  ;;  %v23863_v46 = vld [vmem:[%s30021_s4 + $0x70] sm:$0xff]  ;;  %v13782_v5 = vand.u32 4294901760, %v13773_v10 }
 0x735   : > { %25368 = vmatprep.subr.mxu1 %v11857_v31  ;;  %v13776_v27 = vsel %vm10263_vm14, %v23863_v46, 0 }
 0x736   : > { %v13847_v60 = vand.u32 4294901760, %v13776_v27 }
 0x73b   : > { %25366 = vmatmul.mubr.f32.vlgmr.msra.gmra.mrb[64].mxu1 %v11845_v41 }
 0x73c   : > { %25369 = vmatpush3.msra.mxu1 %v11857_v31  ;;  %25370 = vmatprep.mubr.f32.mxu1 %v11836_v22  ;;  %v13346_v22 = vand.u32 4294901760, %v13345_v2 }
 0x73d   : > { %25373 = vmatprep.subr.mxu1 %v11770_v26 }
 0x743   : > { %25371 = vmatmul.mubr.f32.vlgmr.msra.gmra.mrb[64].mxu1 %v11846_v49 }
 0x744   : > { %25374 = vmatpush3.msra.mxu1 %v11770_v26  ;;  %25375 = vmatprep.mubr.f32.mxu1 %v11837_v52  ;;  %v13368_v52 = vsub.f32 %v13366_v15, %v13367_v18 }
 0x745   : > { %25378 = vmatprep.subr.mxu1 %v11858_v0 }
 0x746   : > { %v13369_v44 = vand.u32 4294901760, %v13368_v52  ;;  %v29371_v52 = vld [vmem:[%s30023_s6 + $0x28] sm:$0xff] }
 0x74b   : > { %25376 = vmatmul.mubr.f32.vlgmr.msra.gmra.mrb[64].mxu1 %v11847_v39 }
 0x74c   : > { %25379 = vmatpush3.msra.mxu1 %v11858_v0  ;;  %25380 = vmatprep.mubr.f32.mxu1 %v11835_v43 }
 0x74d   : > { %25383 = vmatprep.subr.mxu1 %v11770_v26 }
 0x753   : > { %25381 = vmatmul.mubr.f32.vlgmr.msra.gmra.mrb[64].mxu1 %v11845_v41 }
 0x754   : > { %25384 = vmatpush3.msra.mxu1 %v11770_v26  ;;  %25385 = vmatprep.mubr.f32.mxu1 %v11835_v43  ;;  %v13276_v43 = vsel %vm10263_vm14, %v23862_v12, 0  ;;  %v14816_v12 = vld [vmem:[%s30023_s6] sm:$0xff] }
 0x755   : > { %25388 = vmatprep.subr.mxu1 %v12273_v14  ;;  %v13354_v26 = vand.u32 4294901760, %v13276_v43 }
 0x757   : > { %v13355_v31 = vsub.f32 %v13276_v43, %v13354_v26 }
 0x759   : > { %v13356_v0 = vand.u32 4294901760, %v13355_v31 }
 0x75b   : > { %25386 = vmatmul.mubr.f32.vlgmr.msra.gmra.mrb[64].mxu1 %v11845_v41  ;;  %v13347_v41 = vsub.f32 %v13345_v2, %v13346_v22  ;;  %v13357_v51 = vsub.f32 %v13355_v31, %v13356_v0 }
 0x75c   : > { %25389 = vmatpush3.msra.mxu1 %v12273_v14  ;;  %25390 = vmatprep.mubr.f32.mxu1 %v12342_v28 }
 0x75d   : > { %25393 = vmatprep.subr.mxu1 %v12363_v1  ;;  %v13348_v49 = vand.u32 4294901760, %v13347_v41  ;;  %v13358_v39 = vand.u32 4294901760, %v13357_v51 }
 0x763   : > { %25391 = vmatmul.mubr.f32.vlgmr.msra.gmra.mrb[64].mxu1 %v12352_v47  ;;  %v14276_v47 = vpop.permute.xlu1 %14275 }
 0x764   : > { %25394 = vmatpush3.msra.mxu1 %v12363_v1  ;;  %25395 = vmatprep.mubr.f32.mxu1 %v12338_v59  ;;  %v23865_v1 = vld [vmem:[%s30021_s4 + $0x80] sm:$0xff]  ;;  %v14285_v33 = vand.u32 4294901760, %v14276_v47 }
 0x765   : > { %25398 = vmatprep.subr.mxu1 %v12360_v4  ;;  %v14279_v45 = vsel %vm10263_vm14, %v23865_v1, 0 }
 0x766   : > { %v14350_v29 = vand.u32 4294901760, %v14279_v45 }
 0x76b   : > { %25396 = vmatmul.mubr.f32.vlgmr.msra.gmra.mrb[64].mxu1 %v12348_v6 }
 0x76c   : > { %25399 = vmatpush3.msra.mxu1 %v12360_v4  ;;  %25400 = vmatprep.mubr.f32.mxu1 %v12339_v54  ;;  %v13857_v54 = vand.u32 4294901760, %v13779_v17 }
 0x76d   : > { %25403 = vmatprep.subr.mxu1 %v12273_v14 }
 0x773   : > { %25401 = vmatmul.mubr.f32.vlgmr.msra.gmra.mrb[64].mxu1 %v12349_v20 }
 0x774   : > { %25404 = vmatpush3.msra.mxu1 %v12273_v14  ;;  %25405 = vmatprep.mubr.f32.mxu1 %v12340_v32 }
 0x775   : > { %25408 = vmatprep.subr.mxu1 %v12361_v9 }
 0x77b   : > { %25406 = vmatmul.mubr.f32.vlgmr.msra.gmra.mrb[64].mxu1 %v12350_v40 }
 0x77c   : > { %25409 = vmatpush3.msra.mxu1 %v12361_v9  ;;  %25410 = vmatprep.mubr.f32.mxu1 %v12338_v59 }
 0x77d   : > { %25413 = vmatprep.subr.mxu1 %v12273_v14 }
 0x783   : > { %25411 = vmatmul.mubr.f32.vlgmr.msra.gmra.mrb[64].mxu1 %v12348_v6 }
 0x784   : > { %25414 = vmatpush3.msra.mxu1 %v12273_v14  ;;  %25415 = vmatprep.mubr.f32.mxu1 %v12338_v59  ;;  %v13848_v59 = vsub.f32 %v13776_v27, %v13847_v60  ;;  %v13869_v14 = vsub.f32 %v13773_v10, %v13782_v5  ;;  %v14827_v27 = vld [vmem:[%s30023_s6 + $0x58] sm:$0x1]  ;;  %v29403_v10 = vld [vmem:[%s30023_s6 + $0x50] sm:$0xff] }
 0x785   : > { %25418 = vmatprep.subr.mxu1 %v12776_v57 }
 0x786   : > { %v13849_v11 = vand.u32 4294901760, %v13848_v59  ;;  %v13870_v4 = vand.u32 4294901760, %v13869_v14 }
 0x788   : > { %v13850_v32 = vsub.f32 %v13848_v59, %v13849_v11  ;;  %v13871_v9 = vsub.f32 %v13869_v14, %v13870_v4 }
 0x78a   : > { %v13851_v19 = vand.u32 4294901760, %v13850_v32  ;;  %v13872_v61 = vand.u32 4294901760, %v13871_v9 }
 0x78b   : > { %25416 = vmatmul.mubr.f32.vlgmr.msra.gmra.mrb[64].mxu1 %v12348_v6  ;;  %v13858_v6 = vsub.f32 %v13779_v17, %v13857_v54 }
 0x78c   : > { %25419 = vmatpush3.msra.mxu1 %v12776_v57  ;;  %25420 = vmatprep.mubr.f32.mxu1 %v12845_v25 }
 0x78d   : > { %25423 = vmatprep.subr.mxu1 %v12866_v30  ;;  %v13859_v20 = vand.u32 4294901760, %v13858_v6 }
 0x78f   : > { %v13860_v40 = vsub.f32 %v13858_v6, %v13859_v20 }
 0x791   : > { %v13861_v28 = vand.u32 4294901760, %v13860_v40 }
 0x793   : > { %25421 = vmatmul.mubr.f32.vlgmr.msra.gmra.mrb[64].mxu1 %v12855_v48  ;;  %v14780_v48 = vpop.permute.xlu0 %14779 }
 0x794   : > { %25424 = vmatpush3.msra.mxu1 %v12866_v30  ;;  %25425 = vmatprep.mubr.f32.mxu1 %v12841_v3 }
 0x795   : > { %25428 = vmatprep.subr.mxu1 %v12863_v38 }
 0x79b   : > { %25426 = vmatmul.mubr.f32.vlgmr.msra.gmra.mrb[64].mxu1 %v12851_v8 }
 0x79c   : > { %25429 = vmatpush3.msra.mxu1 %v12863_v38  ;;  %25430 = vmatprep.mubr.f32.mxu1 %v12842_v13  ;;  %v14360_v13 = vand.u32 4294901760, %v14282_v55 }
 0x79d   : > { %25433 = vmatprep.subr.mxu1 %v12776_v57 }
 0x7a3   : > { %25431 = vmatmul.mubr.f32.vlgmr.msra.gmra.mrb[64].mxu1 %v12852_v62 }
 0x7a4   : > { %25434 = vmatpush3.msra.mxu1 %v12776_v57  ;;  %25435 = vmatprep.mubr.f32.mxu1 %v12843_v56 }
 0x7a5   : > { %25438 = vmatprep.subr.mxu1 %v12864_v50 }
 0x7ab   : > { %25436 = vmatmul.mubr.f32.vlgmr.msra.gmra.mrb[64].mxu1 %v12853_v36 }
 0x7ac   : > { %25439 = vmatpush3.msra.mxu1 %v12864_v50  ;;  %25440 = vmatprep.mubr.f32.mxu1 %v12841_v3  ;;  %v14785_v30 = vpop.permute.xlu1 %14784 }
 0x7ad   : > { %25443 = vmatprep.subr.mxu1 %v12776_v57 }
 0x7b3   : > { %25441 = vmatmul.mubr.f32.vlgmr.msra.gmra.mrb[64].mxu1 %v12851_v8 }
 0x7b4   : > { %25444 = vmatpush3.msra.mxu1 %v12776_v57  ;;  %25445 = vmatprep.mubr.f32.mxu1 %v12841_v3  ;;  %v14351_v3 = vsub.f32 %v14279_v45, %v14350_v29  ;;  %v14372_v57 = vsub.f32 %v14276_v47, %v14285_v33 }
 0x7b5   : > { %25448 = vmatprep.subr.mxu1 %v13279_v24 }
 0x7b6   : > { %v14352_v58 = vand.u32 4294901760, %v14351_v3  ;;  %v14373_v38 = vand.u32 4294901760, %v14372_v57 }
 0x7b8   : > { %v14353_v56 = vsub.f32 %v14351_v3, %v14352_v58  ;;  %v14374_v50 = vsub.f32 %v14372_v57, %v14373_v38 }
 0x7ba   : > { %v14354_v63 = vand.u32 4294901760, %v14353_v56  ;;  %v14375_v53 = vand.u32 4294901760, %v14374_v50 }
 0x7bb   : > { %25446 = vmatmul.mubr.f32.vlgmr.msra.gmra.mrb[64].mxu1 %v12851_v8  ;;  %v14361_v8 = vsub.f32 %v14282_v55, %v14360_v13 }
 0x7bc   : > { %25449 = vmatpush3.msra.mxu1 %v13279_v24  ;;  %25450 = vmatprep.mubr.f32.mxu1 %v13348_v49 }
 0x7bd   : > { %25453 = vmatprep.subr.mxu1 %v13369_v44  ;;  %v14362_v62 = vand.u32 4294901760, %v14361_v8 }
 0x7bf   : > { %v14363_v36 = vsub.f32 %v14361_v8, %v14362_v62 }
 0x7c1   : > { %v14364_v25 = vand.u32 4294901760, %v14363_v36 }
 0x7c3   : > { %25451 = vmatmul.mubr.f32.vlgmr.msra.gmra.mrb[64].mxu1 %v13358_v39 }
 0x7c4   : > { %25454 = vmatpush3.msra.mxu1 %v13369_v44  ;;  %25455 = vmatprep.mubr.f32.mxu1 %v13344_v21  ;;  %v14854_v44 = vand.u32 4294901760, %v29371_v52 }
 0x7c5   : > { %25458 = vmatprep.subr.mxu1 %v13366_v15 }
 0x7cb   : > { %25456 = vmatmul.mubr.f32.vlgmr.msra.gmra.mrb[64].mxu1 %v13354_v26 }
 0x7cc   : > { %25459 = vmatpush3.msra.mxu1 %v13366_v15  ;;  %25460 = vmatprep.mubr.f32.mxu1 %v13345_v2  ;;  %v29354_v2 = vld [vmem:[%s30023_s6 + $0x10] sm:$0xff]  ;;  %v14839_v15 = vand.u32 4294901760, %v14816_v12 }
 0x7cd   : > { %25463 = vmatprep.subr.mxu1 %v13279_v24 }
 0x7d3   : > { %25461 = vmatmul.mubr.f32.vlgmr.msra.gmra.mrb[64].mxu1 %v13355_v31  ;;  %v29365_v31 = vld [vmem:[%s30023_s6 + $0x20] sm:$0xff] }
 0x7d4   : > { %25464 = vmatpush3.msra.mxu1 %v13279_v24  ;;  %25465 = vmatprep.mubr.f32.mxu1 %v13346_v22  ;;  %v29359_v22 = vld [vmem:[%s30023_s6 + $0x18] sm:$0xff]  ;;  %v14851_v49 = vand.u32 4294901760, %v29365_v31 }
 0x7d5   : > { %25468 = vmatprep.subr.mxu1 %v13367_v18  ;;  %v14848_v41 = vand.u32 4294901760, %v29359_v22 }
 0x7d6   : > { %v29390_v39 = vpack.c.bf16 %v14854_v44, %v14851_v49 }
 0x7db   : > { %25466 = vmatmul.mubr.f32.vlgmr.msra.gmra.mrb[64].mxu1 %v13356_v0 }
 0x7dc   : > { %25469 = vmatpush3.msra.mxu1 %v13367_v18  ;;  %25470 = vmatprep.mubr.f32.mxu1 %v13344_v21  ;;  %v14845_v18 = vand.u32 4294901760, %v29354_v2 }
 0x7dd   : > { %25473 = vmatprep.subr.mxu1 %v13279_v24 }
 0x7de   : > { %v29381_v51 = vpack.c.bf16 %v14848_v41, %v14845_v18 }
 0x7e3   : > { %25471 = vmatmul.mubr.f32.vlgmr.msra.gmra.mrb[64].mxu1 %v13354_v26 }
 0x7e4   : > { %25474 = vmatpush3.msra.mxu1 %v13279_v24  ;;  %25475 = vmatprep.mubr.f32.mxu1 %v13344_v21  ;;  %v14817_v24 = vld [vmem:[%s30023_s6 + $0x8] sm:$0xff] }
 0x7e5   : > { %25478 = vmatprep.subr.mxu1 %v13782_v5 }
 0x7eb   : > { %25476 = vmatmul.mubr.f32.vlgmr.msra.gmra.mrb[64].mxu1 %v13354_v26  ;;  %v14842_v26 = vand.u32 4294901760, %v14817_v24 }
 0x7ec   : > { %25479 = vmatpush3.msra.mxu1 %v13782_v5  ;;  %25480 = vmatprep.mubr.f32.mxu1 %v13851_v19 }
 0x7ed   : > { %25483 = vmatprep.subr.mxu1 %v13872_v61  ;;  %v29373_v0 = vpack.c.bf16 %v14842_v26, %v14839_v15  ;;  %v29436_v40 = vsub.f32 %v14817_v24, %v14842_v26  ;;  %v29491_v26 = vsub.f32 %v29354_v2, %v14845_v18  ;;  %v29508_v18 = vsub.f32 %v29371_v52, %v14854_v44 }
 0x7ef   : > { %26619 = vmatprep.subr.bf16.mxu0 %v29373_v0  ;;  %v14945_v1 = vand.u32 4294901760, %v29436_v40  ;;  %v14973_v52 = vand.u32 4294901760, %v29508_v18 }
 0x7f0   : > { %26621 = vmatpush3.bf16.msra.mxu0 %v29373_v0 }
 0x7f1   : > { %26623 = vmatprep.subr.bf16.mxu0 %v29381_v51  ;;  %v14946_v47 = vsub.f32 %v29436_v40, %v14945_v1 }
 0x7f3   : > { %25481 = vmatmul.mubr.f32.vlgmr.msra.gmra.mrb[64].mxu1 %v13861_v28  ;;  %v14947_v55 = vand.u32 4294901760, %v14946_v47 }
 0x7f4   : > { %25484 = vmatpush3.msra.mxu1 %v13872_v61  ;;  %25485 = vmatprep.mubr.f32.mxu1 %v13847_v60  ;;  %v29434_v61 = vsub.f32 %v14816_v12, %v14839_v15 }
 0x7f5   : > { %25488 = vmatprep.subr.mxu1 %v13869_v14  ;;  %26625 = vmatpush3.bf16.msra.mxu0 %v29381_v51 }
 0x7f6   : > { %26627 = vmatprep.subr.bf16.mxu0 %v29390_v39  ;;  %v14938_v28 = vand.u32 4294901760, %v29434_v61  ;;  %v29478_v24 = vpack.c.bf16 %v29436_v40, %v29434_v61 }
 0x7f8   : > { %v14939_v45 = vsub.f32 %v29434_v61, %v14938_v28 }
 0x7f9   : > { %26629 = vmatpush3.bf16.msra.mxu0 %v29390_v39 }
 0x7fb   : > { %25486 = vmatmul.mubr.f32.vlgmr.msra.gmra.mrb[64].mxu1 %v13857_v54 }
 0x7fc   : > { %25489 = vmatpush3.msra.mxu1 %v13869_v14  ;;  %25490 = vmatprep.mubr.f32.mxu1 %v13848_v59  ;;  %v14857_v59 = vand.u32 4294901760, %v14822_v35  ;;  %v14869_v14 = vand.u32 4294901760, %v29403_v10 }
 0x7fd   : > { %25493 = vmatprep.subr.mxu1 %v13782_v5 }
 0x803   : > { %25491 = vmatmul.mubr.f32.vlgmr.msra.gmra.mrb[64].mxu1 %v13858_v6  ;;  %v14825_v6 = vld [vmem:[%s30023_s6 + $0x48] sm:$0xff] }
 0x804   : > { %25494 = vmatpush3.msra.mxu1 %v13782_v5  ;;  %25495 = vmatprep.mubr.f32.mxu1 %v13849_v11  ;;  %v14866_v9 = vand.u32 4294901760, %v14825_v6 }
 0x805   : > { %25498 = vmatprep.subr.mxu1 %v13870_v4 }
 0x80b   : > { %25496 = vmatmul.mubr.f32.vlgmr.msra.gmra.mrb[64].mxu1 %v13859_v20 }
 0x80c   : > { %25499 = vmatpush3.msra.mxu1 %v13870_v4  ;;  %25500 = vmatprep.mubr.f32.mxu1 %v13847_v60  ;;  %v14824_v4 = vld [vmem:[%s30023_s6 + $0x40] sm:$0xff] }
 0x80d   : > { %25503 = vmatprep.subr.mxu1 %v13782_v5  ;;  %v14863_v32 = vand.u32 4294901760, %v14824_v4 }
 0x80f   : > { %v29432_v19 = vpack.c.bf16 %v14866_v9, %v14863_v32 }
 0x813   : > { %25501 = vmatmul.mubr.f32.vlgmr.msra.gmra.mrb[64].mxu1 %v13857_v54 }
 0x814   : > { %25504 = vmatpush3.msra.mxu1 %v13782_v5  ;;  %25505 = vmatprep.mubr.f32.mxu1 %v13847_v60  ;;  %v29406_v60 = vsel %vm8861_vm13, %v14827_v27, 0  ;;  %v14823_v5 = vld [vmem:[%s30023_s6 + $0x38] sm:$0xff] }
 0x815   : > { %25508 = vmatprep.subr.mxu1 %v14285_v33  ;;  %v14860_v17 = vand.u32 4294901760, %v14823_v5 }
 0x817   : > { %v29416_v11 = vpack.c.bf16 %v14860_v17, %v14857_v59 }
 0x819   : > { %26631 = vmatprep.subr.bf16.mxu0 %v29416_v11 }
 0x81a   : > { %26633 = vmatpush3.bf16.msra.mxu0 %v29416_v11 }
 0x81b   : > { %25506 = vmatmul.mubr.f32.vlgmr.msra.gmra.mrb[64].mxu1 %v13857_v54  ;;  %v14872_v54 = vand.u32 4294901760, %v29406_v60  ;;  %26635 = vmatprep.subr.bf16.mxu0 %v29432_v19 }
 0x81c   : > { %25509 = vmatpush3.msra.mxu1 %v14285_v33  ;;  %25510 = vmatprep.mubr.f32.mxu1 %v14354_v63  ;;  %v29464_v63 = vsub.f32 %v14824_v4, %v14863_v32 }
 0x81d   : > { %25513 = vmatprep.subr.mxu1 %v14375_v53  ;;  %v29430_v20 = vpack.c.bf16 %v14872_v54, %v14869_v14 }
 0x81e   : > { %26637 = vmatpush3.bf16.msra.mxu0 %v29432_v19 }
 0x81f   : > { %26639 = vmatprep.subr.bf16.mxu0 %v29430_v20 }
 0x822   : > { %26641 = vmatpush3.bf16.msra.mxu0 %v29430_v20 }
 0x823   : > { %25511 = vmatmul.mubr.f32.vlgmr.msra.gmra.mrb[64].mxu1 %v14364_v25 }
 0x824   : > { %25514 = vmatpush3.msra.mxu1 %v14375_v53  ;;  %25515 = vmatprep.mubr.f32.mxu1 %v14350_v29  ;;  %v29466_v53 = vsub.f32 %v14825_v6, %v14866_v9 }
 0x825   : > { %25518 = vmatprep.subr.mxu1 %v14372_v57 }
 0x826   : > { %v29486_v15 = vpack.c.bf16 %v29466_v53, %v29464_v63 }
 0x82b   : > { %25516 = vmatmul.mubr.f32.vlgmr.msra.gmra.mrb[64].mxu1 %v14360_v13 }
 0x82c   : > { %25519 = vmatpush3.msra.mxu1 %v14372_v57  ;;  %25520 = vmatprep.mubr.f32.mxu1 %v14351_v3  ;;  %v14940_v3 = vand.u32 4294901760, %v14939_v45 }
 0x82d   : > { %25523 = vmatprep.subr.mxu1 %v14285_v33 }
 0x833   : > { %25521 = vmatmul.mubr.f32.vlgmr.msra.gmra.mrb[64].mxu1 %v14361_v8 }
 0x834   : > { %25524 = vmatpush3.msra.mxu1 %v14285_v33  ;;  %25525 = vmatprep.mubr.f32.mxu1 %v14352_v58  ;;  %v29452_v58 = vsub.f32 %v14822_v35, %v14857_v59 }
 0x835   : > { %25528 = vmatprep.subr.mxu1 %v14373_v38 }
 0x836   : > { %v14980_v8 = vand.u32 4294901760, %v29452_v58 }
 0x838   : > { %v14981_v50 = vsub.f32 %v29452_v58, %v14980_v8 }
 0x83a   : > { %v14982_v36 = vand.u32 4294901760, %v14981_v50 }
 0x83b   : > { %25526 = vmatmul.mubr.f32.vlgmr.msra.gmra.mrb[64].mxu1 %v14362_v62 }
 0x83c   : > { %25529 = vmatpush3.msra.mxu1 %v14373_v38  ;;  %25530 = vmatprep.mubr.f32.mxu1 %v14350_v29  ;;  %v29454_v38 = vsub.f32 %v14823_v5, %v14860_v17  ;;  %v14952_v5 = vand.u32 4294901760, %v29491_v26  ;;  %v29503_v17 = vsub.f32 %v29365_v31, %v14851_v49 }
 0x83d   : > { %25533 = vmatprep.subr.mxu1 %v14285_v33 }
 0x83e   : > { %v14987_v56 = vand.u32 4294901760, %v29454_v38  ;;  %v14953_v32 = vsub.f32 %v29491_v26, %v14952_v5  ;;  %v14966_v49 = vand.u32 4294901760, %v29503_v17 }
 0x840   : > { %v14988_v62 = vsub.f32 %v29454_v38, %v14987_v56  ;;  %v26722_v61 = vpack.c.bf16 %v14973_v52, %v14966_v49  ;;  %v26726_v40 = vpack.c.bf16 %v14987_v56, %v14980_v8 }
 0x842   : > { %v14989_v25 = vand.u32 4294901760, %v14988_v62 }
 0x843   : > { %25531 = vmatmul.mubr.f32.vlgmr.msra.gmra.mrb[64].mxu1 %v14360_v13 }
 0x844   : > { %25534 = vmatpush3.msra.mxu1 %v14285_v33  ;;  %25535 = vmatprep.mubr.f32.mxu1 %v14350_v29 }
 0x84b   : > { %25536 = vmatmul.mubr.f32.vlgmr.msra.gmra.mrb[64].mxu1 %v14360_v13  ;;  %v26642_v13 = vpack.c.bf16 %v14947_v55, %v14940_v3  ;;  %v14974_v55 = vsub.f32 %v29508_v18, %v14973_v52 }
 0x84d   : > { %26643 = vmatprep.subr.bf16.mxu0 %v26642_v13 }
 0x91e   : > { %v25537_v37 = vpop.f32.mrb[64].mxu1 }
 0x91f   : > { %v14788_v23 = vadd.f32 %v25537_v37, %v14785_v30  ;;  %v14763_v34 = vpop.f32.mrb[65].mxu1  ;;  %v14994_v30 = vand.u32 4294901760, %v29464_v63  ;;  %v15001_v37 = vand.u32 4294901760, %v29466_v53 }
 0x920   : > { %v14787_v42 = vadd.f32 %v14780_v48, %v14763_v34  ;;  %v26654_v48 = vpack.c.bf16 %v14989_v25, %v14982_v36 }
 0x921   : > { %v14790_v21 = vmax.f32 %v14788_v23, 0.0  ;;  %v14995_v23 = vsub.f32 %v29464_v63, %v14994_v30  ;;  %v15002_v34 = vsub.f32 %v29466_v53, %v15001_v37 }
 0x922   : > { %v14789_v43 = vmax.f32 %v14787_v42, 0.0 }
 0x923   : > { %14793 = vst.msk [vmem:[#allocation4 + $0x8] sm:$0xff] %vm14791_vm0, %v14790_v21  ;;  %v14996_v42 = vand.u32 4294901760, %v14995_v23  ;;  %v15003_v21 = vand.u32 4294901760, %v15002_v34  ;;  %v14975_v23 = vand.u32 4294901760, %v14974_v55  ;;  %v29539_v34 = vsub.f32 %v29403_v10, %v14869_v14 }
 0x924   : > { %14792 = vst.msk [vmem:[#allocation4] sm:$0xff] %vm14791_vm0, %v14789_v43  ;;  %v29482_v43 = vpack.c.bf16 %v29454_v38, %v29452_v58  ;;  %v15476_v38 = vld [vmem:[%s30024_s7 + $0x8] sm:$0x3] }
 0x925   : > { %v26658_v12 = vpack.c.bf16 %v15003_v21, %v14996_v42  ;;  %v29544_v42 = vsub.f32 %v29406_v60, %v14872_v54  ;;  %v15483_v8 = vsel %vm15470_vm2, %v15476_v38, 0 }
 0x926   : > { %v29636_v56 = vand.u32 4294901760, %v15483_v8 }
 0x92a   : > { %v14795_v7 = vld [vmem:[#allocation4 + $0x8] sm:$0xff] }
 0x92b   : > { %14800 = vrot.lane.b32.xlu1 %v14795_v7, %s27626_s15  ;;  %v14794_v46 = vld [vmem:[#allocation4] sm:$0xff] }
 0x92c   : > { %14798 = vrot.lane.b32.xlu0 %v14794_v46, %s27626_s15 }
 0x99d   : > { %v14801_v29 = vpop.permute.xlu1 %14800 }
 0x99e   : > { %v14805_v16 = vmax.f32 %v14795_v7, %v14801_v29  ;;  %v14799_v33 = vpop.permute.xlu0 %14798  ;;  %v29496_v7 = vsub.f32 %v29359_v22, %v14848_v41  ;;  %v14954_v29 = vand.u32 4294901760, %v14953_v32 }
 0x99f   : > { %v14804_v57 = vmax.f32 %v14794_v46, %v14799_v33  ;;  %v14967_v33 = vsub.f32 %v29503_v17, %v14966_v49 }
 0x9a0   : > { %14810 = vrot.lane.b32.xlu1 %v14805_v16, %s27638_s13  ;;  %v14959_v59 = vand.u32 4294901760, %v29496_v7 }
 0x9a1   : > { %14808 = vrot.lane.b32.xlu0 %v14804_v57, %s27638_s13  ;;  %v14968_v36 = vand.u32 4294901760, %v14967_v33 }
 0x9a2   : > { %v14960_v31 = vsub.f32 %v29496_v7, %v14959_v59 }
 0x9a3   : > { %v26650_v21 = vpack.c.bf16 %v14975_v23, %v14968_v36 }
 0xa12   : > { %v14811_v46 = vpop.permute.xlu1 %14810 }
 0xa13   : > { %v14815_v27 = vmax.f32 %v14805_v16, %v14811_v46  ;;  %v14809_v35 = vpop.permute.xlu0 %14808  ;;  %v14961_v16 = vand.u32 4294901760, %v14960_v31  ;;  %v15008_v46 = vand.u32 4294901760, %v29539_v34 }
 0xa14   : > { %v14814_v2 = vmax.f32 %v14804_v57, %v14809_v35  ;;  %v26670_v35 = vpack.c.bf16 %v29496_v7, %v29491_v26 }
 0xa15   : > { %v14833_v22 = vsel %vm14828_vm1, %v14815_v27, 0  ;;  %v26646_v62 = vpack.c.bf16 %v14961_v16, %v14954_v29  ;;  %v15015_v27 = vand.u32 4294901760, %v29544_v42  ;;  %v15009_v10 = vsub.f32 %v29539_v34, %v15008_v46 }
 0xa16   : > { %v29510_v41 = vand.u32 4294901760, %v14833_v22  ;;  %v14830_v4 = vsel %vm14828_vm1, %v14814_v2, 0  ;;  %v26674_v2 = vpack.c.bf16 %v29508_v18, %v29503_v17 }
 0xa17   : > { %v29512_v6 = vand.u32 4294901760, %v14830_v4  ;;  %v15016_v60 = vsub.f32 %v29544_v42, %v15015_v27  ;;  %v15010_v14 = vand.u32 4294901760, %v15009_v10 }
 0xa18   : > { %v29522_v9 = vsub.f32 %v14833_v22, %v29510_v41 }
 0xa19   : > { %v14916_v44 = vsub.f32 %v14830_v4, %v29512_v6  ;;  %v15017_v54 = vand.u32 4294901760, %v15016_v60 }
 0xa1a   : > { %v14927_v45 = vand.u32 4294901760, %v29522_v9 }
 0xa1b   : > { %v14917_v47 = vand.u32 4294901760, %v14916_v44 }
 0xa1c   : > { %v14928_v3 = vsub.f32 %v29522_v9, %v14927_v45 }
 0xa1d   : > { %v14918_v57 = vsub.f32 %v14916_v44, %v14917_v47 }
 0xa1e   : > { %v14929_v25 = vand.u32 4294901760, %v14928_v3 }
 0xa1f   : > { %v14919_v50 = vand.u32 4294901760, %v14918_v57  ;;  %v23868_v57 = vld [vmem:[%s30024_s7 + $0x18] sm:$0x3] }
 0xa21   : > { %25562 = vmatprep.mubr.f32.mxu0 %v14919_v50  ;;  %v16004_v50 = vsel %vm15470_vm2, %v23868_v57, 0 }
 0xa22   : > { %25563 = vmatmul.mubr.f32.vlgmr.msra.gmra.mrb[60].mxu0 %v14929_v25 }
 0xa23   : > { %26645 = vmatpush3.bf16.msra.mxu0 %v26642_v13  ;;  %25589 = vmatprep.mubr.f32.mxu0 %v29512_v6  ;;  %v26662_v13 = vpack.c.bf16 %v15017_v54, %v15010_v14 }
 0xa24   : > { %26647 = vmatprep.subr.bf16.mxu0 %v26646_v62 }
 0xa27   : > { %26649 = vmatpush3.bf16.msra.mxu0 %v26646_v62  ;;  %v29726_v62 = vand.u32 4294901760, %v16004_v50 }
 0xa28   : > { %26651 = vmatprep.subr.bf16.mxu0 %v26650_v21 }
 0xa29   : > { %v16084_v36 = vsub.f32 %v16004_v50, %v29726_v62 }
 0xa2b   : > { %26653 = vmatpush3.bf16.msra.mxu0 %v26650_v21  ;;  %v16085_v25 = vand.u32 4294901760, %v16084_v36 }
 0xa2c   : > { %26655 = vmatprep.subr.bf16.mxu0 %v26654_v48 }
 0xa2f   : > { %26657 = vmatpush3.bf16.msra.mxu0 %v26654_v48  ;;  %v26686_v48 = vpack.c.bf16 %v29544_v42, %v29539_v34 }
 0xa30   : > { %26659 = vmatprep.subr.bf16.mxu0 %v26658_v12 }
 0xa33   : > { %26661 = vmatpush3.bf16.msra.mxu0 %v26658_v12  ;;  %v26714_v12 = vpack.c.bf16 %v14945_v1, %v14938_v28  ;;  %v26730_v28 = vpack.c.bf16 %v15001_v37, %v14994_v30  ;;  %v26734_v1 = vpack.c.bf16 %v15015_v27, %v15008_v46  ;;  %v29641_v30 = vsub.f32 %v15483_v8, %v29636_v56 }
 0xa34   : > { %26663 = vmatprep.subr.bf16.mxu0 %v26662_v13  ;;  %v16086_v46 = vsub.f32 %v16084_v36, %v16085_v25 }
 0xa35   : > { %v15564_v37 = vand.u32 4294901760, %v29641_v30 }
 0xa37   : > { %26665 = vmatpush3.bf16.msra.mxu0 %v26662_v13  ;;  %v16087_v13 = vand.u32 4294901760, %v16086_v46 }
 0xa38   : > { %26667 = vmatprep.subr.bf16.mxu0 %v29478_v24 }
 0xa3a   : > { %25590 = vmatmul.mubr.f32.vlgmr.msra.gmra.mrb[60].mxu0 %v29510_v41 }
 0xa3b   : > { %26669 = vmatpush3.bf16.msra.mxu0 %v29478_v24  ;;  %25616 = vmatprep.mubr.f32.mxu0 %v14916_v44  ;;  %v26718_v24 = vpack.c.bf16 %v14959_v59, %v14952_v5  ;;  %v15565_v5 = vsub.f32 %v29641_v30, %v15564_v37  ;;  %v23867_v44 = vld [vmem:[%s30024_s7 + $0x10] sm:$0xff] }
 0xa3c   : > { %26671 = vmatprep.subr.bf16.mxu0 %v26670_v35 }
 0xa3f   : > { %26673 = vmatpush3.bf16.msra.mxu0 %v26670_v35 }
 0xa40   : > { %26675 = vmatprep.subr.bf16.mxu0 %v26674_v2 }
 0xa43   : > { %26677 = vmatpush3.bf16.msra.mxu0 %v26674_v2 }
 0xa44   : > { %26679 = vmatprep.subr.bf16.mxu0 %v29482_v43 }
 0xa47   : > { %26681 = vmatpush3.bf16.msra.mxu0 %v29482_v43 }
 0xa48   : > { %26683 = vmatprep.subr.bf16.mxu0 %v29486_v15 }
 0xa4b   : > { %26685 = vmatpush3.bf16.msra.mxu0 %v29486_v15 }
 0xa4c   : > { %26687 = vmatprep.subr.bf16.mxu0 %v26686_v48 }
 0xa4f   : > { %26689 = vmatpush3.bf16.msra.mxu0 %v26686_v48 }
 0xa50   : > { %26691 = vmatprep.subr.bf16.mxu0 %v29373_v0 }
 0xa52   : > { %25617 = vmatmul.mubr.f32.vlgmr.msra.gmra.mrb[60].mxu0 %v29522_v9 }
 0xa53   : > { %26693 = vmatpush3.bf16.msra.mxu0 %v29373_v0  ;;  %25643 = vmatprep.mubr.f32.mxu0 %v14917_v47  ;;  %v16001_v47 = vsel %vm15470_vm2, %v23867_v44, 0 }
 0xa54   : > { %26695 = vmatprep.subr.bf16.mxu0 %v29381_v51  ;;  %v29689_v29 = vand.u32 4294901760, %v16001_v47 }
 0xa56   : > { %v29695_v16 = vsub.f32 %v16001_v47, %v29689_v29 }
 0xa57   : > { %26697 = vmatpush3.bf16.msra.mxu0 %v29381_v51 }
 0xa58   : > { %26699 = vmatprep.subr.bf16.mxu0 %v29390_v39  ;;  %v16075_v33 = vand.u32 4294901760, %v29695_v16 }
 0xa5a   : > { %v16076_v3 = vsub.f32 %v29695_v16, %v16075_v33 }
 0xa5b   : > { %26701 = vmatpush3.bf16.msra.mxu0 %v29390_v39 }
 0xa5c   : > { %26703 = vmatprep.subr.bf16.mxu0 %v29416_v11  ;;  %v16077_v55 = vand.u32 4294901760, %v16076_v3 }
 0xa5f   : > { %26705 = vmatpush3.bf16.msra.mxu0 %v29416_v11 }
 0xa60   : > { %26707 = vmatprep.subr.bf16.mxu0 %v29432_v19 }
 0xa63   : > { %26709 = vmatpush3.bf16.msra.mxu0 %v29432_v19 }
 0xa64   : > { %26711 = vmatprep.subr.bf16.mxu0 %v29430_v20 }
 0xa67   : > { %26713 = vmatpush3.bf16.msra.mxu0 %v29430_v20 }
 0xa68   : > { %26715 = vmatprep.subr.bf16.mxu0 %v26714_v12 }
 0xa6a   : > { %25644 = vmatmul.mubr.f32.vlgmr.msra.gmra.mrb[60].mxu0 %v14927_v45 }
 0xa6b   : > { %26717 = vmatpush3.bf16.msra.mxu0 %v26714_v12  ;;  %25670 = vmatprep.mubr.f32.mxu0 %v29512_v6 }
 0xa6c   : > { %26719 = vmatprep.subr.bf16.mxu0 %v26718_v24 }
 0xa6f   : > { %26721 = vmatpush3.bf16.msra.mxu0 %v26718_v24 }
 0xa70   : > { %26723 = vmatprep.subr.bf16.mxu0 %v26722_v61 }
 0xa73   : > { %26725 = vmatpush3.bf16.msra.mxu0 %v26722_v61 }
 0xa74   : > { %26727 = vmatprep.subr.bf16.mxu0 %v26726_v40 }
 0xa77   : > { %26729 = vmatpush3.bf16.msra.mxu0 %v26726_v40  ;;  %v23869_v40 = vld [vmem:[%s30024_s7 + $0x20] sm:$0xff] }
 0xa78   : > { %26731 = vmatprep.subr.bf16.mxu0 %v26730_v28 }
 0xa7b   : > { %26733 = vmatpush3.bf16.msra.mxu0 %v26730_v28 }
 0xa7c   : > { %26735 = vmatprep.subr.bf16.mxu0 %v26734_v1 }
 0xa7f   : > { %26737 = vmatpush3.bf16.msra.mxu0 %v26734_v1 }
 0xa80   : > { %26739 = vmatprep.subr.bf16.mxu0 %v29373_v0 }
 0xa82   : > { %25671 = vmatmul.mubr.f32.vlgmr.msra.gmra.mrb[60].mxu0 %v29510_v41 }
 0xa83   : > { %26741 = vmatpush3.bf16.msra.mxu0 %v29373_v0  ;;  %25697 = vmatprep.mubr.f32.mxu0 %v29512_v6  ;;  %v15475_v0 = vld [vmem:[%s30024_s7] sm:$0xff] }
 0xa84   : > { %26743 = vmatprep.subr.bf16.mxu0 %v29381_v51 }
 0xa87   : > { %26745 = vmatpush3.bf16.msra.mxu0 %v29381_v51  ;;  %v15480_v51 = vsel %vm15470_vm2, %v15475_v0, 0 }
 0xa88   : > { %26747 = vmatprep.subr.bf16.mxu0 %v29390_v39 }
 0xa8b   : > { %26749 = vmatpush3.bf16.msra.mxu0 %v29390_v39  ;;  %v29623_v39 = vand.u32 4294901760, %v15480_v51 }
 0xa8c   : > { %26751 = vmatprep.subr.bf16.mxu0 %v29416_v11 }
 0xa8f   : > { %26753 = vmatpush3.bf16.msra.mxu0 %v29416_v11  ;;  %v29626_v11 = vsub.f32 %v15480_v51, %v29623_v39  ;;  %v16520_v51 = vsel %vm15470_vm2, %v23869_v40, 0 }
 0xa90   : > { %26755 = vmatprep.subr.bf16.mxu0 %v29432_v19 }
 0xa93   : > { %26757 = vmatpush3.bf16.msra.mxu0 %v29432_v19  ;;  %v15554_v19 = vand.u32 4294901760, %v29626_v11 }
 0xa94   : > { %26759 = vmatprep.subr.bf16.mxu0 %v29430_v20 }
 0xa97   : > { %26761 = vmatpush3.bf16.msra.mxu0 %v29430_v20  ;;  %v15555_v20 = vsub.f32 %v29626_v11, %v15554_v19 }
 0xa99   : > { %v15556_v58 = vand.u32 4294901760, %v15555_v20  ;;  %v23870_v20 = vld [vmem:[%s30024_s7 + $0x28] sm:$0x3] }
 0xa9a   : > { %25698 = vmatmul.mubr.f32.vlgmr.msra.gmra.mrb[60].mxu0 %v29510_v41  ;;  %v15566_v41 = vand.u32 4294901760, %v15565_v5 }
 0xa9b   : > { %25704 = vmatprep.mubr.f32.mxu1 %v15556_v58 }
 0xb6d   : > { %v25699_v63 = vpop.f32.mrb[60].mxu0 }
 0xb6e   : > { %15472 = vst.msk [vmem:[#allocation5 + $0x8] sm:$0xff] %vm15470_vm2, %v25699_v63  ;;  %v15460_v53 = vpop.f32.mrb[61].mxu0 }
 0xb6f   : > { %15471 = vst.msk [vmem:[#allocation5] sm:$0xff] %vm15470_vm2, %v15460_v53 }
 0xb75   : > { %v29644_v43 = vld [vmem:[#allocation5 + $0x8] sm:$0xff] }
 0xb76   : > { %v29646_v15 = vld [vmem:[#allocation5] sm:$0xff]  ;;  %15996 = vrot.lane.b32.xlu1 %v29644_v43, %s27626_s15  ;;  %v15489_v26 = vand.u32 4294901760, %v29644_v43 }
 0xb77   : > { %15994 = vrot.lane.b32.xlu0 %v29646_v15, %s27626_s15  ;;  %v15486_v7 = vand.u32 4294901760, %v29646_v15  ;;  %s27642_s15 = smov 125  }
 0xb78   : > { %v15581_v59 = vsub.f32 %v29644_v43, %v15489_v26 }
 0xb79   : > { %v29656_v17 = vpack.c.bf16 %v15489_v26, %v15486_v7  ;;  %v15574_v18 = vsub.f32 %v29646_v15, %v15486_v7 }
 0xb7a   : > { %16515 = vrot.lane.b32.xlu1 %v29644_v43, %s27627_s16  ;;  %v15582_v22 = vand.u32 4294901760, %v15581_v59 }
 0xb7b   : > { %16513 = vrot.lane.b32.xlu0 %v29646_v15, %s27627_s16  ;;  %26763 = vmatprep.subr.bf16.mxu1 %v29656_v17  ;;  %v15575_v4 = vand.u32 4294901760, %v15574_v18  ;;  %s27643_s16 = smov 124   ;;  %v26770_v52 = vpack.c.bf16 %v15581_v59, %v15574_v18 }
 0xb7c   : > { %26765 = vmatpush3.bf16.msra.mxu1 %v29656_v17  ;;  %v15583_v6 = vsub.f32 %v15581_v59, %v15582_v22 }
 0xb7d   : > { %v15576_v32 = vsub.f32 %v15574_v18, %v15575_v4  ;;  %v26778_v45 = vpack.c.bf16 %v15582_v22, %v15575_v4 }
 0xb7e   : > { %17034 = vrot.lane.b32.xlu1 %v29644_v43, %s27642_s15  ;;  %v15584_v31 = vand.u32 4294901760, %v15583_v6 }
 0xb7f   : > { %17032 = vrot.lane.b32.xlu0 %v29646_v15, %s27642_s15  ;;  %25705 = vmatmul.mubr.f32.vlgmr.msra.gmra.mrb[66].mxu1 %v15566_v41  ;;  %v15577_v49 = vand.u32 4294901760, %v15576_v32 }
 0xb80   : > { %25711 = vmatprep.mubr.f32.mxu1 %v29623_v39 }
 0xb81   : > { %v26766_v9 = vpack.c.bf16 %v15584_v31, %v15577_v49  ;;  %v23871_v31 = vld [vmem:[%s30024_s7 + $0x30] sm:$0xff] }
 0xb82   : > { %17553 = vrot.lane.b32.xlu1 %v29644_v43, %s27643_s16  ;;  %v17039_v44 = vsel %vm15470_vm2, %v23871_v31, 0 }
 0xb83   : > { %17551 = vrot.lane.b32.xlu0 %v29646_v15, %s27643_s16  ;;  %26767 = vmatprep.subr.bf16.mxu1 %v26766_v9  ;;  %s332_s16 = scalar_lea.vmem %s30026_s9, %s23899_s19 }
 0xb84   : > { %26769 = vmatpush3.bf16.msra.mxu1 %v26766_v9 }
 0xb85   : > { %26771 = vmatprep.subr.bf16.mxu1 %v26770_v52 }
 0xb86   : > { %18072 = vrot.lane.b32.xlu1 %v29644_v43, %s27644_s11 }
 0xb87   : > { %18070 = vrot.lane.b32.xlu0 %v29646_v15, %s27644_s11  ;;  %25712 = vmatmul.mubr.f32.vlgmr.msra.gmra.mrb[66].mxu1 %v29636_v56 }
 0xb88   : > { %26773 = vmatpush3.bf16.msra.mxu1 %v26770_v52  ;;  %25718 = vmatprep.mubr.f32.mxu1 %v29626_v11 }
 0xb89   : > { %26775 = vmatprep.subr.bf16.mxu1 %v29656_v17 }
 0xb8a   : > { %18591 = vrot.lane.b32.xlu1 %v29644_v43, %s27645_s12 }
 0xb8b   : > { %18589 = vrot.lane.b32.xlu0 %v29646_v15, %s27645_s12 }
 0xb8e   : > { %19110 = vrot.lane.b32.xlu1 %v29644_v43, %s27646_s20 }
 0xb8f   : > { %19108 = vrot.lane.b32.xlu0 %v29646_v15, %s27646_s20  ;;  %25719 = vmatmul.mubr.f32.vlgmr.msra.gmra.mrb[66].mxu1 %v29641_v30 }
 0xb90   : > { %26777 = vmatpush3.bf16.msra.mxu1 %v29656_v17  ;;  %25725 = vmatprep.mubr.f32.mxu1 %v15554_v19  ;;  %v29736_v19 = vand.u32 4294901760, %v16520_v51 }
 0xb91   : > { %26779 = vmatprep.subr.bf16.mxu1 %v26778_v45 }
 0xb92   : > { %19629 = vrot.lane.b32.xlu1 %v29644_v43, %s27647_s23  ;;  %v16593_v8 = vsub.f32 %v16520_v51, %v29736_v19  ;;  %v23874_v51 = vld [vmem:[%s30024_s7 + $0x48] sm:$0x3] }
 0xb93   : > { %19627 = vrot.lane.b32.xlu0 %v29646_v15, %s27647_s23 }
 0xb96   : > { %20148 = vrot.lane.b32.xlu1 %v29644_v43, %s27648_s25 }
 0xb97   : > { %20146 = vrot.lane.b32.xlu0 %v29646_v15, %s27648_s25  ;;  %25726 = vmatmul.mubr.f32.vlgmr.msra.gmra.mrb[66].mxu1 %v15564_v37  ;;  %v16594_v37 = vand.u32 4294901760, %v16593_v8 }
 0xb98   : > { %26781 = vmatpush3.bf16.msra.mxu1 %v26778_v45  ;;  %25732 = vmatprep.mubr.f32.mxu1 %v29623_v39 }
 0xb99   : > { %26783 = vmatprep.subr.bf16.mxu1 %v29656_v17  ;;  %v16595_v5 = vsub.f32 %v16593_v8, %v16594_v37 }
 0xb9a   : > { %20667 = vrot.lane.b32.xlu1 %v29644_v43, %s27638_s13 }
 0xb9b   : > { %20665 = vrot.lane.b32.xlu0 %v29646_v15, %s27638_s13  ;;  %s27649_s13 = smov 115   ;;  %v16596_v22 = vand.u32 4294901760, %v16595_v5 }
 0xb9e   : > { %21186 = vrot.lane.b32.xlu1 %v29644_v43, %s27637_s17 }
 0xb9f   : > { %21184 = vrot.lane.b32.xlu0 %v29646_v15, %s27637_s17  ;;  %25733 = vmatmul.mubr.f32.vlgmr.msra.gmra.mrb[66].mxu1 %v29636_v56  ;;  %s27650_s17 = smov 114  }
 0xba0   : > { %26785 = vmatpush3.bf16.msra.mxu1 %v29656_v17  ;;  %25739 = vmatprep.mubr.f32.mxu1 %v29623_v39 }
 0xba2   : > { %21705 = vrot.lane.b32.xlu1 %v29644_v43, %s27639_s18 }
 0xba3   : > { %21703 = vrot.lane.b32.xlu0 %v29646_v15, %s27639_s18 }
 0xba6   : > { %22224 = vrot.lane.b32.xlu1 %v29644_v43, %s27649_s13 }
 0xba7   : > { %22222 = vrot.lane.b32.xlu0 %v29646_v15, %s27649_s13  ;;  %25740 = vmatmul.mubr.f32.vlgmr.msra.gmra.mrb[66].mxu1 %v29636_v56  ;;  %v16523_v56 = vsel %vm15470_vm2, %v23870_v20, 0  ;;  %v17561_v20 = vsel %vm15470_vm2, %v23874_v51, 0 }
 0xba8   : > { %25746 = vmatprep.mubr.f32.mxu1 %v16077_v55  ;;  %v29744_v30 = vand.u32 4294901760, %v16523_v56 }
 0xbaa   : > { %22743 = vrot.lane.b32.xlu1 %v29644_v43, %s27650_s17  ;;  %v16603_v7 = vsub.f32 %v16523_v56, %v29744_v30 }
 0xbab   : > { %22741 = vrot.lane.b32.xlu0 %v29646_v15, %s27650_s17 }
 0xbac   : > { %v16604_v18 = vand.u32 4294901760, %v16603_v7 }
 0xbae   : > { %23262 = vrot.lane.b32.xlu1 %v29644_v43, %s27651_s26  ;;  %v16605_v4 = vsub.f32 %v16603_v7, %v16604_v18 }
 0xbaf   : > { %23260 = vrot.lane.b32.xlu0 %v29646_v15, %s27651_s26 }
 0xbb0   : > { %v16606_v6 = vand.u32 4294901760, %v16605_v4 }
 0xbe8   : > { %v15997_v23 = vpop.permute.xlu1 %15996 }
 0xbe9   : > { %v16010_v34 = vand.u32 4294901760, %v15997_v23  ;;  %v15995_v42 = vpop.permute.xlu0 %15994 }
 0xbea   : > { %v16007_v21 = vand.u32 4294901760, %v15995_v42 }
 0xbeb   : > { %v16102_v27 = vsub.f32 %v15997_v23, %v16010_v34 }
 0xbec   : > { %v26786_v10 = vpack.c.bf16 %v16010_v34, %v16007_v21  ;;  %v16095_v60 = vsub.f32 %v15995_v42, %v16007_v21  ;;  %v16516_v1 = vpop.permute.xlu1 %16515 }
 0xbed   : > { %v16103_v14 = vand.u32 4294901760, %v16102_v27  ;;  %v16514_v0 = vpop.permute.xlu0 %16513  ;;  %v16529_v39 = vand.u32 4294901760, %v16516_v1 }
 0xbee   : > { %v16096_v54 = vand.u32 4294901760, %v16095_v60  ;;  %26787 = vmatprep.subr.bf16.mxu1 %v26786_v10  ;;  %v26794_v61 = vpack.c.bf16 %v16102_v27, %v16095_v60  ;;  %v16526_v11 = vand.u32 4294901760, %v16514_v0 }
 0xbef   : > { %v16104_v35 = vsub.f32 %v16102_v27, %v16103_v14  ;;  %26789 = vmatpush3.bf16.msra.mxu1 %v26786_v10  ;;  %v16621_v58 = vsub.f32 %v16516_v1, %v16529_v39 }
 0xbf0   : > { %v16097_v2 = vsub.f32 %v16095_v60, %v16096_v54  ;;  %v26802_v28 = vpack.c.bf16 %v16103_v14, %v16096_v54  ;;  %v16614_v38 = vsub.f32 %v16514_v0, %v16526_v11  ;;  %v26810_v15 = vpack.c.bf16 %v16529_v39, %v16526_v11  ;;  %v17035_v9 = vpop.permute.xlu1 %17034 }
 0xbf1   : > { %v16105_v48 = vand.u32 4294901760, %v16104_v35  ;;  %v16622_v63 = vand.u32 4294901760, %v16621_v58  ;;  %v17033_v52 = vpop.permute.xlu0 %17032  ;;  %v17048_v45 = vand.u32 4294901760, %v17035_v9 }
 0xbf2   : > { %25747 = vmatmul.mubr.f32.vlgmr.msra.gmra.mrb[66].mxu1 %v16087_v13  ;;  %v16098_v12 = vand.u32 4294901760, %v16097_v2  ;;  %v16615_v53 = vand.u32 4294901760, %v16614_v38  ;;  %v26818_v32 = vpack.c.bf16 %v16621_v58, %v16614_v38  ;;  %v17045_v47 = vand.u32 4294901760, %v17033_v52 }
 0xbf3   : > { %25753 = vmatprep.mubr.f32.mxu1 %v29689_v29  ;;  %v16623_v43 = vsub.f32 %v16621_v58, %v16622_v63 }
 0xbf4   : > { %v26790_v24 = vpack.c.bf16 %v16105_v48, %v16098_v12  ;;  %v16616_v26 = vsub.f32 %v16614_v38, %v16615_v53  ;;  %v26826_v49 = vpack.c.bf16 %v16622_v63, %v16615_v53  ;;  %v17133_v3 = vsub.f32 %v17033_v52, %v17045_v47  ;;  %v23873_v48 = vld [vmem:[%s30024_s7 + $0x40] sm:$0xff] }
 0xbf5   : > { %v16624_v17 = vand.u32 4294901760, %v16623_v43  ;;  %v26834_v34 = vpack.c.bf16 %v17048_v45, %v17045_v47  ;;  %v17558_v40 = vsel %vm15470_vm2, %v23873_v48, 0 }
 0xbf6   : > { %26791 = vmatprep.subr.bf16.mxu1 %v26790_v24  ;;  %v16617_v59 = vand.u32 4294901760, %v16616_v26  ;;  %v29776_v0 = vand.u32 4294901760, %v17558_v40 }
 0xbf7   : > { %26793 = vmatpush3.bf16.msra.mxu1 %v26790_v24  ;;  %v17554_v24 = vpop.permute.xlu1 %17553 }
 0xbf8   : > { %26795 = vmatprep.subr.bf16.mxu1 %v26794_v61  ;;  %v26814_v41 = vpack.c.bf16 %v16624_v17, %v16617_v59 }
 0xbfa   : > { %25754 = vmatmul.mubr.f32.vlgmr.msra.gmra.mrb[66].mxu1 %v29726_v62 }
 0xbfb   : > { %26797 = vmatpush3.bf16.msra.mxu1 %v26794_v61  ;;  %25760 = vmatprep.mubr.f32.mxu1 %v29695_v16  ;;  %v23872_v16 = vld [vmem:[%s30024_s7 + $0x38] sm:$0x3]  ;;  %v17552_v61 = vpop.permute.xlu0 %17551 }
 0xbfc   : > { %26799 = vmatprep.subr.bf16.mxu1 %v26786_v10  ;;  %v17042_v57 = vsel %vm15470_vm2, %v23872_v16, 0  ;;  %v17564_v1 = vand.u32 4294901760, %v17552_v61 }
 0xbfe   : > { %v17652_v11 = vsub.f32 %v17552_v61, %v17564_v1 }
 0xc00   : > { %v17653_v38 = vand.u32 4294901760, %v17652_v11 }
 0xc02   : > { %25761 = vmatmul.mubr.f32.vlgmr.msra.gmra.mrb[66].mxu1 %v16084_v36  ;;  %v29764_v36 = vand.u32 4294901760, %v17042_v57 }
 0xc03   : > { %26801 = vmatpush3.bf16.msra.mxu1 %v26786_v10  ;;  %25767 = vmatprep.mubr.f32.mxu1 %v16075_v33  ;;  %v17140_v33 = vsub.f32 %v17035_v9, %v17048_v45 }
 0xc04   : > { %26803 = vmatprep.subr.bf16.mxu1 %v26802_v28  ;;  %v17122_v21 = vsub.f32 %v17042_v57, %v29764_v36 }
 0xc05   : > { %v17141_v50 = vand.u32 4294901760, %v17140_v33  ;;  %v26842_v2 = vpack.c.bf16 %v17140_v33, %v17133_v3 }
 0xc06   : > { %v17123_v60 = vand.u32 4294901760, %v17122_v21 }
 0xc07   : > { %v17142_v23 = vsub.f32 %v17140_v33, %v17141_v50 }
 0xc08   : > { %v17124_v13 = vsub.f32 %v17122_v21, %v17123_v60 }
 0xc0a   : > { %25768 = vmatmul.mubr.f32.vlgmr.msra.gmra.mrb[66].mxu1 %v16085_v25  ;;  %v17125_v35 = vand.u32 4294901760, %v17124_v13 }
 0xc0b   : > { %26805 = vmatpush3.bf16.msra.mxu1 %v26802_v28  ;;  %25774 = vmatprep.mubr.f32.mxu1 %v29689_v29  ;;  %v17567_v28 = vand.u32 4294901760, %v17554_v24 }
 0xc0c   : > { %26807 = vmatprep.subr.bf16.mxu1 %v26786_v10 }
 0xc0d   : > { %v17659_v39 = vsub.f32 %v17554_v24, %v17567_v28  ;;  %v26858_v53 = vpack.c.bf16 %v17567_v28, %v17564_v1 }
 0xc0f   : > { %v17660_v58 = vand.u32 4294901760, %v17659_v39 }
 0xc11   : > { %v17661_v63 = vsub.f32 %v17659_v39, %v17660_v58  ;;  %v26874_v4 = vpack.c.bf16 %v17660_v58, %v17653_v38 }
 0xc12   : > { %25775 = vmatmul.mubr.f32.vlgmr.msra.gmra.mrb[66].mxu1 %v29726_v62 }
 0xc13   : > { %26809 = vmatpush3.bf16.msra.mxu1 %v26786_v10  ;;  %25781 = vmatprep.mubr.f32.mxu1 %v29689_v29  ;;  %v29756_v29 = vand.u32 4294901760, %v17039_v44  ;;  %v17143_v10 = vand.u32 4294901760, %v17142_v23  ;;  %v17662_v26 = vand.u32 4294901760, %v17661_v63 }
 0xc14   : > { %26811 = vmatprep.subr.bf16.mxu1 %v26810_v15 }
 0xc15   : > { %v17112_v55 = vsub.f32 %v17039_v44, %v29756_v29  ;;  %v23876_v44 = vld [vmem:[%s30024_s7 + $0x58] sm:$0x3] }
 0xc16   : > { %v18080_v16 = vsel %vm15470_vm2, %v23876_v44, 0 }
 0xc17   : > { %v17113_v25 = vand.u32 4294901760, %v17112_v55 }
 0xc19   : > { %v17114_v46 = vsub.f32 %v17112_v55, %v17113_v25 }
 0xc1a   : > { %25782 = vmatmul.mubr.f32.vlgmr.msra.gmra.mrb[66].mxu1 %v29726_v62  ;;  %v17134_v62 = vand.u32 4294901760, %v17133_v3 }
 0xc1b   : > { %26813 = vmatpush3.bf16.msra.mxu1 %v26810_v15  ;;  %25788 = vmatprep.mubr.f32.mxu1 %v16596_v22  ;;  %v17115_v14 = vand.u32 4294901760, %v17114_v46  ;;  %v26866_v22 = vpack.c.bf16 %v17659_v39, %v17652_v11 }
 0xc1c   : > { %26815 = vmatprep.subr.bf16.mxu1 %v26814_v41  ;;  %v17135_v42 = vsub.f32 %v17133_v3, %v17134_v62  ;;  %v26850_v12 = vpack.c.bf16 %v17141_v50, %v17134_v62 }
 0xc1e   : > { %v17136_v27 = vand.u32 4294901760, %v17135_v42 }
 0xc20   : > { %v26838_v54 = vpack.c.bf16 %v17143_v10, %v17136_v27 }
 0xc22   : > { %25789 = vmatmul.mubr.f32.vlgmr.msra.gmra.mrb[66].mxu1 %v16606_v6  ;;  %v18073_v6 = vpop.permute.xlu1 %18072 }
 0xc23   : > { %26817 = vmatpush3.bf16.msra.mxu1 %v26814_v41  ;;  %25795 = vmatprep.mubr.f32.mxu1 %v29736_v19  ;;  %v23875_v41 = vld [vmem:[%s30024_s7 + $0x50] sm:$0xff] }
 0xc24   : > { %26819 = vmatprep.subr.bf16.mxu1 %v26818_v32  ;;  %v18077_v31 = vsel %vm15470_vm2, %v23875_v41, 0 }
 0xc25   : > { %v29796_v52 = vand.u32 4294901760, %v18077_v31 }
 0xc2a   : > { %25796 = vmatmul.mubr.f32.vlgmr.msra.gmra.mrb[66].mxu1 %v29744_v30 }
 0xc2b   : > { %26821 = vmatpush3.bf16.msra.mxu1 %v26818_v32  ;;  %25802 = vmatprep.mubr.f32.mxu1 %v16593_v8  ;;  %v29784_v8 = vand.u32 4294901760, %v17561_v20  ;;  %v18071_v32 = vpop.permute.xlu0 %18070 }
 0xc2c   : > { %26823 = vmatprep.subr.bf16.mxu1 %v26810_v15  ;;  %v18083_v9 = vand.u32 4294901760, %v18071_v32 }
 0xc2e   : > { %v18171_v47 = vsub.f32 %v18071_v32, %v18083_v9 }
 0xc30   : > { %v18172_v3 = vand.u32 4294901760, %v18171_v47 }
 0xc32   : > { %25803 = vmatmul.mubr.f32.vlgmr.msra.gmra.mrb[66].mxu1 %v16603_v7 }
 0xc33   : > { %26825 = vmatpush3.bf16.msra.mxu1 %v26810_v15  ;;  %25809 = vmatprep.mubr.f32.mxu1 %v16594_v37  ;;  %v17641_v37 = vsub.f32 %v17561_v20, %v29784_v8 }
 0xc34   : > { %26827 = vmatprep.subr.bf16.mxu1 %v26826_v49 }
 0xc35   : > { %v17642_v7 = vand.u32 4294901760, %v17641_v37 }
 0xc37   : > { %v17643_v17 = vsub.f32 %v17641_v37, %v17642_v7 }
 0xc3a   : > { %25810 = vmatmul.mubr.f32.vlgmr.msra.gmra.mrb[66].mxu1 %v16604_v18  ;;  %v17644_v18 = vand.u32 4294901760, %v17643_v17 }
 0xc3b   : > { %26829 = vmatpush3.bf16.msra.mxu1 %v26826_v49  ;;  %25816 = vmatprep.mubr.f32.mxu1 %v29736_v19  ;;  %v18086_v49 = vand.u32 4294901760, %v18073_v6 }
 0xc3c   : > { %26831 = vmatprep.subr.bf16.mxu1 %v26810_v15 }
 0xc3d   : > { %v18178_v45 = vsub.f32 %v18073_v6, %v18086_v49  ;;  %v26882_v62 = vpack.c.bf16 %v18086_v49, %v18083_v9 }
 0xc3f   : > { %v18179_v33 = vand.u32 4294901760, %v18178_v45 }
 0xc41   : > { %v18180_v50 = vsub.f32 %v18178_v45, %v18179_v33  ;;  %v26898_v13 = vpack.c.bf16 %v18179_v33, %v18172_v3 }
 0xc42   : > { %25817 = vmatmul.mubr.f32.vlgmr.msra.gmra.mrb[66].mxu1 %v29744_v30 }
 0xc43   : > { %26833 = vmatpush3.bf16.msra.mxu1 %v26810_v15  ;;  %25823 = vmatprep.mubr.f32.mxu1 %v29736_v19  ;;  %v17631_v19 = vsub.f32 %v17558_v40, %v29776_v0  ;;  %v18181_v42 = vand.u32 4294901760, %v18180_v50  ;;  %v23878_v40 = vld [vmem:[%s30024_s7 + $0x68] sm:$0x3] }
 0xc44   : > { %26835 = vmatprep.subr.bf16.mxu1 %v26834_v34  ;;  %v18599_v51 = vsel %vm15470_vm2, %v23878_v40, 0 }
 0xc45   : > { %v17632_v56 = vand.u32 4294901760, %v17631_v19 }
 0xc47   : > { %v17633_v43 = vsub.f32 %v17631_v19, %v17632_v56 }
 0xc49   : > { %v17634_v5 = vand.u32 4294901760, %v17633_v43 }
 0xc4a   : > { %25824 = vmatmul.mubr.f32.vlgmr.msra.gmra.mrb[66].mxu1 %v29744_v30  ;;  %v17654_v30 = vsub.f32 %v17652_v11, %v17653_v38 }
 0xc4b   : > { %26837 = vmatpush3.bf16.msra.mxu1 %v26834_v34  ;;  %25830 = vmatprep.mubr.f32.mxu1 %v17115_v14  ;;  %v26890_v14 = vpack.c.bf16 %v18178_v45, %v18171_v47 }
 0xc4c   : > { %26839 = vmatprep.subr.bf16.mxu1 %v26838_v54  ;;  %v17655_v15 = vand.u32 4294901760, %v17654_v30 }
 0xc4e   : > { %v26862_v59 = vpack.c.bf16 %v17662_v26, %v17655_v15 }
 0xc52   : > { %25831 = vmatmul.mubr.f32.vlgmr.msra.gmra.mrb[66].mxu1 %v17125_v35  ;;  %v18592_v35 = vpop.permute.xlu1 %18591 }
 0xc53   : > { %26841 = vmatpush3.bf16.msra.mxu1 %v26838_v54  ;;  %25837 = vmatprep.mubr.f32.mxu1 %v29756_v29  ;;  %v23877_v54 = vld [vmem:[%s30024_s7 + $0x60] sm:$0xff] }
 0xc54   : > { %26843 = vmatprep.subr.bf16.mxu1 %v26842_v2  ;;  %v18596_v48 = vsel %vm15470_vm2, %v23877_v54, 0 }
 0xc55   : > { %v29816_v61 = vand.u32 4294901760, %v18596_v48 }
 0xc5a   : > { %25838 = vmatmul.mubr.f32.vlgmr.msra.gmra.mrb[66].mxu1 %v29764_v36 }
 0xc5b   : > { %26845 = vmatpush3.bf16.msra.mxu1 %v26842_v2  ;;  %25844 = vmatprep.mubr.f32.mxu1 %v17112_v55  ;;  %v29804_v55 = vand.u32 4294901760, %v18080_v16  ;;  %v18590_v2 = vpop.permute.xlu0 %18589 }
 0xc5c   : > { %26847 = vmatprep.subr.bf16.mxu1 %v26834_v34  ;;  %v18602_v24 = vand.u32 4294901760, %v18590_v2 }
 0xc5e   : > { %v18690_v1 = vsub.f32 %v18590_v2, %v18602_v24 }
 0xc60   : > { %v18691_v11 = vand.u32 4294901760, %v18690_v1 }
 0xc62   : > { %25845 = vmatmul.mubr.f32.vlgmr.msra.gmra.mrb[66].mxu1 %v17122_v21 }
 0xc63   : > { %26849 = vmatpush3.bf16.msra.mxu1 %v26834_v34  ;;  %25851 = vmatprep.mubr.f32.mxu1 %v17113_v25  ;;  %v18160_v25 = vsub.f32 %v18080_v16, %v29804_v55 }
 0xc64   : > { %26851 = vmatprep.subr.bf16.mxu1 %v26850_v12 }
 0xc65   : > { %v18161_v21 = vand.u32 4294901760, %v18160_v25 }
 0xc67   : > { %v18162_v10 = vsub.f32 %v18160_v25, %v18161_v21 }
 0xc6a   : > { %25852 = vmatmul.mubr.f32.vlgmr.msra.gmra.mrb[66].mxu1 %v17123_v60  ;;  %v18163_v60 = vand.u32 4294901760, %v18162_v10 }
 0xc6b   : > { %26853 = vmatpush3.bf16.msra.mxu1 %v26850_v12  ;;  %25858 = vmatprep.mubr.f32.mxu1 %v29756_v29  ;;  %v18605_v12 = vand.u32 4294901760, %v18592_v35 }
 0xc6c   : > { %26855 = vmatprep.subr.bf16.mxu1 %v26834_v34 }
 0xc6d   : > { %v18697_v28 = vsub.f32 %v18592_v35, %v18605_v12  ;;  %v26906_v38 = vpack.c.bf16 %v18605_v12, %v18602_v24 }
 0xc6f   : > { %v18698_v39 = vand.u32 4294901760, %v18697_v28 }
 0xc71   : > { %v18699_v58 = vsub.f32 %v18697_v28, %v18698_v39  ;;  %v26922_v17 = vpack.c.bf16 %v18698_v39, %v18691_v11 }
 0xc72   : > { %25859 = vmatmul.mubr.f32.vlgmr.msra.gmra.mrb[66].mxu1 %v29764_v36 }
 0xc73   : > { %26857 = vmatpush3.bf16.msra.mxu1 %v26834_v34  ;;  %25865 = vmatprep.mubr.f32.mxu1 %v29756_v29  ;;  %v18150_v29 = vsub.f32 %v18077_v31, %v29796_v52  ;;  %v18700_v30 = vand.u32 4294901760, %v18699_v58  ;;  %v23880_v31 = vld [vmem:[%s30024_s7 + $0x78] sm:$0x3] }
 0xc74   : > { %26859 = vmatprep.subr.bf16.mxu1 %v26858_v53  ;;  %v19118_v44 = vsel %vm15470_vm2, %v23880_v31, 0 }
 0xc75   : > { %v18151_v57 = vand.u32 4294901760, %v18150_v29 }
 0xc77   : > { %v18152_v23 = vsub.f32 %v18150_v29, %v18151_v57 }
 0xc79   : > { %v18153_v46 = vand.u32 4294901760, %v18152_v23 }
 0xc7a   : > { %25866 = vmatmul.mubr.f32.vlgmr.msra.gmra.mrb[66].mxu1 %v29764_v36  ;;  %v18173_v36 = vsub.f32 %v18171_v47, %v18172_v3 }
 0xc7b   : > { %26861 = vmatpush3.bf16.msra.mxu1 %v26858_v53  ;;  %25872 = vmatprep.mubr.f32.mxu1 %v17634_v5  ;;  %v26914_v5 = vpack.c.bf16 %v18697_v28, %v18690_v1 }
 0xc7c   : > { %26863 = vmatprep.subr.bf16.mxu1 %v26862_v59  ;;  %v18174_v34 = vand.u32 4294901760, %v18173_v36 }
 0xc7e   : > { %v26886_v27 = vpack.c.bf16 %v18181_v42, %v18174_v34 }
 0xc82   : > { %25873 = vmatmul.mubr.f32.vlgmr.msra.gmra.mrb[66].mxu1 %v17644_v18  ;;  %v19111_v18 = vpop.permute.xlu1 %19110 }
 0xc83   : > { %26865 = vmatpush3.bf16.msra.mxu1 %v26862_v59  ;;  %25879 = vmatprep.mubr.f32.mxu1 %v29776_v0  ;;  %v23879_v59 = vld [vmem:[%s30024_s7 + $0x70] sm:$0xff] }
 0xc84   : > { %26867 = vmatprep.subr.bf16.mxu1 %v26866_v22  ;;  %v19115_v41 = vsel %vm15470_vm2, %v23879_v59, 0 }
 0xc85   : > { %v29836_v32 = vand.u32 4294901760, %v19115_v41 }
 0xc8a   : > { %25880 = vmatmul.mubr.f32.vlgmr.msra.gmra.mrb[66].mxu1 %v29784_v8 }
 0xc8b   : > { %26869 = vmatpush3.bf16.msra.mxu1 %v26866_v22  ;;  %25886 = vmatprep.mubr.f32.mxu1 %v17631_v19  ;;  %v29824_v19 = vand.u32 4294901760, %v18599_v51  ;;  %v19109_v22 = vpop.permute.xlu0 %19108 }
 0xc8c   : > { %26871 = vmatprep.subr.bf16.mxu1 %v26858_v53  ;;  %v19121_v6 = vand.u32 4294901760, %v19109_v22 }
 0xc8e   : > { %v19209_v9 = vsub.f32 %v19109_v22, %v19121_v6 }
 0xc90   : > { %v19210_v47 = vand.u32 4294901760, %v19209_v9 }
 0xc92   : > { %25887 = vmatmul.mubr.f32.vlgmr.msra.gmra.mrb[66].mxu1 %v17641_v37 }
 0xc93   : > { %26873 = vmatpush3.bf16.msra.mxu1 %v26858_v53  ;;  %25893 = vmatprep.mubr.f32.mxu1 %v17632_v56  ;;  %v18679_v56 = vsub.f32 %v18599_v51, %v29824_v19 }
 0xc94   : > { %26875 = vmatprep.subr.bf16.mxu1 %v26874_v4 }
 0xc95   : > { %v18680_v37 = vand.u32 4294901760, %v18679_v56 }
 0xc97   : > { %v18681_v26 = vsub.f32 %v18679_v56, %v18680_v37 }
 0xc9a   : > { %25894 = vmatmul.mubr.f32.vlgmr.msra.gmra.mrb[66].mxu1 %v17642_v7  ;;  %v18682_v7 = vand.u32 4294901760, %v18681_v26 }
 0xc9b   : > { %26877 = vmatpush3.bf16.msra.mxu1 %v26874_v4  ;;  %25900 = vmatprep.mubr.f32.mxu1 %v29776_v0  ;;  %v19124_v4 = vand.u32 4294901760, %v19111_v18 }
 0xc9c   : > { %26879 = vmatprep.subr.bf16.mxu1 %v26858_v53 }
 0xc9d   : > { %v19216_v49 = vsub.f32 %v19111_v18, %v19124_v4  ;;  %v26930_v3 = vpack.c.bf16 %v19124_v4, %v19121_v6 }
 0xc9f   : > { %v19217_v45 = vand.u32 4294901760, %v19216_v49 }
 0xca1   : > { %v19218_v33 = vsub.f32 %v19216_v49, %v19217_v45  ;;  %v26946_v10 = vpack.c.bf16 %v19217_v45, %v19210_v47 }
 0xca2   : > { %25901 = vmatmul.mubr.f32.vlgmr.msra.gmra.mrb[66].mxu1 %v29784_v8 }
 0xca3   : > { %26881 = vmatpush3.bf16.msra.mxu1 %v26858_v53  ;;  %25907 = vmatprep.mubr.f32.mxu1 %v29776_v0  ;;  %v18669_v0 = vsub.f32 %v18596_v48, %v29816_v61  ;;  %v19219_v36 = vand.u32 4294901760, %v19218_v33  ;;  %v23882_v48 = vld [vmem:[%s30024_s7 + $0x88] sm:$0x3] }
 0xca4   : > { %26883 = vmatprep.subr.bf16.mxu1 %v26882_v62  ;;  %v19637_v40 = vsel %vm15470_vm2, %v23882_v48, 0 }
 0xca5   : > { %v18670_v20 = vand.u32 4294901760, %v18669_v0 }
 0xca7   : > { %v18671_v63 = vsub.f32 %v18669_v0, %v18670_v20 }
 0xca9   : > { %v18672_v43 = vand.u32 4294901760, %v18671_v63 }
 0xcaa   : > { %25908 = vmatmul.mubr.f32.vlgmr.msra.gmra.mrb[66].mxu1 %v29784_v8  ;;  %v18692_v8 = vsub.f32 %v18690_v1, %v18691_v11 }
 0xcab   : > { %26885 = vmatpush3.bf16.msra.mxu1 %v26882_v62  ;;  %25914 = vmatprep.mubr.f32.mxu1 %v18153_v46  ;;  %v26938_v46 = vpack.c.bf16 %v19216_v49, %v19209_v9 }
 0xcac   : > { %26887 = vmatprep.subr.bf16.mxu1 %v26886_v27  ;;  %v18693_v53 = vand.u32 4294901760, %v18692_v8 }
 0xcae   : > { %v26910_v15 = vpack.c.bf16 %v18700_v30, %v18693_v53 }
 0xcb2   : > { %25915 = vmatmul.mubr.f32.vlgmr.msra.gmra.mrb[66].mxu1 %v18163_v60  ;;  %v19630_v60 = vpop.permute.xlu1 %19629 }
 0xcb3   : > { %26889 = vmatpush3.bf16.msra.mxu1 %v26886_v27  ;;  %25921 = vmatprep.mubr.f32.mxu1 %v29796_v52  ;;  %v23881_v27 = vld [vmem:[%s30024_s7 + $0x80] sm:$0xff] }
 0xcb4   : > { %26891 = vmatprep.subr.bf16.mxu1 %v26890_v14  ;;  %v19634_v54 = vsel %vm15470_vm2, %v23881_v27, 0 }
 0xcb5   : > { %v29856_v2 = vand.u32 4294901760, %v19634_v54 }
 0xcba   : > { %25922 = vmatmul.mubr.f32.vlgmr.msra.gmra.mrb[66].mxu1 %v29804_v55 }
 0xcbb   : > { %26893 = vmatpush3.bf16.msra.mxu1 %v26890_v14  ;;  %25928 = vmatprep.mubr.f32.mxu1 %v18150_v29  ;;  %v29844_v29 = vand.u32 4294901760, %v19118_v44  ;;  %v19628_v14 = vpop.permute.xlu0 %19627 }
 0xcbc   : > { %26895 = vmatprep.subr.bf16.mxu1 %v26882_v62  ;;  %v19640_v35 = vand.u32 4294901760, %v19628_v14 }
 0xcbe   : > { %v19728_v24 = vsub.f32 %v19628_v14, %v19640_v35 }
 0xcc0   : > { %v19729_v1 = vand.u32 4294901760, %v19728_v24 }
 0xcc2   : > { %25929 = vmatmul.mubr.f32.vlgmr.msra.gmra.mrb[66].mxu1 %v18160_v25 }
 0xcc3   : > { %26897 = vmatpush3.bf16.msra.mxu1 %v26882_v62  ;;  %25935 = vmatprep.mubr.f32.mxu1 %v18151_v57  ;;  %v19198_v57 = vsub.f32 %v19118_v44, %v29844_v29 }
 0xcc4   : > { %26899 = vmatprep.subr.bf16.mxu1 %v26898_v13 }
 0xcc5   : > { %v19199_v25 = vand.u32 4294901760, %v19198_v57 }
 0xcc7   : > { %v19200_v42 = vsub.f32 %v19198_v57, %v19199_v25 }
 0xcca   : > { %25936 = vmatmul.mubr.f32.vlgmr.msra.gmra.mrb[66].mxu1 %v18161_v21  ;;  %v19201_v21 = vand.u32 4294901760, %v19200_v42 }
 0xccb   : > { %26901 = vmatpush3.bf16.msra.mxu1 %v26898_v13  ;;  %25942 = vmatprep.mubr.f32.mxu1 %v29796_v52  ;;  %v19643_v13 = vand.u32 4294901760, %v19630_v60 }
 0xccc   : > { %26903 = vmatprep.subr.bf16.mxu1 %v26882_v62 }
 0xccd   : > { %v19735_v12 = vsub.f32 %v19630_v60, %v19643_v13  ;;  %v26954_v11 = vpack.c.bf16 %v19643_v13, %v19640_v35 }
 0xccf   : > { %v19736_v28 = vand.u32 4294901760, %v19735_v12 }
 0xcd1   : > { %v19737_v39 = vsub.f32 %v19735_v12, %v19736_v28  ;;  %v26970_v26 = vpack.c.bf16 %v19736_v28, %v19729_v1 }
 0xcd2   : > { %25943 = vmatmul.mubr.f32.vlgmr.msra.gmra.mrb[66].mxu1 %v29804_v55 }
 0xcd3   : > { %26905 = vmatpush3.bf16.msra.mxu1 %v26882_v62  ;;  %25949 = vmatprep.mubr.f32.mxu1 %v29796_v52  ;;  %v19188_v52 = vsub.f32 %v19115_v41, %v29836_v32  ;;  %v19738_v8 = vand.u32 4294901760, %v19737_v39  ;;  %v23884_v41 = vld [vmem:[%s30024_s7 + $0x98] sm:$0x3] }
 0xcd4   : > { %26907 = vmatprep.subr.bf16.mxu1 %v26906_v38  ;;  %v20156_v31 = vsel %vm15470_vm2, %v23884_v41, 0 }
 0xcd5   : > { %v19189_v16 = vand.u32 4294901760, %v19188_v52 }
 0xcd7   : > { %v19190_v50 = vsub.f32 %v19188_v52, %v19189_v16 }
 0xcd9   : > { %v19191_v23 = vand.u32 4294901760, %v19190_v50 }
 0xcda   : > { %25950 = vmatmul.mubr.f32.vlgmr.msra.gmra.mrb[66].mxu1 %v29804_v55  ;;  %v19211_v55 = vsub.f32 %v19209_v9, %v19210_v47 }
 0xcdb   : > { %26909 = vmatpush3.bf16.msra.mxu1 %v26906_v38  ;;  %25956 = vmatprep.mubr.f32.mxu1 %v18672_v43  ;;  %v26962_v43 = vpack.c.bf16 %v19735_v12, %v19728_v24 }
 0xcdc   : > { %26911 = vmatprep.subr.bf16.mxu1 %v26910_v15  ;;  %v19212_v62 = vand.u32 4294901760, %v19211_v55 }
 0xcde   : > { %v26934_v34 = vpack.c.bf16 %v19219_v36, %v19212_v62 }
 0xce2   : > { %25957 = vmatmul.mubr.f32.vlgmr.msra.gmra.mrb[66].mxu1 %v18682_v7  ;;  %v20149_v7 = vpop.permute.xlu1 %20148 }
 0xce3   : > { %26913 = vmatpush3.bf16.msra.mxu1 %v26910_v15  ;;  %25963 = vmatprep.mubr.f32.mxu1 %v29816_v61  ;;  %v23883_v15 = vld [vmem:[%s30024_s7 + $0x90] sm:$0xff] }
 0xce4   : > { %26915 = vmatprep.subr.bf16.mxu1 %v26914_v5  ;;  %v20153_v59 = vsel %vm15470_vm2, %v23883_v15, 0 }
 0xce5   : > { %v29876_v22 = vand.u32 4294901760, %v20153_v59 }
 0xcea   : > { %25964 = vmatmul.mubr.f32.vlgmr.msra.gmra.mrb[66].mxu1 %v29824_v19 }
 0xceb   : > { %26917 = vmatpush3.bf16.msra.mxu1 %v26914_v5  ;;  %25970 = vmatprep.mubr.f32.mxu1 %v18669_v0  ;;  %v29864_v0 = vand.u32 4294901760, %v19637_v40  ;;  %v20147_v5 = vpop.permute.xlu0 %20146 }
 0xcec   : > { %26919 = vmatprep.subr.bf16.mxu1 %v26906_v38  ;;  %v20159_v18 = vand.u32 4294901760, %v20147_v5 }
 0xcee   : > { %v20247_v6 = vsub.f32 %v20147_v5, %v20159_v18 }
 0xcf0   : > { %v20248_v9 = vand.u32 4294901760, %v20247_v6 }
 0xcf2   : > { %25971 = vmatmul.mubr.f32.vlgmr.msra.gmra.mrb[66].mxu1 %v18679_v56 }
 0xcf3   : > { %26921 = vmatpush3.bf16.msra.mxu1 %v26906_v38  ;;  %25977 = vmatprep.mubr.f32.mxu1 %v18670_v20  ;;  %v19717_v20 = vsub.f32 %v19637_v40, %v29864_v0 }
 0xcf4   : > { %26923 = vmatprep.subr.bf16.mxu1 %v26922_v17 }
 0xcf5   : > { %v19718_v56 = vand.u32 4294901760, %v19717_v20 }
 0xcf7   : > { %v19719_v30 = vsub.f32 %v19717_v20, %v19718_v56 }
 0xcfa   : > { %25978 = vmatmul.mubr.f32.vlgmr.msra.gmra.mrb[66].mxu1 %v18680_v37  ;;  %v19720_v37 = vand.u32 4294901760, %v19719_v30 }
 0xcfb   : > { %26925 = vmatpush3.bf16.msra.mxu1 %v26922_v17  ;;  %25984 = vmatprep.mubr.f32.mxu1 %v29816_v61  ;;  %v20162_v17 = vand.u32 4294901760, %v20149_v7 }
 0xcfc   : > { %26927 = vmatprep.subr.bf16.mxu1 %v26906_v38 }
 0xcfd   : > { %v20254_v4 = vsub.f32 %v20149_v7, %v20162_v17  ;;  %v26978_v47 = vpack.c.bf16 %v20162_v17, %v20159_v18 }
 0xcff   : > { %v20255_v49 = vand.u32 4294901760, %v20254_v4 }
 0xd01   : > { %v20256_v45 = vsub.f32 %v20254_v4, %v20255_v49  ;;  %v26994_v42 = vpack.c.bf16 %v20255_v49, %v20248_v9 }
 0xd02   : > { %25985 = vmatmul.mubr.f32.vlgmr.msra.gmra.mrb[66].mxu1 %v29824_v19 }
 0xd03   : > { %26929 = vmatpush3.bf16.msra.mxu1 %v26906_v38  ;;  %25991 = vmatprep.mubr.f32.mxu1 %v29816_v61  ;;  %v19707_v61 = vsub.f32 %v19634_v54, %v29856_v2  ;;  %v20257_v55 = vand.u32 4294901760, %v20256_v45  ;;  %v23886_v54 = vld [vmem:[%s30024_s7 + $0xa8] sm:$0x3] }
 0xd04   : > { %26931 = vmatprep.subr.bf16.mxu1 %v26930_v3  ;;  %v20675_v48 = vsel %vm15470_vm2, %v23886_v54, 0 }
 0xd05   : > { %v19708_v51 = vand.u32 4294901760, %v19707_v61 }
 0xd07   : > { %v19709_v58 = vsub.f32 %v19707_v61, %v19708_v51 }
 0xd09   : > { %v19710_v63 = vand.u32 4294901760, %v19709_v58 }
 0xd0a   : > { %25992 = vmatmul.mubr.f32.vlgmr.msra.gmra.mrb[66].mxu1 %v29824_v19  ;;  %v19730_v19 = vsub.f32 %v19728_v24, %v19729_v1 }
 0xd0b   : > { %26933 = vmatpush3.bf16.msra.mxu1 %v26930_v3  ;;  %25998 = vmatprep.mubr.f32.mxu1 %v19191_v23  ;;  %v26986_v23 = vpack.c.bf16 %v20254_v4, %v20247_v6 }
 0xd0c   : > { %26935 = vmatprep.subr.bf16.mxu1 %v26934_v34  ;;  %v19731_v38 = vand.u32 4294901760, %v19730_v19 }
 0xd0e   : > { %v26958_v53 = vpack.c.bf16 %v19738_v8, %v19731_v38 }
 0xd12   : > { %25999 = vmatmul.mubr.f32.vlgmr.msra.gmra.mrb[66].mxu1 %v19201_v21  ;;  %v20668_v21 = vpop.permute.xlu1 %20667 }
 0xd13   : > { %26937 = vmatpush3.bf16.msra.mxu1 %v26934_v34  ;;  %26005 = vmatprep.mubr.f32.mxu1 %v29836_v32  ;;  %v23885_v34 = vld [vmem:[%s30024_s7 + $0xa0] sm:$0xff] }
 0xd14   : > { %26939 = vmatprep.subr.bf16.mxu1 %v26938_v46  ;;  %v20672_v27 = vsel %vm15470_vm2, %v23885_v34, 0 }
 0xd15   : > { %v29896_v14 = vand.u32 4294901760, %v20672_v27 }
 0xd1a   : > { %26006 = vmatmul.mubr.f32.vlgmr.msra.gmra.mrb[66].mxu1 %v29844_v29 }
 0xd1b   : > { %26941 = vmatpush3.bf16.msra.mxu1 %v26938_v46  ;;  %26012 = vmatprep.mubr.f32.mxu1 %v19188_v52  ;;  %v29884_v52 = vand.u32 4294901760, %v20156_v31  ;;  %v20666_v46 = vpop.permute.xlu0 %20665 }
 0xd1c   : > { %26943 = vmatprep.subr.bf16.mxu1 %v26930_v3  ;;  %v20678_v60 = vand.u32 4294901760, %v20666_v46 }
 0xd1e   : > { %v20766_v35 = vsub.f32 %v20666_v46, %v20678_v60 }
 0xd20   : > { %v20767_v24 = vand.u32 4294901760, %v20766_v35 }
 0xd22   : > { %26013 = vmatmul.mubr.f32.vlgmr.msra.gmra.mrb[66].mxu1 %v19198_v57 }
 0xd23   : > { %26945 = vmatpush3.bf16.msra.mxu1 %v26930_v3  ;;  %26019 = vmatprep.mubr.f32.mxu1 %v19189_v16  ;;  %v20236_v16 = vsub.f32 %v20156_v31, %v29884_v52 }
 0xd24   : > { %26947 = vmatprep.subr.bf16.mxu1 %v26946_v10 }
 0xd25   : > { %v20237_v57 = vand.u32 4294901760, %v20236_v16 }
 0xd27   : > { %v20238_v36 = vsub.f32 %v20236_v16, %v20237_v57 }
 0xd2a   : > { %26020 = vmatmul.mubr.f32.vlgmr.msra.gmra.mrb[66].mxu1 %v19199_v25  ;;  %v20239_v25 = vand.u32 4294901760, %v20238_v36 }
 0xd2b   : > { %26949 = vmatpush3.bf16.msra.mxu1 %v26946_v10  ;;  %26026 = vmatprep.mubr.f32.mxu1 %v29836_v32  ;;  %v20681_v10 = vand.u32 4294901760, %v20668_v21 }
 0xd2c   : > { %26951 = vmatprep.subr.bf16.mxu1 %v26930_v3 }
 0xd2d   : > { %v20773_v13 = vsub.f32 %v20668_v21, %v20681_v10  ;;  %v27002_v1 = vpack.c.bf16 %v20681_v10, %v20678_v60 }
 0xd2f   : > { %v20774_v12 = vand.u32 4294901760, %v20773_v13 }
 0xd31   : > { %v20775_v28 = vsub.f32 %v20773_v13, %v20774_v12  ;;  %v27018_v30 = vpack.c.bf16 %v20774_v12, %v20767_v24 }
 0xd32   : > { %26027 = vmatmul.mubr.f32.vlgmr.msra.gmra.mrb[66].mxu1 %v29844_v29 }
 0xd33   : > { %26953 = vmatpush3.bf16.msra.mxu1 %v26930_v3  ;;  %26033 = vmatprep.mubr.f32.mxu1 %v29836_v32  ;;  %v20226_v32 = vsub.f32 %v20153_v59, %v29876_v22  ;;  %v20776_v19 = vand.u32 4294901760, %v20775_v28  ;;  %v23888_v59 = vld [vmem:[%s30024_s7 + $0xb8] sm:$0x3] }
 0xd34   : > { %26955 = vmatprep.subr.bf16.mxu1 %v26954_v11  ;;  %v21194_v41 = vsel %vm15470_vm2, %v23888_v59, 0 }
 0xd35   : > { %v20227_v44 = vand.u32 4294901760, %v20226_v32 }
 0xd37   : > { %v20228_v33 = vsub.f32 %v20226_v32, %v20227_v44 }
 0xd39   : > { %v20229_v50 = vand.u32 4294901760, %v20228_v33 }
 0xd3a   : > { %26034 = vmatmul.mubr.f32.vlgmr.msra.gmra.mrb[66].mxu1 %v29844_v29  ;;  %v20249_v29 = vsub.f32 %v20247_v6, %v20248_v9 }
 0xd3b   : > { %26957 = vmatpush3.bf16.msra.mxu1 %v26954_v11  ;;  %26040 = vmatprep.mubr.f32.mxu1 %v19710_v63  ;;  %v27010_v63 = vpack.c.bf16 %v20773_v13, %v20766_v35 }
 0xd3c   : > { %26959 = vmatprep.subr.bf16.mxu1 %v26958_v53  ;;  %v20250_v3 = vand.u32 4294901760, %v20249_v29 }
 0xd3e   : > { %v26982_v62 = vpack.c.bf16 %v20257_v55, %v20250_v3 }
 0xd42   : > { %26041 = vmatmul.mubr.f32.vlgmr.msra.gmra.mrb[66].mxu1 %v19720_v37  ;;  %v21187_v37 = vpop.permute.xlu1 %21186 }
 0xd43   : > { %26961 = vmatpush3.bf16.msra.mxu1 %v26958_v53  ;;  %26047 = vmatprep.mubr.f32.mxu1 %v29856_v2  ;;  %v23887_v53 = vld [vmem:[%s30024_s7 + $0xb0] sm:$0xff] }
 0xd44   : > { %26963 = vmatprep.subr.bf16.mxu1 %v26962_v43  ;;  %v21191_v15 = vsel %vm15470_vm2, %v23887_v53, 0 }
 0xd45   : > { %v29916_v5 = vand.u32 4294901760, %v21191_v15 }
 0xd4a   : > { %26048 = vmatmul.mubr.f32.vlgmr.msra.gmra.mrb[66].mxu1 %v29864_v0 }
 0xd4b   : > { %26965 = vmatpush3.bf16.msra.mxu1 %v26962_v43  ;;  %26054 = vmatprep.mubr.f32.mxu1 %v19707_v61  ;;  %v29904_v61 = vand.u32 4294901760, %v20675_v48  ;;  %v21185_v43 = vpop.permute.xlu0 %21184 }
 0xd4c   : > { %26967 = vmatprep.subr.bf16.mxu1 %v26954_v11  ;;  %v21197_v7 = vand.u32 4294901760, %v21185_v43 }
 0xd4e   : > { %v21285_v18 = vsub.f32 %v21185_v43, %v21197_v7 }
 0xd50   : > { %v21286_v6 = vand.u32 4294901760, %v21285_v18 }
 0xd52   : > { %26055 = vmatmul.mubr.f32.vlgmr.msra.gmra.mrb[66].mxu1 %v19717_v20 }
 0xd53   : > { %26969 = vmatpush3.bf16.msra.mxu1 %v26954_v11  ;;  %26061 = vmatprep.mubr.f32.mxu1 %v19708_v51  ;;  %v20755_v51 = vsub.f32 %v20675_v48, %v29904_v61 }
 0xd54   : > { %26971 = vmatprep.subr.bf16.mxu1 %v26970_v26 }
 0xd55   : > { %v20756_v20 = vand.u32 4294901760, %v20755_v51 }
 0xd57   : > { %v20757_v8 = vsub.f32 %v20755_v51, %v20756_v20 }
 0xd5a   : > { %26062 = vmatmul.mubr.f32.vlgmr.msra.gmra.mrb[66].mxu1 %v19718_v56  ;;  %v20758_v56 = vand.u32 4294901760, %v20757_v8 }
 0xd5b   : > { %26973 = vmatpush3.bf16.msra.mxu1 %v26970_v26  ;;  %26068 = vmatprep.mubr.f32.mxu1 %v29856_v2  ;;  %v21200_v26 = vand.u32 4294901760, %v21187_v37 }
 0xd5c   : > { %26975 = vmatprep.subr.bf16.mxu1 %v26954_v11 }
 0xd5d   : > { %v21292_v17 = vsub.f32 %v21187_v37, %v21200_v26  ;;  %v27026_v9 = vpack.c.bf16 %v21200_v26, %v21197_v7 }
 0xd5f   : > { %v21293_v4 = vand.u32 4294901760, %v21292_v17 }
 0xd61   : > { %v21294_v49 = vsub.f32 %v21292_v17, %v21293_v4  ;;  %v27042_v36 = vpack.c.bf16 %v21293_v4, %v21286_v6 }
 0xd62   : > { %26069 = vmatmul.mubr.f32.vlgmr.msra.gmra.mrb[66].mxu1 %v29864_v0 }
 0xd63   : > { %26977 = vmatpush3.bf16.msra.mxu1 %v26954_v11  ;;  %26075 = vmatprep.mubr.f32.mxu1 %v29856_v2  ;;  %v20745_v2 = vsub.f32 %v20672_v27, %v29896_v14  ;;  %v21295_v29 = vand.u32 4294901760, %v21294_v49  ;;  %v23890_v27 = vld [vmem:[%s30024_s7 + $0xc8] sm:$0x3] }
 0xd64   : > { %26979 = vmatprep.subr.bf16.mxu1 %v26978_v47  ;;  %v21713_v54 = vsel %vm15470_vm2, %v23890_v27, 0 }
 0xd65   : > { %v20746_v40 = vand.u32 4294901760, %v20745_v2 }
 0xd67   : > { %v20747_v39 = vsub.f32 %v20745_v2, %v20746_v40 }
 0xd69   : > { %v20748_v58 = vand.u32 4294901760, %v20747_v39 }
 0xd6a   : > { %26076 = vmatmul.mubr.f32.vlgmr.msra.gmra.mrb[66].mxu1 %v29864_v0  ;;  %v20768_v0 = vsub.f32 %v20766_v35, %v20767_v24 }
 0xd6b   : > { %26981 = vmatpush3.bf16.msra.mxu1 %v26978_v47  ;;  %26082 = vmatprep.mubr.f32.mxu1 %v20229_v50  ;;  %v27034_v50 = vpack.c.bf16 %v21292_v17, %v21285_v18 }
 0xd6c   : > { %26983 = vmatprep.subr.bf16.mxu1 %v26982_v62  ;;  %v20769_v11 = vand.u32 4294901760, %v20768_v0 }
 0xd6e   : > { %v27006_v38 = vpack.c.bf16 %v20776_v19, %v20769_v11 }
 0xd72   : > { %26083 = vmatmul.mubr.f32.vlgmr.msra.gmra.mrb[66].mxu1 %v20239_v25  ;;  %v21706_v25 = vpop.permute.xlu1 %21705 }
 0xd73   : > { %26985 = vmatpush3.bf16.msra.mxu1 %v26982_v62  ;;  %26089 = vmatprep.mubr.f32.mxu1 %v29876_v22  ;;  %v23889_v62 = vld [vmem:[%s30024_s7 + $0xc0] sm:$0xff] }
 0xd74   : > { %26987 = vmatprep.subr.bf16.mxu1 %v26986_v23  ;;  %v21710_v34 = vsel %vm15470_vm2, %v23889_v62, 0 }
 0xd75   : > { %v29936_v46 = vand.u32 4294901760, %v21710_v34 }
 0xd7a   : > { %26090 = vmatmul.mubr.f32.vlgmr.msra.gmra.mrb[66].mxu1 %v29884_v52 }
 0xd7b   : > { %26989 = vmatpush3.bf16.msra.mxu1 %v26986_v23  ;;  %26096 = vmatprep.mubr.f32.mxu1 %v20226_v32  ;;  %v29924_v32 = vand.u32 4294901760, %v21194_v41  ;;  %v21704_v23 = vpop.permute.xlu0 %21703 }
 0xd7c   : > { %26991 = vmatprep.subr.bf16.mxu1 %v26978_v47  ;;  %v21716_v21 = vand.u32 4294901760, %v21704_v23 }
 0xd7e   : > { %v21804_v60 = vsub.f32 %v21704_v23, %v21716_v21 }
 0xd80   : > { %v21805_v35 = vand.u32 4294901760, %v21804_v60 }
 0xd82   : > { %26097 = vmatmul.mubr.f32.vlgmr.msra.gmra.mrb[66].mxu1 %v20236_v16 }
 0xd83   : > { %26993 = vmatpush3.bf16.msra.mxu1 %v26978_v47  ;;  %26103 = vmatprep.mubr.f32.mxu1 %v20227_v44  ;;  %v21274_v44 = vsub.f32 %v21194_v41, %v29924_v32 }
 0xd84   : > { %26995 = vmatprep.subr.bf16.mxu1 %v26994_v42 }
 0xd85   : > { %v21275_v16 = vand.u32 4294901760, %v21274_v44 }
 0xd87   : > { %v21276_v55 = vsub.f32 %v21274_v44, %v21275_v16 }
 0xd8a   : > { %26104 = vmatmul.mubr.f32.vlgmr.msra.gmra.mrb[66].mxu1 %v20237_v57  ;;  %v21277_v57 = vand.u32 4294901760, %v21276_v55 }
 0xd8b   : > { %26997 = vmatpush3.bf16.msra.mxu1 %v26994_v42  ;;  %26110 = vmatprep.mubr.f32.mxu1 %v29876_v22  ;;  %v21719_v42 = vand.u32 4294901760, %v21706_v25 }
 0xd8c   : > { %26999 = vmatprep.subr.bf16.mxu1 %v26978_v47 }
 0xd8d   : > { %v21811_v10 = vsub.f32 %v21706_v25, %v21719_v42  ;;  %v27050_v24 = vpack.c.bf16 %v21719_v42, %v21716_v21 }
 0xd8f   : > { %v21812_v13 = vand.u32 4294901760, %v21811_v10 }
 0xd91   : > { %v21813_v12 = vsub.f32 %v21811_v10, %v21812_v13  ;;  %v27066_v8 = vpack.c.bf16 %v21812_v13, %v21805_v35 }
 0xd92   : > { %26111 = vmatmul.mubr.f32.vlgmr.msra.gmra.mrb[66].mxu1 %v29884_v52 }
 0xd93   : > { %27001 = vmatpush3.bf16.msra.mxu1 %v26978_v47  ;;  %26117 = vmatprep.mubr.f32.mxu1 %v29876_v22  ;;  %v21264_v22 = vsub.f32 %v21191_v15, %v29916_v5  ;;  %v21814_v0 = vand.u32 4294901760, %v21813_v12  ;;  %v23892_v15 = vld [vmem:[%s30024_s7 + $0xd8] sm:$0x3] }
 0xd94   : > { %27003 = vmatprep.subr.bf16.mxu1 %v27002_v1  ;;  %v22232_v59 = vsel %vm15470_vm2, %v23892_v15, 0 }
 0xd95   : > { %v21265_v31 = vand.u32 4294901760, %v21264_v22 }
 0xd97   : > { %v21266_v45 = vsub.f32 %v21264_v22, %v21265_v31 }
 0xd99   : > { %v21267_v33 = vand.u32 4294901760, %v21266_v45 }
 0xd9a   : > { %26118 = vmatmul.mubr.f32.vlgmr.msra.gmra.mrb[66].mxu1 %v29884_v52  ;;  %v21287_v52 = vsub.f32 %v21285_v18, %v21286_v6 }
 0xd9b   : > { %27005 = vmatpush3.bf16.msra.mxu1 %v27002_v1  ;;  %26124 = vmatprep.mubr.f32.mxu1 %v20748_v58  ;;  %v27058_v58 = vpack.c.bf16 %v21811_v10, %v21804_v60 }
 0xd9c   : > { %27007 = vmatprep.subr.bf16.mxu1 %v27006_v38  ;;  %v21288_v47 = vand.u32 4294901760, %v21287_v52 }
 0xd9e   : > { %v27030_v3 = vpack.c.bf16 %v21295_v29, %v21288_v47 }
 0xda2   : > { %26125 = vmatmul.mubr.f32.vlgmr.msra.gmra.mrb[66].mxu1 %v20758_v56  ;;  %v22225_v56 = vpop.permute.xlu1 %22224 }
 0xda3   : > { %27009 = vmatpush3.bf16.msra.mxu1 %v27006_v38  ;;  %26131 = vmatprep.mubr.f32.mxu1 %v29896_v14  ;;  %v23891_v38 = vld [vmem:[%s30024_s7 + $0xd0] sm:$0xff] }
 0xda4   : > { %27011 = vmatprep.subr.bf16.mxu1 %v27010_v63  ;;  %v22229_v53 = vsel %vm15470_vm2, %v23891_v38, 0 }
 0xda5   : > { %v29956_v43 = vand.u32 4294901760, %v22229_v53 }
 0xdaa   : > { %26132 = vmatmul.mubr.f32.vlgmr.msra.gmra.mrb[66].mxu1 %v29904_v61 }
 0xdab   : > { %27013 = vmatpush3.bf16.msra.mxu1 %v27010_v63  ;;  %26138 = vmatprep.mubr.f32.mxu1 %v20745_v2  ;;  %v29944_v2 = vand.u32 4294901760, %v21713_v54  ;;  %v22223_v63 = vpop.permute.xlu0 %22222 }
 0xdac   : > { %27015 = vmatprep.subr.bf16.mxu1 %v27002_v1  ;;  %v22235_v37 = vand.u32 4294901760, %v22223_v63 }
 0xdae   : > { %v22323_v7 = vsub.f32 %v22223_v63, %v22235_v37 }
 0xdb0   : > { %v22324_v18 = vand.u32 4294901760, %v22323_v7 }
 0xdb2   : > { %26139 = vmatmul.mubr.f32.vlgmr.msra.gmra.mrb[66].mxu1 %v20755_v51 }
 0xdb3   : > { %27017 = vmatpush3.bf16.msra.mxu1 %v27002_v1  ;;  %26145 = vmatprep.mubr.f32.mxu1 %v20746_v40  ;;  %v21793_v40 = vsub.f32 %v21713_v54, %v29944_v2 }
 0xdb4   : > { %27019 = vmatprep.subr.bf16.mxu1 %v27018_v30 }
 0xdb5   : > { %v21794_v51 = vand.u32 4294901760, %v21793_v40 }
 0xdb7   : > { %v21795_v19 = vsub.f32 %v21793_v40, %v21794_v51 }
 0xdba   : > { %26146 = vmatmul.mubr.f32.vlgmr.msra.gmra.mrb[66].mxu1 %v20756_v20  ;;  %v21796_v20 = vand.u32 4294901760, %v21795_v19 }
 0xdbb   : > { %27021 = vmatpush3.bf16.msra.mxu1 %v27018_v30  ;;  %26152 = vmatprep.mubr.f32.mxu1 %v29896_v14  ;;  %v22238_v30 = vand.u32 4294901760, %v22225_v56 }
 0xdbc   : > { %27023 = vmatprep.subr.bf16.mxu1 %v27002_v1 }
 0xdbd   : > { %v22330_v26 = vsub.f32 %v22225_v56, %v22238_v30  ;;  %v27074_v6 = vpack.c.bf16 %v22238_v30, %v22235_v37 }
 0xdbf   : > { %v22331_v17 = vand.u32 4294901760, %v22330_v26 }
 0xdc1   : > { %v22332_v4 = vsub.f32 %v22330_v26, %v22331_v17  ;;  %v27090_v55 = vpack.c.bf16 %v22331_v17, %v22324_v18 }
 0xdc2   : > { %26153 = vmatmul.mubr.f32.vlgmr.msra.gmra.mrb[66].mxu1 %v29904_v61 }
 0xdc3   : > { %27025 = vmatpush3.bf16.msra.mxu1 %v27002_v1  ;;  %26159 = vmatprep.mubr.f32.mxu1 %v29896_v14  ;;  %v21783_v14 = vsub.f32 %v21710_v34, %v29936_v46  ;;  %v22333_v52 = vand.u32 4294901760, %v22332_v4  ;;  %v23894_v34 = vld [vmem:[%s30024_s7 + $0xe8] sm:$0x3] }
 0xdc4   : > { %27027 = vmatprep.subr.bf16.mxu1 %v27026_v9  ;;  %v22751_v27 = vsel %vm15470_vm2, %v23894_v34, 0 }
 0xdc5   : > { %v21784_v48 = vand.u32 4294901760, %v21783_v14 }
 0xdc7   : > { %v21785_v28 = vsub.f32 %v21783_v14, %v21784_v48 }
 0xdc9   : > { %v21786_v39 = vand.u32 4294901760, %v21785_v28 }
 0xdca   : > { %26160 = vmatmul.mubr.f32.vlgmr.msra.gmra.mrb[66].mxu1 %v29904_v61  ;;  %v21806_v61 = vsub.f32 %v21804_v60, %v21805_v35 }
 0xdcb   : > { %27029 = vmatpush3.bf16.msra.mxu1 %v27026_v9  ;;  %26166 = vmatprep.mubr.f32.mxu1 %v21267_v33  ;;  %v27082_v33 = vpack.c.bf16 %v22330_v26, %v22323_v7 }
 0xdcc   : > { %27031 = vmatprep.subr.bf16.mxu1 %v27030_v3  ;;  %v21807_v1 = vand.u32 4294901760, %v21806_v61 }
 0xdce   : > { %v27054_v11 = vpack.c.bf16 %v21814_v0, %v21807_v1 }
 0xdd2   : > { %26167 = vmatmul.mubr.f32.vlgmr.msra.gmra.mrb[66].mxu1 %v21277_v57  ;;  %v22744_v57 = vpop.permute.xlu1 %22743 }
 0xdd3   : > { %27033 = vmatpush3.bf16.msra.mxu1 %v27030_v3  ;;  %26173 = vmatprep.mubr.f32.mxu1 %v29916_v5  ;;  %v23893_v3 = vld [vmem:[%s30024_s7 + $0xe0] sm:$0xff] }
 0xdd4   : > { %27035 = vmatprep.subr.bf16.mxu1 %v27034_v50  ;;  %v22748_v62 = vsel %vm15470_vm2, %v23893_v3, 0 }
 0xdd5   : > { %v29976_v23 = vand.u32 4294901760, %v22748_v62 }
 0xdda   : > { %26174 = vmatmul.mubr.f32.vlgmr.msra.gmra.mrb[66].mxu1 %v29924_v32 }
 0xddb   : > { %27037 = vmatpush3.bf16.msra.mxu1 %v27034_v50  ;;  %26180 = vmatprep.mubr.f32.mxu1 %v21264_v22  ;;  %v29964_v22 = vand.u32 4294901760, %v22232_v59  ;;  %v22742_v50 = vpop.permute.xlu0 %22741 }
 0xddc   : > { %27039 = vmatprep.subr.bf16.mxu1 %v27026_v9  ;;  %v22754_v25 = vand.u32 4294901760, %v22742_v50 }
 0xdde   : > { %v22842_v21 = vsub.f32 %v22742_v50, %v22754_v25 }
 0xde0   : > { %v22843_v60 = vand.u32 4294901760, %v22842_v21 }
 0xde2   : > { %26181 = vmatmul.mubr.f32.vlgmr.msra.gmra.mrb[66].mxu1 %v21274_v44 }
 0xde3   : > { %27041 = vmatpush3.bf16.msra.mxu1 %v27026_v9  ;;  %26187 = vmatprep.mubr.f32.mxu1 %v21265_v31  ;;  %v22312_v31 = vsub.f32 %v22232_v59, %v29964_v22 }
 0xde4   : > { %27043 = vmatprep.subr.bf16.mxu1 %v27042_v36 }
 0xde5   : > { %v22313_v44 = vand.u32 4294901760, %v22312_v31 }
 0xde7   : > { %v22314_v29 = vsub.f32 %v22312_v31, %v22313_v44 }
 0xdea   : > { %26188 = vmatmul.mubr.f32.vlgmr.msra.gmra.mrb[66].mxu1 %v21275_v16  ;;  %v22315_v16 = vand.u32 4294901760, %v22314_v29  ;;  %v15474_v29 = vld [vmem:[%s30025_s8 + $0x8] sm:$0x3] }
 0xdeb   : > { %27045 = vmatpush3.bf16.msra.mxu1 %v27042_v36  ;;  %26194 = vmatprep.mubr.f32.mxu1 %v29916_v5  ;;  %v22757_v36 = vand.u32 4294901760, %v22744_v57 }
 0xdec   : > { %27047 = vmatprep.subr.bf16.mxu1 %v27026_v9 }
 0xded   : > { %v22849_v42 = vsub.f32 %v22744_v57, %v22757_v36  ;;  %v27098_v35 = vpack.c.bf16 %v22757_v36, %v22754_v25 }
 0xdef   : > { %v22850_v10 = vand.u32 4294901760, %v22849_v42 }
 0xdf1   : > { %v22851_v13 = vsub.f32 %v22849_v42, %v22850_v10  ;;  %v27114_v19 = vpack.c.bf16 %v22850_v10, %v22843_v60 }
 0xdf2   : > { %26195 = vmatmul.mubr.f32.vlgmr.msra.gmra.mrb[66].mxu1 %v29924_v32 }
 0xdf3   : > { %27049 = vmatpush3.bf16.msra.mxu1 %v27026_v9  ;;  %26201 = vmatprep.mubr.f32.mxu1 %v29916_v5  ;;  %v22302_v5 = vsub.f32 %v22229_v53, %v29956_v43  ;;  %v22852_v61 = vand.u32 4294901760, %v22851_v13  ;;  %v23896_v53 = vld [vmem:[%s30024_s7 + $0xf8] sm:$0x3] }
 0xdf4   : > { %27051 = vmatprep.subr.bf16.mxu1 %v27050_v24  ;;  %v23270_v15 = vsel %vm15470_vm2, %v23896_v53, 0 }
 0xdf5   : > { %v22303_v41 = vand.u32 4294901760, %v22302_v5 }
 0xdf7   : > { %v22304_v49 = vsub.f32 %v22302_v5, %v22303_v41 }
 0xdf9   : > { %v22305_v45 = vand.u32 4294901760, %v22304_v49 }
 0xdfa   : > { %26202 = vmatmul.mubr.f32.vlgmr.msra.gmra.mrb[66].mxu1 %v29924_v32  ;;  %v22325_v32 = vsub.f32 %v22323_v7, %v22324_v18 }
 0xdfb   : > { %27053 = vmatpush3.bf16.msra.mxu1 %v27050_v24  ;;  %26208 = vmatprep.mubr.f32.mxu1 %v21786_v39  ;;  %v27106_v39 = vpack.c.bf16 %v22849_v42, %v22842_v21 }
 0xdfc   : > { %27055 = vmatprep.subr.bf16.mxu1 %v27054_v11  ;;  %v22326_v9 = vand.u32 4294901760, %v22325_v32 }
 0xdfe   : > { %v27078_v47 = vpack.c.bf16 %v22333_v52, %v22326_v9 }
 0xe02   : > { %26209 = vmatmul.mubr.f32.vlgmr.msra.gmra.mrb[66].mxu1 %v21796_v20  ;;  %v23263_v20 = vpop.permute.xlu1 %23262 }
 0xe03   : > { %27057 = vmatpush3.bf16.msra.mxu1 %v27054_v11  ;;  %26215 = vmatprep.mubr.f32.mxu1 %v29936_v46  ;;  %v23895_v11 = vld [vmem:[%s30024_s7 + $0xf0] sm:$0xff] }
 0xe04   : > { %27059 = vmatprep.subr.bf16.mxu1 %v27058_v58  ;;  %v23267_v38 = vsel %vm15470_vm2, %v23895_v11, 0 }
 0xe05   : > { %v23339_v63 = vand.u32 4294901760, %v23267_v38 }
 0xe0a   : > { %26216 = vmatmul.mubr.f32.vlgmr.msra.gmra.mrb[66].mxu1 %v29944_v2 }
 0xe0b   : > { %27061 = vmatpush3.bf16.msra.mxu1 %v27058_v58  ;;  %26222 = vmatprep.mubr.f32.mxu1 %v21783_v14  ;;  %v29984_v14 = vand.u32 4294901760, %v22751_v27  ;;  %v23261_v58 = vpop.permute.xlu0 %23260 }
 0xe0c   : > { %27063 = vmatprep.subr.bf16.mxu1 %v27050_v24  ;;  %v23273_v56 = vand.u32 4294901760, %v23261_v58 }
 0xe0e   : > { %v23361_v37 = vsub.f32 %v23261_v58, %v23273_v56 }
 0xe10   : > { %v23362_v7 = vand.u32 4294901760, %v23361_v37 }
 0xe12   : > { %26223 = vmatmul.mubr.f32.vlgmr.msra.gmra.mrb[66].mxu1 %v21793_v40 }
 0xe13   : > { %27065 = vmatpush3.bf16.msra.mxu1 %v27050_v24  ;;  %26229 = vmatprep.mubr.f32.mxu1 %v21784_v48  ;;  %v22831_v48 = vsub.f32 %v22751_v27, %v29984_v14 }
 0xe14   : > { %27067 = vmatprep.subr.bf16.mxu1 %v27066_v8 }
 0xe15   : > { %v22832_v40 = vand.u32 4294901760, %v22831_v48 }
 0xe17   : > { %v22833_v0 = vsub.f32 %v22831_v48, %v22832_v40 }
 0xe1a   : > { %26230 = vmatmul.mubr.f32.vlgmr.msra.gmra.mrb[66].mxu1 %v21794_v51  ;;  %v22834_v51 = vand.u32 4294901760, %v22833_v0 }
 0xe1b   : > { %27069 = vmatpush3.bf16.msra.mxu1 %v27066_v8  ;;  %26236 = vmatprep.mubr.f32.mxu1 %v29936_v46  ;;  %v23276_v8 = vand.u32 4294901760, %v23263_v20 }
 0xe1c   : > { %27071 = vmatprep.subr.bf16.mxu1 %v27050_v24 }
 0xe1d   : > { %v23368_v30 = vsub.f32 %v23263_v20, %v23276_v8  ;;  %v27122_v18 = vpack.c.bf16 %v23276_v8, %v23273_v56 }
 0xe1f   : > { %v23369_v26 = vand.u32 4294901760, %v23368_v30 }
 0xe21   : > { %v23370_v17 = vsub.f32 %v23368_v30, %v23369_v26 }
 0xe22   : > { %26237 = vmatmul.mubr.f32.vlgmr.msra.gmra.mrb[66].mxu1 %v29944_v2 }
 0xe23   : > { %27073 = vmatpush3.bf16.msra.mxu1 %v27050_v24  ;;  %26243 = vmatprep.mubr.f32.mxu1 %v29936_v46  ;;  %v22821_v46 = vsub.f32 %v22748_v62, %v29976_v23 }
 0xe24   : > { %27075 = vmatprep.subr.bf16.mxu1 %v27074_v6 }
 0xe25   : > { %v22822_v54 = vand.u32 4294901760, %v22821_v46 }
 0xe27   : > { %v22823_v12 = vsub.f32 %v22821_v46, %v22822_v54 }
 0xe29   : > { %v22824_v28 = vand.u32 4294901760, %v22823_v12 }
 0xe2a   : > { %26244 = vmatmul.mubr.f32.vlgmr.msra.gmra.mrb[66].mxu1 %v29944_v2  ;;  %v22844_v2 = vsub.f32 %v22842_v21, %v22843_v60 }
 0xe2b   : > { %27077 = vmatpush3.bf16.msra.mxu1 %v27074_v6  ;;  %26250 = vmatprep.mubr.f32.mxu1 %v22305_v45  ;;  %v27130_v45 = vpack.c.bf16 %v23368_v30, %v23361_v37 }
 0xe2c   : > { %27079 = vmatprep.subr.bf16.mxu1 %v27078_v47  ;;  %v22845_v24 = vand.u32 4294901760, %v22844_v2 }
 0xe2e   : > { %v27102_v1 = vpack.c.bf16 %v22852_v61, %v22845_v24 }
 0xe32   : > { %26251 = vmatmul.mubr.f32.vlgmr.msra.gmra.mrb[66].mxu1 %v22315_v16  ;;  %v15473_v16 = vld [vmem:[%s30025_s8] sm:$0xff] }
 0xe33   : > { %27081 = vmatpush3.bf16.msra.mxu1 %v27078_v47  ;;  %26257 = vmatprep.mubr.f32.mxu1 %v29956_v43  ;;  %v27138_v47 = vpack.c.bf16 %v23369_v26, %v23362_v7 }
 0xe34   : > { %27083 = vmatprep.subr.bf16.mxu1 %v27082_v33 }
 0xe3a   : > { %26258 = vmatmul.mubr.f32.vlgmr.msra.gmra.mrb[66].mxu1 %v29964_v22 }
 0xe3b   : > { %27085 = vmatpush3.bf16.msra.mxu1 %v27082_v33  ;;  %26264 = vmatprep.mubr.f32.mxu1 %v22302_v5  ;;  %v23349_v5 = vand.u32 4294901760, %v23270_v15 }
 0xe3c   : > { %27087 = vmatprep.subr.bf16.mxu1 %v27074_v6 }
 0xe42   : > { %26265 = vmatmul.mubr.f32.vlgmr.msra.gmra.mrb[66].mxu1 %v22312_v31 }
 0xe43   : > { %27089 = vmatpush3.bf16.msra.mxu1 %v27074_v6  ;;  %26271 = vmatprep.mubr.f32.mxu1 %v22303_v41  ;;  %v23350_v41 = vsub.f32 %v23270_v15, %v23349_v5 }
 0xe44   : > { %27091 = vmatprep.subr.bf16.mxu1 %v27090_v55 }
 0xe45   : > { %v23351_v31 = vand.u32 4294901760, %v23350_v41 }
 0xe47   : > { %v23352_v52 = vsub.f32 %v23350_v41, %v23351_v31 }
 0xe4a   : > { %26272 = vmatmul.mubr.f32.vlgmr.msra.gmra.mrb[66].mxu1 %v22313_v44  ;;  %v23353_v44 = vand.u32 4294901760, %v23352_v52 }
 0xe4b   : > { %27093 = vmatpush3.bf16.msra.mxu1 %v27090_v55  ;;  %26278 = vmatprep.mubr.f32.mxu1 %v29956_v43 }
 0xe4c   : > { %27095 = vmatprep.subr.bf16.mxu1 %v27074_v6 }
 0xe52   : > { %26279 = vmatmul.mubr.f32.vlgmr.msra.gmra.mrb[66].mxu1 %v29964_v22 }
 0xe53   : > { %27097 = vmatpush3.bf16.msra.mxu1 %v27074_v6  ;;  %26285 = vmatprep.mubr.f32.mxu1 %v29956_v43  ;;  %v23340_v43 = vsub.f32 %v23267_v38, %v23339_v63  ;;  %v23371_v6 = vand.u32 4294901760, %v23370_v17 }
 0xe54   : > { %27099 = vmatprep.subr.bf16.mxu1 %v27098_v35 }
 0xe55   : > { %v23341_v59 = vand.u32 4294901760, %v23340_v43 }
 0xe57   : > { %v23342_v4 = vsub.f32 %v23340_v43, %v23341_v59 }
 0xe59   : > { %v23343_v49 = vand.u32 4294901760, %v23342_v4 }
 0xe5a   : > { %26286 = vmatmul.mubr.f32.vlgmr.msra.gmra.mrb[66].mxu1 %v29964_v22  ;;  %v23363_v22 = vsub.f32 %v23361_v37, %v23362_v7 }
 0xe5b   : > { %27101 = vmatpush3.bf16.msra.mxu1 %v27098_v35  ;;  %26292 = vmatprep.mubr.f32.mxu1 %v22824_v28 }
 0xe5c   : > { %27103 = vmatprep.subr.bf16.mxu1 %v27102_v1  ;;  %v23364_v32 = vand.u32 4294901760, %v23363_v22 }
 0xe5e   : > { %v27126_v9 = vpack.c.bf16 %v23371_v6, %v23364_v32 }
 0xe62   : > { %26293 = vmatmul.mubr.f32.vlgmr.msra.gmra.mrb[66].mxu1 %v22834_v51 }
 0xe63   : > { %27105 = vmatpush3.bf16.msra.mxu1 %v27102_v1  ;;  %26299 = vmatprep.mubr.f32.mxu1 %v29976_v23 }
 0xe64   : > { %27107 = vmatprep.subr.bf16.mxu1 %v27106_v39 }
 0xe6a   : > { %26300 = vmatmul.mubr.f32.vlgmr.msra.gmra.mrb[66].mxu1 %v29984_v14 }
 0xe6b   : > { %27109 = vmatpush3.bf16.msra.mxu1 %v27106_v39  ;;  %26306 = vmatprep.mubr.f32.mxu1 %v22821_v46 }
 0xe6c   : > { %27111 = vmatprep.subr.bf16.mxu1 %v27098_v35 }
 0xe72   : > { %26307 = vmatmul.mubr.f32.vlgmr.msra.gmra.mrb[66].mxu1 %v22831_v48 }
 0xe73   : > { %27113 = vmatpush3.bf16.msra.mxu1 %v27098_v35  ;;  %26313 = vmatprep.mubr.f32.mxu1 %v22822_v54 }
 0xe74   : > { %27115 = vmatprep.subr.bf16.mxu1 %v27114_v19 }
 0xe7a   : > { %26314 = vmatmul.mubr.f32.vlgmr.msra.gmra.mrb[66].mxu1 %v22832_v40 }
 0xe7b   : > { %27117 = vmatpush3.bf16.msra.mxu1 %v27114_v19  ;;  %26320 = vmatprep.mubr.f32.mxu1 %v29976_v23 }
 0xe7c   : > { %27119 = vmatprep.subr.bf16.mxu1 %v27098_v35 }
 0xe82   : > { %26321 = vmatmul.mubr.f32.vlgmr.msra.gmra.mrb[66].mxu1 %v29984_v14 }
 0xe83   : > { %27121 = vmatpush3.bf16.msra.mxu1 %v27098_v35  ;;  %26327 = vmatprep.mubr.f32.mxu1 %v29976_v23 }
 0xe84   : > { %27123 = vmatprep.subr.bf16.mxu1 %v27122_v18 }
 0xe8a   : > { %26328 = vmatmul.mubr.f32.vlgmr.msra.gmra.mrb[66].mxu1 %v29984_v14 }
 0xe8b   : > { %27125 = vmatpush3.bf16.msra.mxu1 %v27122_v18  ;;  %26334 = vmatprep.mubr.f32.mxu1 %v23343_v49 }
 0xe8c   : > { %27127 = vmatprep.subr.bf16.mxu1 %v27126_v9 }
 0xe92   : > { %26335 = vmatmul.mubr.f32.vlgmr.msra.gmra.mrb[66].mxu1 %v23353_v44 }
 0xe93   : > { %27129 = vmatpush3.bf16.msra.mxu1 %v27126_v9  ;;  %26341 = vmatprep.mubr.f32.mxu1 %v23339_v63 }
 0xe94   : > { %27131 = vmatprep.subr.bf16.mxu1 %v27130_v45 }
 0xe9a   : > { %26342 = vmatmul.mubr.f32.vlgmr.msra.gmra.mrb[66].mxu1 %v23349_v5 }
 0xe9b   : > { %27133 = vmatpush3.bf16.msra.mxu1 %v27130_v45  ;;  %26348 = vmatprep.mubr.f32.mxu1 %v23340_v43 }
 0xe9c   : > { %27135 = vmatprep.subr.bf16.mxu1 %v27122_v18 }
 0xea2   : > { %26349 = vmatmul.mubr.f32.vlgmr.msra.gmra.mrb[66].mxu1 %v23350_v41 }
 0xea3   : > { %27137 = vmatpush3.bf16.msra.mxu1 %v27122_v18  ;;  %26355 = vmatprep.mubr.f32.mxu1 %v23341_v59 }
 0xea4   : > { %27139 = vmatprep.subr.bf16.mxu1 %v27138_v47 }
 0xeaa   : > { %26356 = vmatmul.mubr.f32.vlgmr.msra.gmra.mrb[66].mxu1 %v23351_v31 }
 0xeab   : > { %27141 = vmatpush3.bf16.msra.mxu1 %v27138_v47  ;;  %26362 = vmatprep.mubr.f32.mxu1 %v23339_v63 }
 0xeac   : > { %27143 = vmatprep.subr.bf16.mxu1 %v27122_v18 }
 0xeb2   : > { %26363 = vmatmul.mubr.f32.vlgmr.msra.gmra.mrb[66].mxu1 %v23349_v5 }
 0xeb3   : > { %27145 = vmatpush3.bf16.msra.mxu1 %v27122_v18  ;;  %26369 = vmatprep.mubr.f32.mxu1 %v23339_v63 }
 0xeba   : > { %26370 = vmatmul.mubr.f32.vlgmr.msra.gmra.mrb[66].mxu1 %v23349_v5 }
 0xf8d   : > { %v26371_v33 = vpop.f32.mrb[66].mxu1 }
 0xf8e   : > { %v27147_v3 = vadd.f32 %v26371_v33, %v15474_v29  ;;  %v23764_v55 = vpop.f32.mrb[67].mxu1 }
 0xf8f   : > { %v27148_v57 = vadd.f32 %v23764_v55, %v15473_v16 }
 0xf90   : > { %23779 = vst.msk [vmem:[%s332_s16 + $0x8] sm:$0x3] %vm23778_vm3, %v27147_v3 }
 0xf91   : > { %23777 = vst.msk [vmem:[%s332_s16] sm:$0xff] %vm23776_vm4, %v27148_v57 }
 0xf92 PF: > { %s19_s30 = sadd.s32 1, %s27623_s30  }
 0xf93   : > { %p16_p4 = scmp.ge.s32.totalorder %s19_s30, 4  }
 0xf95   :  { %18 = sbr.rel (!%p16_p4) target bundleno = 1 (0x1), region = 117 }

</bundles_post_ra>
